<compile_context>
chip_gen: v5e
topology: v5e:2x2
jax: 0.10.0
libtpu: 0.0.40
codegen_flags: <defaults>
</compile_context>

<pallas_src>
import jax
import jax.numpy as jnp
from jax.experimental import pallas as pl
from jax.experimental.pallas import tpu as pltpu


# ---------------------------------------------------------------------------
# Fused kernel: conv3x3/s1 + bias + ReLU  ->  (VMEM)  ->  conv3x3/s2 + bias + ReLU
#
# Layout inside the kernel: spatial is flattened into the sublane axis with row
# pitch P = W + 2 (the zero-padding columns are part of the pitch), channels sit
# in lanes.  A 3x3 tap (dy, dx) is then just a shifted contiguous (or stride-2 for
# the second conv) slab read, and each tap is a 2-D matmul contracting channels.
# The 2 "junk" columns per image row are masked to zero so that, when the layer-1
# slab is written back at offset P+1, they land exactly on the padding ring of the
# layer-2 input buffer.
# ---------------------------------------------------------------------------
def _make_stem_kernel(H, W, Cin, Cmid, Cout):
    P = W + 2                    # padded row pitch
    HS = H * P                   # layer-1 output slab rows (W valid + 2 junk per row)
    Ho, Wo = H // 2, W // 2
    OS = Ho * P                  # layer-2 output slab rows (stride-2 reads keep pitch P)

    def kernel(x_ref, w1_ref, b1_ref, w2_ref, b2_ref, mask_ref, o_ref, ypad_ref):
        # ----- layer 1: 3x3 conv, stride 1 — 9 shifted-slab matmuls, f32 accumulation
        acc1 = jnp.zeros((HS, Cmid), jnp.float32)
        for dy in range(3):
            for dx in range(3):
                patch = x_ref[0, pl.ds(dy * P + dx, HS), :].astype(jnp.bfloat16)
                acc1 = acc1 + jnp.dot(patch, w1_ref[dy * 3 + dx],
                                      preferred_element_type=jnp.float32)
        # BN scale already folded into w1; epilogue = bias + ReLU.  Mask zeroes the junk
        # columns so they land exactly on zero padding when written below.
        y1 = jnp.maximum(acc1 + b1_ref[...], 0.0) * mask_ref[...]

        # ----- intermediate activation never leaves VMEM
        ypad_ref[...] = jnp.zeros_like(ypad_ref)      # padding ring = 0
        ypad_ref[pl.ds(P + 1, HS), :] = y1            # interior (+ masked junk -> padding)

        # ----- layer 2: 3x3 conv, stride 2 — stride-2 sublane reads from the VMEM scratch
        acc2 = jnp.zeros((OS, Cout), jnp.float32)
        for dy in range(3):
            for dx in range(3):
                patch = ypad_ref[pl.ds(dy * P + dx, OS, stride=2), :].astype(jnp.bfloat16)
                acc2 = acc2 + jnp.dot(patch, w2_ref[dy * 3 + dx],
                                      preferred_element_type=jnp.float32)
        o_ref[0] = jnp.maximum(acc2 + b2_ref[...], 0.0).astype(o_ref.dtype)

    return kernel


# ---------------------------------------------------------------------------
# Wrapper: NCHW <-> NHWC plumbing, one-time zero pad, single pallas_call over batch.
# ---------------------------------------------------------------------------
@jax.jit
def stem_block_forward(x_nchw, params):
    w1, b1, w2, b2 = params["w1"], params["b1"], params["w2"], params["b2"]
    x = jnp.transpose(x_nchw, (0, 2, 3, 1)).astype(jnp.float32)      # NHWC
    N, H, W, Cin = x.shape
    assert H % 2 == 0 and W % 2 == 0, "StemBlock kernel assumes even spatial dims"
    Cmid, Cout = w1.shape[-1], w2.shape[-1]
    P = W + 2
    Ho, Wo = H // 2, W // 2
    HS = H * P
    OS = Ho * P

    # Zero pad: 1 ring of conv padding + 1 extra bottom row of slack so the shifted
    # flat reads inside the kernel stay in bounds.  (This is ~2*(H+W)/(H*W) extra
    # input bytes — nothing like the 9x of an im2col.)
    xp = jnp.pad(x, ((0, 0), (1, 2), (1, 1), (0, 0)))
    xflat = xp.reshape(N, (H + 3) * P, Cin)

    # Column-validity mask for the layer-1 slab (1 where the flat position is a real pixel).
    mask = (jnp.arange(HS, dtype=jnp.int32) % P < W).astype(jnp.float32).reshape(HS, 1)

    kernel = _make_stem_kernel(H, W, Cin, Cmid, Cout)

    flops = 2 * N * 9 * (HS * Cin * Cmid + OS * Cmid * Cout)
    bytes_accessed = (xflat.size * 4 + w1.size * 2 + w2.size * 2
                      + (b1.size + b2.size + mask.size) * 4 + N * OS * Cout * 4)

    out_flat = pl.pallas_call(
        kernel,
        out_shape=jax.ShapeDtypeStruct((N, OS, Cout), jnp.float32),
        grid=(N,),
        in_specs=[
            pl.BlockSpec((1, (H + 3) * P, Cin), lambda b: (b, 0, 0)),   # padded input tile
            pl.BlockSpec((9, Cin, Cmid), lambda b: (0, 0, 0)),          # conv1 weights (BN-folded, bf16)
            pl.BlockSpec((1, Cmid), lambda b: (0, 0)),                  # conv1 bias
            pl.BlockSpec((9, Cmid, Cout), lambda b: (0, 0, 0)),         # conv2 weights (BN-folded, bf16)
            pl.BlockSpec((1, Cout), lambda b: (0, 0)),                  # conv2 bias
            pl.BlockSpec((HS, 1), lambda b: (0, 0)),                    # junk-column mask
        ],
        out_specs=pl.BlockSpec((1, OS, Cout), lambda b: (b, 0, 0)),
        scratch_shapes=[pltpu.VMEM(((H + 3) * P, Cmid), jnp.float32)],  # VMEM-resident intermediate
        compiler_params=pltpu.CompilerParams(dimension_semantics=("parallel",)),
        cost_estimate=pl.CostEstimate(flops=flops, transcendentals=0,
                                      bytes_accessed=bytes_accessed),
    )(xflat, w1, b1, w2, b2, mask)

    # Drop the junk columns of the stride-2 slab (free XLA slice) and go back to NCHW.
    out = out_flat.reshape(N, Ho, P, Cout)[:, :, :Wo, :]
    return jnp.transpose(out, (0, 3, 1, 2))


# ---------------------------------------------------------------------------
# Parameter prep: synthetic Conv+BN params, BN folded into weights (eval mode).
# ---------------------------------------------------------------------------
def _init_conv_bn(key, cin, cout, eps=1e-5):
    kw, kg, kb, km, kv = jax.random.split(key, 5)
    fan_in = cin * 9
    w = jax.random.normal(kw, (3, 3, cin, cout), jnp.float32) / jnp.sqrt(fan_in)  # HWIO
    gamma = 1.0 + 0.1 * jax.random.normal(kg, (cout,), jnp.float32)
    beta = 0.1 * jax.random.normal(kb, (cout,), jnp.float32)
    mean = 0.1 * jax.random.normal(km, (cout,), jnp.float32)
    var = jnp.abs(jax.random.normal(kv, (cout,), jnp.float32)) + 0.5
    scale = gamma / jnp.sqrt(var + eps)
    return w * scale, beta - mean * scale        # (folded weight HWIO f32, bias f32)


def prepare_kernel_params(folded):
    (w1f, b1), (w2f, b2) = folded
    cin, cmid = w1f.shape[2], w1f.shape[3]
    cout = w2f.shape[3]
    return {
        "w1": w1f.reshape(9, cin, cmid).astype(jnp.bfloat16),
        "b1": b1.reshape(1, cmid).astype(jnp.float32),
        "w2": w2f.reshape(9, cmid, cout).astype(jnp.bfloat16),
        "b2": b2.reshape(1, cout).astype(jnp.float32),
    }


def stem_block_reference(x_nchw, folded):
    (w1f, b1), (w2f, b2) = folded
    dn = ("NHWC", "HWIO", "NHWC")
    x = jnp.transpose(x_nchw, (0, 2, 3, 1)).astype(jnp.float32)
    y = jax.lax.conv_general_dilated(x, w1f, (1, 1), ((1, 1), (1, 1)),
                                     dimension_numbers=dn,
                                     precision=jax.lax.Precision.HIGHEST)
    y = jnp.maximum(y + b1, 0.0)
    y = jax.lax.conv_general_dilated(y, w2f, (2, 2), ((1, 1), (1, 1)),
                                     dimension_numbers=dn,
                                     precision=jax.lax.Precision.HIGHEST)
    y = jnp.maximum(y + b2, 0.0)
    return jnp.transpose(y, (0, 3, 1, 2))


if __name__ == "__main__":
    batch, in_channels, out_channels, spatial = 2, 4, 8, 16

    key = jax.random.PRNGKey(0)
    kx, kp = jax.random.split(key)
    x = jax.random.normal(kx, (batch, in_channels, spatial, spatial), jnp.float32)

    k1, k2 = jax.random.split(kp)
    folded = (_init_conv_bn(k1, in_channels, out_channels // 2),
              _init_conv_bn(k2, out_channels // 2, out_channels))
    params = prepare_kernel_params(folded)

    out = jax.block_until_ready(stem_block_forward(x, params))

    expected_shape = (batch, out_channels, spatial // 2, spatial // 2)
    assert out.shape == expected_shape, (out.shape, expected_shape)
    assert bool(jnp.all(jnp.isfinite(out)))

    # Correctness vs. a pure-JAX reference (loose tolerance: kernel uses bf16 MXU inputs).
    ref = jax.block_until_ready(stem_block_reference(x, folded))
    max_err = float(jnp.max(jnp.abs(out - ref)))
    assert bool(jnp.allclose(out, ref, rtol=1e-1, atol=1e-1)), max_err

    print("KERNEL_OK")
</pallas_src>

<mosaic_0001>
module attributes {stable_mosaic.version = 11 : i64} {
  func.func @kernel(%arg0: i32, %arg1: memref<1x342x4xf32, #tpu.memory_space<vmem>>, %arg2: memref<9x4x4xbf16, #tpu.memory_space<vmem>>, %arg3: memref<1x4xf32, #tpu.memory_space<vmem>>, %arg4: memref<9x4x8xbf16, #tpu.memory_space<vmem>>, %arg5: memref<1x8xf32, #tpu.memory_space<vmem>>, %arg6: memref<288x1xf32, #tpu.memory_space<vmem>>, %arg7: memref<1x144x8xf32, #tpu.memory_space<vmem>>, %arg8: memref<342x4xf32, #tpu.memory_space<vmem>>) attributes {dimension_semantics = [#tpu.dimension_semantics<parallel>], iteration_bounds = array<i64: 2>, scalar_prefetch = 0 : i64, scratch_operands = 1 : i64, tpu.core_type = #tpu.core_type<tc>, window_params = [{transform_indices = @transform_0, window_bounds = array<i64: 1, 342, 4>}, {pipeline_mode = #tpu.pipeline_mode<synchronous>, transform_indices = @transform_1, window_bounds = array<i64: 9, 4, 4>}, {pipeline_mode = #tpu.pipeline_mode<synchronous>, transform_indices = @transform_2, window_bounds = array<i64: 1, 4>}, {pipeline_mode = #tpu.pipeline_mode<synchronous>, transform_indices = @transform_3, window_bounds = array<i64: 9, 4, 8>}, {pipeline_mode = #tpu.pipeline_mode<synchronous>, transform_indices = @transform_4, window_bounds = array<i64: 1, 8>}, {pipeline_mode = #tpu.pipeline_mode<synchronous>, transform_indices = @transform_5, window_bounds = array<i64: 288, 1>}, {transform_indices = @transform_6, window_bounds = array<i64: 1, 144, 8>}]} {
    %cst = arith.constant 0.000000e+00 : f32
    %0 = vector.broadcast %cst : f32 to vector<288x4xf32>
    %c0 = arith.constant 0 : index
    %c0_0 = arith.constant 0 : index
    %c0_1 = arith.constant 0 : index
    %1 = vector.load %arg1[%c0, %c0_0, %c0_1] : memref<1x342x4xf32, #tpu.memory_space<vmem>>, vector<1x288x4xf32>
    %2 = vector.shape_cast %1 : vector<1x288x4xf32> to vector<288x4xf32>
    %3 = arith.truncf %2 : vector<288x4xf32> to vector<288x4xbf16>
    %c0_2 = arith.constant 0 : index
    %c0_3 = arith.constant 0 : index
    %c0_4 = arith.constant 0 : index
    %4 = vector.load %arg2[%c0_2, %c0_3, %c0_4] : memref<9x4x4xbf16, #tpu.memory_space<vmem>>, vector<1x4x4xbf16>
    %5 = vector.shape_cast %4 : vector<1x4x4xbf16> to vector<4x4xbf16>
    %cst_5 = arith.constant dense<0.000000e+00> : vector<288x4xf32>
    %6 = tpu.matmul %3, %5, %cst_5 {dimension_numbers = #tpu.dot_dimension_numbers<[1], [0], [0], [1], [0, 0, 1, 1], [], []>} : vector<288x4xbf16>, vector<4x4xbf16>, vector<288x4xf32> -> vector<288x4xf32>
    %7 = arith.addf %0, %6 : vector<288x4xf32>
    %c0_6 = arith.constant 0 : index
    %c1 = arith.constant 1 : index
    %c0_7 = arith.constant 0 : index
    %8 = vector.load %arg1[%c0_6, %c1, %c0_7] : memref<1x342x4xf32, #tpu.memory_space<vmem>>, vector<1x288x4xf32>
    %9 = vector.shape_cast %8 : vector<1x288x4xf32> to vector<288x4xf32>
    %10 = arith.truncf %9 : vector<288x4xf32> to vector<288x4xbf16>
    %c1_8 = arith.constant 1 : index
    %c0_9 = arith.constant 0 : index
    %c0_10 = arith.constant 0 : index
    %11 = vector.load %arg2[%c1_8, %c0_9, %c0_10] : memref<9x4x4xbf16, #tpu.memory_space<vmem>>, vector<1x4x4xbf16>
    %12 = vector.shape_cast %11 : vector<1x4x4xbf16> to vector<4x4xbf16>
    %cst_11 = arith.constant dense<0.000000e+00> : vector<288x4xf32>
    %13 = tpu.matmul %10, %12, %cst_11 {dimension_numbers = #tpu.dot_dimension_numbers<[1], [0], [0], [1], [0, 0, 1, 1], [], []>} : vector<288x4xbf16>, vector<4x4xbf16>, vector<288x4xf32> -> vector<288x4xf32>
    %14 = arith.addf %7, %13 : vector<288x4xf32>
    %c0_12 = arith.constant 0 : index
    %c2 = arith.constant 2 : index
    %c0_13 = arith.constant 0 : index
    %15 = vector.load %arg1[%c0_12, %c2, %c0_13] : memref<1x342x4xf32, #tpu.memory_space<vmem>>, vector<1x288x4xf32>
    %16 = vector.shape_cast %15 : vector<1x288x4xf32> to vector<288x4xf32>
    %17 = arith.truncf %16 : vector<288x4xf32> to vector<288x4xbf16>
    %c2_14 = arith.constant 2 : index
    %c0_15 = arith.constant 0 : index
    %c0_16 = arith.constant 0 : index
    %18 = vector.load %arg2[%c2_14, %c0_15, %c0_16] : memref<9x4x4xbf16, #tpu.memory_space<vmem>>, vector<1x4x4xbf16>
    %19 = vector.shape_cast %18 : vector<1x4x4xbf16> to vector<4x4xbf16>
    %cst_17 = arith.constant dense<0.000000e+00> : vector<288x4xf32>
    %20 = tpu.matmul %17, %19, %cst_17 {dimension_numbers = #tpu.dot_dimension_numbers<[1], [0], [0], [1], [0, 0, 1, 1], [], []>} : vector<288x4xbf16>, vector<4x4xbf16>, vector<288x4xf32> -> vector<288x4xf32>
    %21 = arith.addf %14, %20 : vector<288x4xf32>
    %c0_18 = arith.constant 0 : index
    %c18 = arith.constant 18 : index
    %c0_19 = arith.constant 0 : index
    %22 = vector.load %arg1[%c0_18, %c18, %c0_19] : memref<1x342x4xf32, #tpu.memory_space<vmem>>, vector<1x288x4xf32>
    %23 = vector.shape_cast %22 : vector<1x288x4xf32> to vector<288x4xf32>
    %24 = arith.truncf %23 : vector<288x4xf32> to vector<288x4xbf16>
    %c3 = arith.constant 3 : index
    %c0_20 = arith.constant 0 : index
    %c0_21 = arith.constant 0 : index
    %25 = vector.load %arg2[%c3, %c0_20, %c0_21] : memref<9x4x4xbf16, #tpu.memory_space<vmem>>, vector<1x4x4xbf16>
    %26 = vector.shape_cast %25 : vector<1x4x4xbf16> to vector<4x4xbf16>
    %cst_22 = arith.constant dense<0.000000e+00> : vector<288x4xf32>
    %27 = tpu.matmul %24, %26, %cst_22 {dimension_numbers = #tpu.dot_dimension_numbers<[1], [0], [0], [1], [0, 0, 1, 1], [], []>} : vector<288x4xbf16>, vector<4x4xbf16>, vector<288x4xf32> -> vector<288x4xf32>
    %28 = arith.addf %21, %27 : vector<288x4xf32>
    %c0_23 = arith.constant 0 : index
    %c19 = arith.constant 19 : index
    %c0_24 = arith.constant 0 : index
    %29 = vector.load %arg1[%c0_23, %c19, %c0_24] : memref<1x342x4xf32, #tpu.memory_space<vmem>>, vector<1x288x4xf32>
    %30 = vector.shape_cast %29 : vector<1x288x4xf32> to vector<288x4xf32>
    %31 = arith.truncf %30 : vector<288x4xf32> to vector<288x4xbf16>
    %c4 = arith.constant 4 : index
    %c0_25 = arith.constant 0 : index
    %c0_26 = arith.constant 0 : index
    %32 = vector.load %arg2[%c4, %c0_25, %c0_26] : memref<9x4x4xbf16, #tpu.memory_space<vmem>>, vector<1x4x4xbf16>
    %33 = vector.shape_cast %32 : vector<1x4x4xbf16> to vector<4x4xbf16>
    %cst_27 = arith.constant dense<0.000000e+00> : vector<288x4xf32>
    %34 = tpu.matmul %31, %33, %cst_27 {dimension_numbers = #tpu.dot_dimension_numbers<[1], [0], [0], [1], [0, 0, 1, 1], [], []>} : vector<288x4xbf16>, vector<4x4xbf16>, vector<288x4xf32> -> vector<288x4xf32>
    %35 = arith.addf %28, %34 : vector<288x4xf32>
    %c0_28 = arith.constant 0 : index
    %c20 = arith.constant 20 : index
    %c0_29 = arith.constant 0 : index
    %36 = vector.load %arg1[%c0_28, %c20, %c0_29] : memref<1x342x4xf32, #tpu.memory_space<vmem>>, vector<1x288x4xf32>
    %37 = vector.shape_cast %36 : vector<1x288x4xf32> to vector<288x4xf32>
    %38 = arith.truncf %37 : vector<288x4xf32> to vector<288x4xbf16>
    %c5 = arith.constant 5 : index
    %c0_30 = arith.constant 0 : index
    %c0_31 = arith.constant 0 : index
    %39 = vector.load %arg2[%c5, %c0_30, %c0_31] : memref<9x4x4xbf16, #tpu.memory_space<vmem>>, vector<1x4x4xbf16>
    %40 = vector.shape_cast %39 : vector<1x4x4xbf16> to vector<4x4xbf16>
    %cst_32 = arith.constant dense<0.000000e+00> : vector<288x4xf32>
    %41 = tpu.matmul %38, %40, %cst_32 {dimension_numbers = #tpu.dot_dimension_numbers<[1], [0], [0], [1], [0, 0, 1, 1], [], []>} : vector<288x4xbf16>, vector<4x4xbf16>, vector<288x4xf32> -> vector<288x4xf32>
    %42 = arith.addf %35, %41 : vector<288x4xf32>
    %c0_33 = arith.constant 0 : index
    %c36 = arith.constant 36 : index
    %c0_34 = arith.constant 0 : index
    %43 = vector.load %arg1[%c0_33, %c36, %c0_34] : memref<1x342x4xf32, #tpu.memory_space<vmem>>, vector<1x288x4xf32>
    %44 = vector.shape_cast %43 : vector<1x288x4xf32> to vector<288x4xf32>
    %45 = arith.truncf %44 : vector<288x4xf32> to vector<288x4xbf16>
    %c6 = arith.constant 6 : index
    %c0_35 = arith.constant 0 : index
    %c0_36 = arith.constant 0 : index
    %46 = vector.load %arg2[%c6, %c0_35, %c0_36] : memref<9x4x4xbf16, #tpu.memory_space<vmem>>, vector<1x4x4xbf16>
    %47 = vector.shape_cast %46 : vector<1x4x4xbf16> to vector<4x4xbf16>
    %cst_37 = arith.constant dense<0.000000e+00> : vector<288x4xf32>
    %48 = tpu.matmul %45, %47, %cst_37 {dimension_numbers = #tpu.dot_dimension_numbers<[1], [0], [0], [1], [0, 0, 1, 1], [], []>} : vector<288x4xbf16>, vector<4x4xbf16>, vector<288x4xf32> -> vector<288x4xf32>
    %49 = arith.addf %42, %48 : vector<288x4xf32>
    %c0_38 = arith.constant 0 : index
    %c37 = arith.constant 37 : index
    %c0_39 = arith.constant 0 : index
    %50 = vector.load %arg1[%c0_38, %c37, %c0_39] : memref<1x342x4xf32, #tpu.memory_space<vmem>>, vector<1x288x4xf32>
    %51 = vector.shape_cast %50 : vector<1x288x4xf32> to vector<288x4xf32>
    %52 = arith.truncf %51 : vector<288x4xf32> to vector<288x4xbf16>
    %c7 = arith.constant 7 : index
    %c0_40 = arith.constant 0 : index
    %c0_41 = arith.constant 0 : index
    %53 = vector.load %arg2[%c7, %c0_40, %c0_41] : memref<9x4x4xbf16, #tpu.memory_space<vmem>>, vector<1x4x4xbf16>
    %54 = vector.shape_cast %53 : vector<1x4x4xbf16> to vector<4x4xbf16>
    %cst_42 = arith.constant dense<0.000000e+00> : vector<288x4xf32>
    %55 = tpu.matmul %52, %54, %cst_42 {dimension_numbers = #tpu.dot_dimension_numbers<[1], [0], [0], [1], [0, 0, 1, 1], [], []>} : vector<288x4xbf16>, vector<4x4xbf16>, vector<288x4xf32> -> vector<288x4xf32>
    %56 = arith.addf %49, %55 : vector<288x4xf32>
    %c0_43 = arith.constant 0 : index
    %c38 = arith.constant 38 : index
    %c0_44 = arith.constant 0 : index
    %57 = vector.load %arg1[%c0_43, %c38, %c0_44] : memref<1x342x4xf32, #tpu.memory_space<vmem>>, vector<1x288x4xf32>
    %58 = vector.shape_cast %57 : vector<1x288x4xf32> to vector<288x4xf32>
    %59 = arith.truncf %58 : vector<288x4xf32> to vector<288x4xbf16>
    %c8 = arith.constant 8 : index
    %c0_45 = arith.constant 0 : index
    %c0_46 = arith.constant 0 : index
    %60 = vector.load %arg2[%c8, %c0_45, %c0_46] : memref<9x4x4xbf16, #tpu.memory_space<vmem>>, vector<1x4x4xbf16>
    %61 = vector.shape_cast %60 : vector<1x4x4xbf16> to vector<4x4xbf16>
    %cst_47 = arith.constant dense<0.000000e+00> : vector<288x4xf32>
    %62 = tpu.matmul %59, %61, %cst_47 {dimension_numbers = #tpu.dot_dimension_numbers<[1], [0], [0], [1], [0, 0, 1, 1], [], []>} : vector<288x4xbf16>, vector<4x4xbf16>, vector<288x4xf32> -> vector<288x4xf32>
    %63 = arith.addf %56, %62 : vector<288x4xf32>
    %c0_48 = arith.constant 0 : index
    %c0_49 = arith.constant 0 : index
    %64 = vector.load %arg3[%c0_48, %c0_49] : memref<1x4xf32, #tpu.memory_space<vmem>>, vector<1x4xf32>
    %65 = vector.broadcast %64 : vector<1x4xf32> to vector<288x4xf32>
    %66 = arith.addf %63, %65 : vector<288x4xf32>
    %cst_50 = arith.constant 0.000000e+00 : f32
    %67 = vector.broadcast %cst_50 : f32 to vector<288x4xf32>
    %68 = arith.maximumf %66, %67 : vector<288x4xf32>
    %c0_51 = arith.constant 0 : index
    %c0_52 = arith.constant 0 : index
    %69 = vector.load %arg6[%c0_51, %c0_52] : memref<288x1xf32, #tpu.memory_space<vmem>>, vector<288x1xf32>
    %70 = vector.broadcast %69 : vector<288x1xf32> to vector<288x4xf32>
    %71 = arith.mulf %68, %70 : vector<288x4xf32>
    %cst_53 = arith.constant 0.000000e+00 : f32
    %72 = vector.broadcast %cst_53 : f32 to vector<342x4xf32>
    %c0_54 = arith.constant 0 : index
    %c0_55 = arith.constant 0 : index
    %73 = vector.load %arg8[%c0_54, %c0_55] : memref<342x4xf32, #tpu.memory_space<vmem>>, vector<342x4xf32>
    tpu.vector_store %arg8[%c0_54, %c0_55], %72 {strides = array<i32>} : memref<342x4xf32, #tpu.memory_space<vmem>>, vector<342x4xf32>,
    %c19_56 = arith.constant 19 : index
    %c0_57 = arith.constant 0 : index
    %74 = vector.load %arg8[%c19_56, %c0_57] : memref<342x4xf32, #tpu.memory_space<vmem>>, vector<288x4xf32>
    tpu.vector_store %arg8[%c19_56, %c0_57], %71 {strides = array<i32>} : memref<342x4xf32, #tpu.memory_space<vmem>>, vector<288x4xf32>,
    %cst_58 = arith.constant 0.000000e+00 : f32
    %75 = vector.broadcast %cst_58 : f32 to vector<144x8xf32>
    %c0_59 = arith.constant 0 : index
    %c0_60 = arith.constant 0 : index
    %76 = tpu.strided_load %arg8[%c0_59, %c0_60] {strides = array<i32: 2, 1>} : memref<342x4xf32, #tpu.memory_space<vmem>>, vector<144x4xf32>
    %77 = arith.truncf %76 : vector<144x4xf32> to vector<144x4xbf16>
    %c0_61 = arith.constant 0 : index
    %c0_62 = arith.constant 0 : index
    %c0_63 = arith.constant 0 : index
    %78 = vector.load %arg4[%c0_61, %c0_62, %c0_63] : memref<9x4x8xbf16, #tpu.memory_space<vmem>>, vector<1x4x8xbf16>
    %79 = vector.shape_cast %78 : vector<1x4x8xbf16> to vector<4x8xbf16>
    %cst_64 = arith.constant dense<0.000000e+00> : vector<144x8xf32>
    %80 = tpu.matmul %77, %79, %cst_64 {dimension_numbers = #tpu.dot_dimension_numbers<[1], [0], [0], [1], [0, 0, 1, 1], [], []>} : vector<144x4xbf16>, vector<4x8xbf16>, vector<144x8xf32> -> vector<144x8xf32>
    %81 = arith.addf %75, %80 : vector<144x8xf32>
    %c1_65 = arith.constant 1 : index
    %c0_66 = arith.constant 0 : index
    %82 = tpu.strided_load %arg8[%c1_65, %c0_66] {strides = array<i32: 2, 1>} : memref<342x4xf32, #tpu.memory_space<vmem>>, vector<144x4xf32>
    %83 = arith.truncf %82 : vector<144x4xf32> to vector<144x4xbf16>
    %c1_67 = arith.constant 1 : index
    %c0_68 = arith.constant 0 : index
    %c0_69 = arith.constant 0 : index
    %84 = vector.load %arg4[%c1_67, %c0_68, %c0_69] : memref<9x4x8xbf16, #tpu.memory_space<vmem>>, vector<1x4x8xbf16>
    %85 = vector.shape_cast %84 : vector<1x4x8xbf16> to vector<4x8xbf16>
    %cst_70 = arith.constant dense<0.000000e+00> : vector<144x8xf32>
    %86 = tpu.matmul %83, %85, %cst_70 {dimension_numbers = #tpu.dot_dimension_numbers<[1], [0], [0], [1], [0, 0, 1, 1], [], []>} : vector<144x4xbf16>, vector<4x8xbf16>, vector<144x8xf32> -> vector<144x8xf32>
    %87 = arith.addf %81, %86 : vector<144x8xf32>
    %c2_71 = arith.constant 2 : index
    %c0_72 = arith.constant 0 : index
    %88 = tpu.strided_load %arg8[%c2_71, %c0_72] {strides = array<i32: 2, 1>} : memref<342x4xf32, #tpu.memory_space<vmem>>, vector<144x4xf32>
    %89 = arith.truncf %88 : vector<144x4xf32> to vector<144x4xbf16>
    %c2_73 = arith.constant 2 : index
    %c0_74 = arith.constant 0 : index
    %c0_75 = arith.constant 0 : index
    %90 = vector.load %arg4[%c2_73, %c0_74, %c0_75] : memref<9x4x8xbf16, #tpu.memory_space<vmem>>, vector<1x4x8xbf16>
    %91 = vector.shape_cast %90 : vector<1x4x8xbf16> to vector<4x8xbf16>
    %cst_76 = arith.constant dense<0.000000e+00> : vector<144x8xf32>
    %92 = tpu.matmul %89, %91, %cst_76 {dimension_numbers = #tpu.dot_dimension_numbers<[1], [0], [0], [1], [0, 0, 1, 1], [], []>} : vector<144x4xbf16>, vector<4x8xbf16>, vector<144x8xf32> -> vector<144x8xf32>
    %93 = arith.addf %87, %92 : vector<144x8xf32>
    %c18_77 = arith.constant 18 : index
    %c0_78 = arith.constant 0 : index
    %94 = tpu.strided_load %arg8[%c18_77, %c0_78] {strides = array<i32: 2, 1>} : memref<342x4xf32, #tpu.memory_space<vmem>>, vector<144x4xf32>
    %95 = arith.truncf %94 : vector<144x4xf32> to vector<144x4xbf16>
    %c3_79 = arith.constant 3 : index
    %c0_80 = arith.constant 0 : index
    %c0_81 = arith.constant 0 : index
    %96 = vector.load %arg4[%c3_79, %c0_80, %c0_81] : memref<9x4x8xbf16, #tpu.memory_space<vmem>>, vector<1x4x8xbf16>
    %97 = vector.shape_cast %96 : vector<1x4x8xbf16> to vector<4x8xbf16>
    %cst_82 = arith.constant dense<0.000000e+00> : vector<144x8xf32>
    %98 = tpu.matmul %95, %97, %cst_82 {dimension_numbers = #tpu.dot_dimension_numbers<[1], [0], [0], [1], [0, 0, 1, 1], [], []>} : vector<144x4xbf16>, vector<4x8xbf16>, vector<144x8xf32> -> vector<144x8xf32>
    %99 = arith.addf %93, %98 : vector<144x8xf32>
    %c19_83 = arith.constant 19 : index
    %c0_84 = arith.constant 0 : index
    %100 = tpu.strided_load %arg8[%c19_83, %c0_84] {strides = array<i32: 2, 1>} : memref<342x4xf32, #tpu.memory_space<vmem>>, vector<144x4xf32>
    %101 = arith.truncf %100 : vector<144x4xf32> to vector<144x4xbf16>
    %c4_85 = arith.constant 4 : index
    %c0_86 = arith.constant 0 : index
    %c0_87 = arith.constant 0 : index
    %102 = vector.load %arg4[%c4_85, %c0_86, %c0_87] : memref<9x4x8xbf16, #tpu.memory_space<vmem>>, vector<1x4x8xbf16>
    %103 = vector.shape_cast %102 : vector<1x4x8xbf16> to vector<4x8xbf16>
    %cst_88 = arith.constant dense<0.000000e+00> : vector<144x8xf32>
    %104 = tpu.matmul %101, %103, %cst_88 {dimension_numbers = #tpu.dot_dimension_numbers<[1], [0], [0], [1], [0, 0, 1, 1], [], []>} : vector<144x4xbf16>, vector<4x8xbf16>, vector<144x8xf32> -> vector<144x8xf32>
    %105 = arith.addf %99, %104 : vector<144x8xf32>
    %c20_89 = arith.constant 20 : index
    %c0_90 = arith.constant 0 : index
    %106 = tpu.strided_load %arg8[%c20_89, %c0_90] {strides = array<i32: 2, 1>} : memref<342x4xf32, #tpu.memory_space<vmem>>, vector<144x4xf32>
    %107 = arith.truncf %106 : vector<144x4xf32> to vector<144x4xbf16>
    %c5_91 = arith.constant 5 : index
    %c0_92 = arith.constant 0 : index
    %c0_93 = arith.constant 0 : index
    %108 = vector.load %arg4[%c5_91, %c0_92, %c0_93] : memref<9x4x8xbf16, #tpu.memory_space<vmem>>, vector<1x4x8xbf16>
    %109 = vector.shape_cast %108 : vector<1x4x8xbf16> to vector<4x8xbf16>
    %cst_94 = arith.constant dense<0.000000e+00> : vector<144x8xf32>
    %110 = tpu.matmul %107, %109, %cst_94 {dimension_numbers = #tpu.dot_dimension_numbers<[1], [0], [0], [1], [0, 0, 1, 1], [], []>} : vector<144x4xbf16>, vector<4x8xbf16>, vector<144x8xf32> -> vector<144x8xf32>
    %111 = arith.addf %105, %110 : vector<144x8xf32>
    %c36_95 = arith.constant 36 : index
    %c0_96 = arith.constant 0 : index
    %112 = tpu.strided_load %arg8[%c36_95, %c0_96] {strides = array<i32: 2, 1>} : memref<342x4xf32, #tpu.memory_space<vmem>>, vector<144x4xf32>
    %113 = arith.truncf %112 : vector<144x4xf32> to vector<144x4xbf16>
    %c6_97 = arith.constant 6 : index
    %c0_98 = arith.constant 0 : index
    %c0_99 = arith.constant 0 : index
    %114 = vector.load %arg4[%c6_97, %c0_98, %c0_99] : memref<9x4x8xbf16, #tpu.memory_space<vmem>>, vector<1x4x8xbf16>
    %115 = vector.shape_cast %114 : vector<1x4x8xbf16> to vector<4x8xbf16>
    %cst_100 = arith.constant dense<0.000000e+00> : vector<144x8xf32>
    %116 = tpu.matmul %113, %115, %cst_100 {dimension_numbers = #tpu.dot_dimension_numbers<[1], [0], [0], [1], [0, 0, 1, 1], [], []>} : vector<144x4xbf16>, vector<4x8xbf16>, vector<144x8xf32> -> vector<144x8xf32>
    %117 = arith.addf %111, %116 : vector<144x8xf32>
    %c37_101 = arith.constant 37 : index
    %c0_102 = arith.constant 0 : index
    %118 = tpu.strided_load %arg8[%c37_101, %c0_102] {strides = array<i32: 2, 1>} : memref<342x4xf32, #tpu.memory_space<vmem>>, vector<144x4xf32>
    %119 = arith.truncf %118 : vector<144x4xf32> to vector<144x4xbf16>
    %c7_103 = arith.constant 7 : index
    %c0_104 = arith.constant 0 : index
    %c0_105 = arith.constant 0 : index
    %120 = vector.load %arg4[%c7_103, %c0_104, %c0_105] : memref<9x4x8xbf16, #tpu.memory_space<vmem>>, vector<1x4x8xbf16>
    %121 = vector.shape_cast %120 : vector<1x4x8xbf16> to vector<4x8xbf16>
    %cst_106 = arith.constant dense<0.000000e+00> : vector<144x8xf32>
    %122 = tpu.matmul %119, %121, %cst_106 {dimension_numbers = #tpu.dot_dimension_numbers<[1], [0], [0], [1], [0, 0, 1, 1], [], []>} : vector<144x4xbf16>, vector<4x8xbf16>, vector<144x8xf32> -> vector<144x8xf32>
    %123 = arith.addf %117, %122 : vector<144x8xf32>
    %c38_107 = arith.constant 38 : index
    %c0_108 = arith.constant 0 : index
    %124 = tpu.strided_load %arg8[%c38_107, %c0_108] {strides = array<i32: 2, 1>} : memref<342x4xf32, #tpu.memory_space<vmem>>, vector<144x4xf32>
    %125 = arith.truncf %124 : vector<144x4xf32> to vector<144x4xbf16>
    %c8_109 = arith.constant 8 : index
    %c0_110 = arith.constant 0 : index
    %c0_111 = arith.constant 0 : index
    %126 = vector.load %arg4[%c8_109, %c0_110, %c0_111] : memref<9x4x8xbf16, #tpu.memory_space<vmem>>, vector<1x4x8xbf16>
    %127 = vector.shape_cast %126 : vector<1x4x8xbf16> to vector<4x8xbf16>
    %cst_112 = arith.constant dense<0.000000e+00> : vector<144x8xf32>
    %128 = tpu.matmul %125, %127, %cst_112 {dimension_numbers = #tpu.dot_dimension_numbers<[1], [0], [0], [1], [0, 0, 1, 1], [], []>} : vector<144x4xbf16>, vector<4x8xbf16>, vector<144x8xf32> -> vector<144x8xf32>
    %129 = arith.addf %123, %128 : vector<144x8xf32>
    %c0_113 = arith.constant 0 : index
    %c0_114 = arith.constant 0 : index
    %130 = vector.load %arg5[%c0_113, %c0_114] : memref<1x8xf32, #tpu.memory_space<vmem>>, vector<1x8xf32>
    %131 = vector.broadcast %130 : vector<1x8xf32> to vector<144x8xf32>
    %132 = arith.addf %129, %131 : vector<144x8xf32>
    %cst_115 = arith.constant 0.000000e+00 : f32
    %133 = vector.broadcast %cst_115 : f32 to vector<144x8xf32>
    %134 = arith.maximumf %132, %133 : vector<144x8xf32>
    %c0_116 = arith.constant 0 : index
    %c0_117 = arith.constant 0 : index
    %c0_118 = arith.constant 0 : index
    %135 = vector.load %arg7[%c0_116, %c0_117, %c0_118] : memref<1x144x8xf32, #tpu.memory_space<vmem>>, vector<1x144x8xf32>
    %136 = vector.shape_cast %135 : vector<1x144x8xf32> to vector<144x8xf32>
    %137 = vector.shape_cast %134 : vector<144x8xf32> to vector<1x144x8xf32>
    tpu.vector_store %arg7[%c0_116, %c0_117, %c0_118], %137 {strides = array<i32>} : memref<1x144x8xf32, #tpu.memory_space<vmem>>, vector<1x144x8xf32>,
    return
  }
  func.func @transform_0(%arg0: i32) -> (i32, i32, i32) {
    %c0_i32 = arith.constant 0 : i32
    %c0_i32_0 = arith.constant 0 : i32
    %c0_i32_1 = arith.constant 0 : i32
    return %arg0, %c0_i32, %c0_i32_0 : i32, i32, i32
  }
  func.func @transform_1(%arg0: i32) -> (i32, i32, i32) {
    %c0_i32 = arith.constant 0 : i32
    %c0_i32_0 = arith.constant 0 : i32
    %c0_i32_1 = arith.constant 0 : i32
    %c0_i32_2 = arith.constant 0 : i32
    return %c0_i32, %c0_i32_0, %c0_i32_1 : i32, i32, i32
  }
  func.func @transform_2(%arg0: i32) -> (i32, i32) {
    %c0_i32 = arith.constant 0 : i32
    %c0_i32_0 = arith.constant 0 : i32
    %c0_i32_1 = arith.constant 0 : i32
    return %c0_i32, %c0_i32_0 : i32, i32
  }
  func.func @transform_3(%arg0: i32) -> (i32, i32, i32) {
    %c0_i32 = arith.constant 0 : i32
    %c0_i32_0 = arith.constant 0 : i32
    %c0_i32_1 = arith.constant 0 : i32
    %c0_i32_2 = arith.constant 0 : i32
    return %c0_i32, %c0_i32_0, %c0_i32_1 : i32, i32, i32
  }
  func.func @transform_4(%arg0: i32) -> (i32, i32) {
    %c0_i32 = arith.constant 0 : i32
    %c0_i32_0 = arith.constant 0 : i32
    %c0_i32_1 = arith.constant 0 : i32
    return %c0_i32, %c0_i32_0 : i32, i32
  }
  func.func @transform_5(%arg0: i32) -> (i32, i32) {
    %c0_i32 = arith.constant 0 : i32
    %c0_i32_0 = arith.constant 0 : i32
    %c0_i32_1 = arith.constant 0 : i32
    return %c0_i32, %c0_i32_0 : i32, i32
  }
  func.func @transform_6(%arg0: i32) -> (i32, i32, i32) {
    %c0_i32 = arith.constant 0 : i32
    %c0_i32_0 = arith.constant 0 : i32
    %c0_i32_1 = arith.constant 0 : i32
    return %arg0, %c0_i32, %c0_i32_0 : i32, i32, i32
  }
}

</mosaic_0001>

<bundles_post_ra>
// kernel: stem_block_forward.1
= control target key start
LH: loop header
LB: loop body
LE: loop exit
PB: predicated region body
PF: predicated region fallthrough
CT: control target
= control target key end

     0   :  { %s4539_s21 = smov 0   ;;  %s6260_s0 = inlined_call_operand.vmem [shape: f32[2,342,4], index: 0, kind: input, shape index: {}]   ;;  %s6261_s1 = inlined_call_operand.vmem [shape: bf16[9,4,4], index: 1, kind: input, shape index: {}]   ;;  %s6262_s2 = inlined_call_operand.vmem [shape: f32[1,4], index: 2, kind: input, shape index: {}]   ;;  %s6263_s3 = inlined_call_operand.vmem [shape: bf16[9,4,8], index: 3, kind: input, shape index: {}]   ;;  %s6264_s4 = inlined_call_operand.vmem [shape: f32[1,8], index: 4, kind: input, shape index: {}]   ;;  %s6265_s5 = inlined_call_operand.vmem [shape: f32[288,1], index: 5, kind: input, shape index: {}]   ;;  %s6266_s6 = inlined_call_operand.vmem [shape: f32[2,144,8], index: 6, kind: output, shape index: {}]  }
   0x1 LB: > { %s4205_s22 = sadd.s32 4294967295, %s4500_s21   ;;  %p4209_p0 = scmp.ge.s32.totalorder %s4500_s21, 1  ;;  %s4500_s21 = sphi %s4539_s21, %s16_s21  }
   0x2   : > { %p212_p1 = scmp.lt.s32.totalorder %s4500_s21, 3 }
   0x4   : > { %p213_p2 = pnand %p4209_p0, %p212_p1 }
   0x6   : > { %216 = sbr.rel (%p213_p2) target bundleno = 1407 (0x57f), region = 44 }
   0xb   : > { %v4212_v0 = vld [vmem:[%s6261_s1 + $0x2] sm:$0x3]  ;;  %vm419_vm0 = vcmask 1041408   ;;  %v307_v1 = vld [vmem:[%s6261_s1] sm:$0x3]  ;;  %p242_p3 = scmp.lt.s32.totalorder %s4205_s22, 1 }
   0xc   : > { %v421_v2 = vsel %vm419_vm0, %v4212_v0, 0  ;;  %v577_v3 = vsel %vm419_vm0, %v307_v1, 0  ;;  %v4249_v4 = vld [vmem:[%s6261_s1 + $0x4] sm:$0x3]  ;;  %v4287_v6 = vld [vmem:[%s6261_s1 + $0x8] sm:$0x3] }
   0xd   : > { %430 = vmatpush.bf16.msra.mxu0 %v421_v2  ;;  %4473 = vmatpush.bf16.msra.mxu3 %v421_v2  ;;  %v789_v5 = vsel %vm419_vm0, %v4249_v4, 0  ;;  %s6326_s22 = smov (!%p242_p3, %s4205_s22), 1  ;;  %v1285_v7 = vsel %vm419_vm0, %v4287_v6, 0  ;;  %vm364_vm1 = vcmask 31744   ;;  %v4268_v56 = vld [vmem:[%s6261_s1 + $0x6] sm:$0x3] }
   0xe   : > { %586 = vmatpush.bf16.msra.mxu1 %v577_v3  ;;  %798 = vmatpush.bf16.msra.mxu2 %v789_v5  ;;  %s4476_s7 = smul.u32 344, %s6326_s22  ;;  %v1037_v57 = vsel %vm419_vm0, %v4268_v56, 0  ;;  %vm4131_vm2 = vcmask 64512  }
   0xf   : > { %s4477_s11 = smul.u32 144, %s6326_s22 }
  0x10   : > { %s4569_s10 = scalar_lea.vmem %s6260_s0, %s4476_s7 }
  0x11   : > { %1294 = vmatpush.bf16.msrb.mxu0 %v1285_v7  ;;  %4474 = vmatpush.bf16.msrb.mxu3 %v577_v3  ;;  %v308_v8 = vld [vmem:[%s4569_s10 + $0x1] sm:$0xff]  ;;  %v309_v9 = vld [vmem:[%s4569_s10 + $0x9] sm:$0xff]  ;;  %v310_v20 = vld [vmem:[%s4569_s10 + $0x11] sm:$0xff]  ;;  %s6186_s14 = scalar_lea.vmem %s6266_s6, %s4477_s11 }
  0x12   : > { %v340_v10 = vld [vmem:[%s4569_s10 + $0x101] sm:$0xff]  ;;  %v344_v11 = vpack.c.bf16 %v309_v9, %v308_v8  ;;  %v341_v12 = vld [vmem:[%s4569_s10 + $0x109] sm:$0xff]  ;;  %v311_v21 = vld [vmem:[%s4569_s10 + $0x19] sm:$0xff] }
  0x13   : > { %v253_v13 = vld [vmem:[%s4569_s10] sm:$0xff]  ;;  %v254_v14 = vld [vmem:[%s4569_s10 + $0x8] sm:$0xff]  ;;  %v360_v15 = vpack.c.bf16 %v341_v12, %v340_v10  ;;  %v342_v22 = vld [vmem:[%s4569_s10 + $0x111] sm:$0xff]  ;;  %v345_v28 = vpack.c.bf16 %v311_v21, %v310_v20 }
  0x14   : > { %v289_v16 = vpack.c.bf16 %v254_v14, %v253_v13  ;;  %v678_v17 = vld [vmem:[%s4569_s10 + $0x2] sm:$0xff]  ;;  %v679_v18 = vld [vmem:[%s4569_s10 + $0xa] sm:$0xff]  ;;  %4213 = vmatmul.msk.bf16.vlgmr.msra.gmra.mxu0 %vm364_vm1, %v344_v11  ;;  %v343_v23 = vld [vmem:[%s4569_s10 + $0x119] sm:$0xff] }
  0x15   : > { %v714_v19 = vpack.c.bf16 %v679_v18, %v678_v17  ;;  %4229 = vmatmul.msk.bf16.vlgmr.msra.gmra.mxu3 %vm364_vm1, %v360_v15  ;;  %v255_v24 = vld [vmem:[%s4569_s10 + $0x10] sm:$0xff]  ;;  %v256_v25 = vld [vmem:[%s4569_s10 + $0x18] sm:$0xff]  ;;  %v361_v29 = vpack.c.bf16 %v343_v23, %v342_v22  ;;  %v312_v32 = vld [vmem:[%s4569_s10 + $0x21] sm:$0xff] }
  0x16   : > { %4231 = vmatmul.msk.bf16.vlgmr.msra.gmra.mxu1 %vm364_vm1, %v289_v16  ;;  %4475 = vmatpush.bf16.msra.mxu3 %v789_v5  ;;  %v680_v26 = vld [vmem:[%s4569_s10 + $0x12] sm:$0xff]  ;;  %v681_v27 = vld [vmem:[%s4569_s10 + $0x1a] sm:$0xff]  ;;  %v290_v30 = vpack.c.bf16 %v256_v25, %v255_v24  ;;  %v313_v33 = vld [vmem:[%s4569_s10 + $0x29] sm:$0xff] }
  0x17   : > { %4250 = vmatmul.msk.bf16.vlgmr.msra.gmra.mxu2 %vm364_vm1, %v714_v19  ;;  %v4591_v31 = vpack.c.bf16 %v681_v27, %v680_v26  ;;  %v257_v34 = vld [vmem:[%s4569_s10 + $0x20] sm:$0xff]  ;;  %v258_v35 = vld [vmem:[%s4569_s10 + $0x28] sm:$0xff]  ;;  %v346_v40 = vpack.c.bf16 %v313_v33, %v312_v32  ;;  %v314_v44 = vld [vmem:[%s4569_s10 + $0x31] sm:$0xff] }
  0x18   : > { %v285_v36 = vld [vmem:[%s4569_s10 + $0x100] sm:$0xff]  ;;  %v286_v37 = vld [vmem:[%s4569_s10 + $0x108] sm:$0xff]  ;;  %v291_v41 = vpack.c.bf16 %v258_v35, %v257_v34  ;;  %v259_v46 = vld [vmem:[%s4569_s10 + $0x30] sm:$0xff] }
  0x19   : > { %v682_v38 = vld [vmem:[%s4569_s10 + $0x22] sm:$0xff]  ;;  %v683_v39 = vld [vmem:[%s4569_s10 + $0x2a] sm:$0xff]  ;;  %v305_v42 = vpack.c.bf16 %v286_v37, %v285_v36  ;;  %v315_v45 = vld [vmem:[%s4569_s10 + $0x39] sm:$0xff] }
  0x1a   : > { %v4606_v43 = vpack.c.bf16 %v683_v39, %v682_v38  ;;  %v260_v47 = vld [vmem:[%s4569_s10 + $0x38] sm:$0xff]  ;;  %v287_v48 = vld [vmem:[%s4569_s10 + $0x110] sm:$0xff]  ;;  %v347_v52 = vpack.c.bf16 %v315_v45, %v314_v44  ;;  %v316_v58 = vld [vmem:[%s4569_s10 + $0x41] sm:$0xff] }
  0x1b   : > { %v288_v49 = vld [vmem:[%s4569_s10 + $0x118] sm:$0xff]  ;;  %v292_v53 = vpack.c.bf16 %v260_v47, %v259_v46  ;;  %v317_v59 = vld [vmem:[%s4569_s10 + $0x49] sm:$0xff]  ;;  %v261_v60 = vld [vmem:[%s4569_s10 + $0x40] sm:$0xff] }
  0x1c   : > { %v684_v50 = vld [vmem:[%s4569_s10 + $0x32] sm:$0xff]  ;;  %v685_v51 = vld [vmem:[%s4569_s10 + $0x3a] sm:$0xff]  ;;  %v306_v54 = vpack.c.bf16 %v288_v49, %v287_v48  ;;  %v262_v61 = vld [vmem:[%s4569_s10 + $0x48] sm:$0xff]  ;;  %v348_v2 = vpack.c.bf16 %v317_v59, %v316_v58 }
  0x1d   : > { %v4621_v55 = vpack.c.bf16 %v685_v51, %v684_v50  ;;  %v710_v62 = vld [vmem:[%s4569_s10 + $0x102] sm:$0xff]  ;;  %v711_v63 = vld [vmem:[%s4569_s10 + $0x10a] sm:$0xff]  ;;  %v293_v3 = vpack.c.bf16 %v262_v61, %v261_v60  ;;  %v319_v7 = vld [vmem:[%s4569_s10 + $0x59] sm:$0xff] }
  0x1e   : > { %v686_v0 = vld [vmem:[%s4569_s10 + $0x42] sm:$0xff]  ;;  %v687_v1 = vld [vmem:[%s4569_s10 + $0x4a] sm:$0xff]  ;;  %v4640_v4 = vpack.c.bf16 %v711_v63, %v710_v62  ;;  %v264_v9 = vld [vmem:[%s4569_s10 + $0x58] sm:$0xff] }
  0x1f   : > { %v4642_v5 = vpack.c.bf16 %v687_v1, %v686_v0  ;;  %v318_v6 = vld [vmem:[%s4569_s10 + $0x51] sm:$0xff]  ;;  %v713_v11 = vld [vmem:[%s4569_s10 + $0x11a] sm:$0xff]  ;;  %v321_v19 = vld [vmem:[%s4569_s10 + $0x69] sm:$0xff] }
  0x20   : > { %v263_v8 = vld [vmem:[%s4569_s10 + $0x50] sm:$0xff]  ;;  %v689_v13 = vld [vmem:[%s4569_s10 + $0x5a] sm:$0xff]  ;;  %v349_v14 = vpack.c.bf16 %v319_v7, %v318_v6  ;;  %v266_v21 = vld [vmem:[%s4569_s10 + $0x68] sm:$0xff] }
  0x21   : > { %v712_v10 = vld [vmem:[%s4569_s10 + $0x112] sm:$0xff]  ;;  %v294_v15 = vpack.c.bf16 %v264_v9, %v263_v8  ;;  %v320_v18 = vld [vmem:[%s4569_s10 + $0x61] sm:$0xff]  ;;  %v691_v23 = vld [vmem:[%s4569_s10 + $0x6a] sm:$0xff] }
  0x22   : > { %v688_v12 = vld [vmem:[%s4569_s10 + $0x52] sm:$0xff]  ;;  %v4658_v16 = vpack.c.bf16 %v713_v11, %v712_v10  ;;  %v265_v20 = vld [vmem:[%s4569_s10 + $0x60] sm:$0xff]  ;;  %v350_v24 = vpack.c.bf16 %v321_v19, %v320_v18  ;;  %v325_v37 = vld [vmem:[%s4569_s10 + $0x89] sm:$0xff] }
  0x23   : > { %v4660_v17 = vpack.c.bf16 %v689_v13, %v688_v12  ;;  %v690_v22 = vld [vmem:[%s4569_s10 + $0x62] sm:$0xff]  ;;  %v295_v25 = vpack.c.bf16 %v266_v21, %v265_v20  ;;  %v322_v27 = vld [vmem:[%s4569_s10 + $0x71] sm:$0xff]  ;;  %v693_v33 = vld [vmem:[%s4569_s10 + $0x7a] sm:$0xff] }
  0x24   : > { %4214 = vmatmul.msk.bf16.gmra.mxu0 %vm364_vm1, %v345_v28  ;;  %v4674_v26 = vpack.c.bf16 %v691_v23, %v690_v22  ;;  %v323_v28 = vld [vmem:[%s4569_s10 + $0x79] sm:$0xff]  ;;  %v270_v39 = vld [vmem:[%s4569_s10 + $0x88] sm:$0xff] }
  0x25   : > { %4230 = vmatmul.msk.bf16.gmra.mxu3 %vm364_vm1, %v361_v29  ;;  %v267_v29 = vld [vmem:[%s4569_s10 + $0x70] sm:$0xff]  ;;  %v351_v34 = vpack.c.bf16 %v323_v28, %v322_v27  ;;  %v269_v38 = vld [vmem:[%s4569_s10 + $0x80] sm:$0xff]  ;;  %v272_v58 = vld [vmem:[%s4569_s10 + $0x98] sm:$0xff] }
  0x26   : > { %4232 = vmatmul.msk.bf16.gmra.mxu1 %vm364_vm1, %v290_v30  ;;  %v268_v30 = vld [vmem:[%s4569_s10 + $0x78] sm:$0xff]  ;;  %v297_v45 = vpack.c.bf16 %v270_v39, %v269_v38  ;;  %v328_v13 = vld [vmem:[%s4569_s10 + $0xa1] sm:$0xff]  ;;  %v699_v20 = vld [vmem:[%s4569_s10 + $0xaa] sm:$0xff] }
  0x27   : > { %4251 = vmatmul.msk.bf16.gmra.mxu2 %vm364_vm1, %v4591_v31  ;;  %v692_v32 = vld [vmem:[%s4569_s10 + $0x72] sm:$0xff]  ;;  %v296_v35 = vpack.c.bf16 %v268_v30, %v267_v29  ;;  %v697_v60 = vld [vmem:[%s4569_s10 + $0x9a] sm:$0xff]  ;;  %v274_v18 = vld [vmem:[%s4569_s10 + $0xa8] sm:$0xff] }
  0x28   : > { %v4688_v36 = vpack.c.bf16 %v693_v33, %v692_v32  ;;  %v327_v56 = vld [vmem:[%s4569_s10 + $0x99] sm:$0xff]  ;;  %v698_v19 = vld [vmem:[%s4569_s10 + $0xa2] sm:$0xff]  ;;  %v330_v38 = vld [vmem:[%s4569_s10 + $0xb1] sm:$0xff] }
  0x29   : > { %v696_v59 = vld [vmem:[%s4569_s10 + $0x92] sm:$0xff]  ;;  %v4738_v28 = vpack.c.bf16 %v699_v20, %v698_v19 }
  0x2a   : > { %v331_v39 = vld [vmem:[%s4569_s10 + $0xb9] sm:$0xff] }
  0x34   : > { %4215 = vmatmul.msk.bf16.gmra.mxu0 %vm364_vm1, %v346_v40  ;;  %v694_v40 = vld [vmem:[%s4569_s10 + $0x82] sm:$0xff] }
  0x35   : > { %4247 = vmatmul.msk.bf16.vlgmr.msrb.gmra.mxu3 %vm364_vm1, %v305_v42 }
  0x36   : > { %4233 = vmatmul.msk.bf16.gmra.mxu1 %vm364_vm1, %v291_v41  ;;  %1046 = vmatpush.bf16.msrb.mxu3 %v1037_v57  ;;  %v695_v41 = vld [vmem:[%s4569_s10 + $0x8a] sm:$0xff] }
  0x37   : > { %4252 = vmatmul.msk.bf16.gmra.mxu2 %vm364_vm1, %v4606_v43  ;;  %v4702_v47 = vpack.c.bf16 %v695_v41, %v694_v40  ;;  %v271_v57 = vld [vmem:[%s4569_s10 + $0x90] sm:$0xff]  ;;  %v276_v41 = vld [vmem:[%s4569_s10 + $0xb8] sm:$0xff] }
  0x38   : > { %v298_v0 = vpack.c.bf16 %v272_v58, %v271_v57  ;;  %v275_v40 = vld [vmem:[%s4569_s10 + $0xb0] sm:$0xff] }
  0x44   : > { %4216 = vmatmul.msk.bf16.gmra.mxu0 %vm364_vm1, %v347_v52 }
  0x45   : > { %4248 = vmatmul.msk.bf16.gmra.mxu3 %vm364_vm1, %v306_v54  ;;  %v326_v54 = vld [vmem:[%s4569_s10 + $0x91] sm:$0xff] }
  0x46   : > { %4234 = vmatmul.msk.bf16.gmra.mxu1 %vm364_vm1, %v292_v53  ;;  %v353_v62 = vpack.c.bf16 %v327_v56, %v326_v54 }
  0x47   : > { %4253 = vmatmul.msk.bf16.gmra.mxu2 %vm364_vm1, %v4621_v55 }
  0x54   : > { %4217 = vmatmul.msk.bf16.gmra.mxu0 %vm364_vm1, %v348_v2 }
  0x55   : > { %4266 = vmatmul.msk.bf16.vlgmr.msra.gmra.mxu3 %vm364_vm1, %v4640_v4 }
  0x56   : > { %4235 = vmatmul.msk.bf16.gmra.mxu1 %vm364_vm1, %v293_v3  ;;  %v4720_v3 = vpack.c.bf16 %v697_v60, %v696_v59 }
  0x57   : > { %4254 = vmatmul.msk.bf16.gmra.mxu2 %vm364_vm1, %v4642_v5 }
  0x64   : > { %4218 = vmatmul.msk.bf16.gmra.mxu0 %vm364_vm1, %v349_v14  ;;  %v329_v14 = vld [vmem:[%s4569_s10 + $0xa9] sm:$0xff] }
  0x65   : > { %4267 = vmatmul.msk.bf16.gmra.mxu3 %vm364_vm1, %v4658_v16  ;;  %v354_v22 = vpack.c.bf16 %v329_v14, %v328_v13 }
  0x66   : > { %4236 = vmatmul.msk.bf16.gmra.mxu1 %vm364_vm1, %v294_v15  ;;  %v273_v15 = vld [vmem:[%s4569_s10 + $0xa0] sm:$0xff] }
  0x67   : > { %4255 = vmatmul.msk.bf16.gmra.mxu2 %vm364_vm1, %v4660_v17 }
  0x74   : > { %4219 = vmatmul.msk.bf16.gmra.mxu0 %vm364_vm1, %v350_v24  ;;  %v299_v24 = vpack.c.bf16 %v274_v18, %v273_v15 }
  0x75   : > { %4269 = vmatmul.msk.bf16.vlgmr.msrb.gmra.mxu3 %vm364_vm1, %v4591_v31  ;;  %v324_v31 = vld [vmem:[%s4569_s10 + $0x81] sm:$0xff] }
  0x76   : > { %4237 = vmatmul.msk.bf16.gmra.mxu1 %vm364_vm1, %v295_v25  ;;  %v352_v42 = vpack.c.bf16 %v325_v37, %v324_v31 }
  0x77   : > { %4256 = vmatmul.msk.bf16.gmra.mxu2 %vm364_vm1, %v4674_v26 }
  0x84   : > { %4220 = vmatmul.msk.bf16.gmra.mxu0 %vm364_vm1, %v351_v34 }
  0x85   : > { %4270 = vmatmul.msk.bf16.gmra.mxu3 %vm364_vm1, %v4606_v43 }
  0x86   : > { %4238 = vmatmul.msk.bf16.gmra.mxu1 %vm364_vm1, %v296_v35 }
  0x87   : > { %4257 = vmatmul.msk.bf16.gmra.mxu2 %vm364_vm1, %v4688_v36 }
  0x91   : > { %v432_v44 = vpop.f32.mrf.mxu0 }
  0x93   : > { %v588_v46 = vpop.f32.mrf.mxu1 }
  0x94   : > { %v589_v43 = vadd.f32 %v588_v46, %v432_v44  ;;  %4221 = vmatmul.msk.bf16.gmra.mxu0 %vm364_vm1, %v352_v42  ;;  %v700_v42 = vld [vmem:[%s4569_s10 + $0xb2] sm:$0xff]  ;;  %v701_v44 = vld [vmem:[%s4569_s10 + $0xba] sm:$0xff]  ;;  %v355_v46 = vpack.c.bf16 %v331_v39, %v330_v38 }
  0x95   : > { %4271 = vmatmul.msk.bf16.gmra.mxu3 %vm364_vm1, %v4621_v55 }
  0x96   : > { %4239 = vmatmul.msk.bf16.gmra.mxu1 %vm364_vm1, %v297_v45 }
  0x97   : > { %4258 = vmatmul.msk.bf16.gmra.mxu2 %vm364_vm1, %v4702_v47 }
  0x98   : > { %v512_v48 = vpop.f32.mrf.mxu3 }
  0x99   : > { %v434_v50 = vpop.f32.mrf.mxu0 }
  0x9a   : > { %v800_v49 = vpop.f32.mrf.mxu2 }
  0x9b   : > { %v4710_v51 = vadd.f32 %v800_v49, %v589_v43  ;;  %v590_v52 = vpop.f32.mrf.mxu1 }
  0x9c   : > { %v591_v53 = vadd.f32 %v590_v52, %v434_v50  ;;  %v300_v50 = vpack.c.bf16 %v276_v41, %v275_v40 }
  0xa0   : > { %v514_v61 = vpop.f32.mrf.mxu3 }
  0xa1   : > { %v437_v55 = vpop.f32.mrf.mxu0 }
  0xa2   : > { %v802_v63 = vpop.f32.mrf.mxu2 }
  0xa3   : > { %v4718_v1 = vadd.f32 %v802_v63, %v591_v53  ;;  %v593_v2 = vpop.f32.mrf.mxu1  ;;  %v4756_v53 = vpack.c.bf16 %v701_v44, %v700_v42  ;;  %v332_v63 = vld [vmem:[%s4569_s10 + $0xc1] sm:$0xff] }
  0xa4   : > { %v594_v6 = vadd.f32 %v593_v2, %v437_v55  ;;  %4222 = vmatmul.msk.bf16.gmra.mxu0 %vm364_vm1, %v353_v62  ;;  %v333_v55 = vld [vmem:[%s4569_s10 + $0xc9] sm:$0xff] }
  0xa5   : > { %4272 = vmatmul.msk.bf16.gmra.mxu3 %vm364_vm1, %v4642_v5  ;;  %v278_v2 = vld [vmem:[%s4569_s10 + $0xc8] sm:$0xff] }
  0xa6   : > { %4240 = vmatmul.msk.bf16.gmra.mxu1 %vm364_vm1, %v298_v0  ;;  %v277_v0 = vld [vmem:[%s4569_s10 + $0xc0] sm:$0xff] }
  0xa7   : > { %4259 = vmatmul.msk.bf16.gmra.mxu2 %vm364_vm1, %v4720_v3  ;;  %v301_v14 = vpack.c.bf16 %v278_v2, %v277_v0  ;;  %v707_v0 = vld [vmem:[%s4569_s10 + $0xea] sm:$0xff] }
  0xa8   : > { %v517_v7 = vpop.f32.mrf.mxu3 }
  0xa9   : > { %v439_v9 = vpop.f32.mrf.mxu0 }
  0xaa   : > { %v805_v8 = vpop.f32.mrf.mxu2 }
  0xab   : > { %v4728_v10 = vadd.f32 %v805_v8, %v594_v6  ;;  %v595_v11 = vpop.f32.mrf.mxu1  ;;  %v702_v6 = vld [vmem:[%s4569_s10 + $0xc2] sm:$0xff]  ;;  %v703_v8 = vld [vmem:[%s4569_s10 + $0xca] sm:$0xff] }
  0xac   : > { %v596_v12 = vadd.f32 %v595_v11, %v439_v9  ;;  %v356_v11 = vpack.c.bf16 %v333_v55, %v332_v63  ;;  %v4774_v18 = vpack.c.bf16 %v703_v8, %v702_v6  ;;  %v282_v63 = vld [vmem:[%s4569_s10 + $0xe8] sm:$0xff] }
  0xad   : > { %v706_v55 = vld [vmem:[%s4569_s10 + $0xe2] sm:$0xff] }
  0xb0   : > { %v519_v21 = vpop.f32.mrf.mxu3 }
  0xb1   : > { %v442_v5 = vpop.f32.mrf.mxu0 }
  0xb2   : > { %v807_v23 = vpop.f32.mrf.mxu2 }
  0xb3   : > { %v4736_v25 = vadd.f32 %v807_v23, %v596_v12  ;;  %v598_v27 = vpop.f32.mrf.mxu1 }
  0xb4   : > { %v599_v29 = vadd.f32 %v598_v27, %v442_v5  ;;  %4223 = vmatmul.msk.bf16.gmra.mxu0 %vm364_vm1, %v354_v22 }
  0xb5   : > { %4273 = vmatmul.msk.bf16.gmra.mxu3 %vm364_vm1, %v4660_v17 }
  0xb6   : > { %4241 = vmatmul.msk.bf16.gmra.mxu1 %vm364_vm1, %v299_v24 }
  0xb7   : > { %4260 = vmatmul.msk.bf16.gmra.mxu2 %vm364_vm1, %v4738_v28 }
  0xb8   : > { %v668_v30 = vpop.f32.mrf.mxu3 }
  0xb9   : > { %v669_v32 = vadd.f32 %v668_v30, %v512_v48  ;;  %v444_v34 = vpop.f32.mrf.mxu0  ;;  %v335_v30 = vld [vmem:[%s4569_s10 + $0xd9] sm:$0xff] }
  0xba   : > { %v810_v33 = vpop.f32.mrf.mxu2 }
  0xbb   : > { %v4746_v35 = vadd.f32 %v810_v33, %v599_v29  ;;  %v600_v31 = vpop.f32.mrf.mxu1  ;;  %v334_v29 = vld [vmem:[%s4569_s10 + $0xd1] sm:$0xff] }
  0xbc   : > { %v601_v37 = vadd.f32 %v600_v31, %v444_v34  ;;  %v279_v33 = vld [vmem:[%s4569_s10 + $0xd0] sm:$0xff]  ;;  %v280_v34 = vld [vmem:[%s4569_s10 + $0xd8] sm:$0xff] }
  0xbd   : > { %v704_v31 = vld [vmem:[%s4569_s10 + $0xd2] sm:$0xff]  ;;  %v302_v42 = vpack.c.bf16 %v280_v34, %v279_v33 }
  0xc0   : > { %v670_v45 = vpop.f32.mrf.mxu3 }
  0xc1   : > { %v671_v17 = vadd.f32 %v670_v45, %v514_v61  ;;  %v447_v49 = vpop.f32.mrf.mxu0 }
  0xc2   : > { %v812_v43 = vpop.f32.mrf.mxu2 }
  0xc3   : > { %v4754_v48 = vadd.f32 %v812_v43, %v601_v37  ;;  %v603_v52 = vpop.f32.mrf.mxu1  ;;  %v705_v37 = vld [vmem:[%s4569_s10 + $0xda] sm:$0xff] }
  0xc4   : > { %v604_v54 = vadd.f32 %v603_v52, %v447_v49  ;;  %4224 = vmatmul.msk.bf16.gmra.mxu0 %vm364_vm1, %v355_v46  ;;  %v4796_v45 = vpack.c.bf16 %v705_v37, %v704_v31  ;;  %v338_v37 = vld [vmem:[%s4569_s10 + $0xf1] sm:$0xff] }
  0xc5   : > { %4274 = vmatmul.msk.bf16.gmra.mxu3 %vm364_vm1, %v4674_v26 }
  0xc6   : > { %4242 = vmatmul.msk.bf16.gmra.mxu1 %vm364_vm1, %v300_v50 }
  0xc7   : > { %4261 = vmatmul.msk.bf16.gmra.mxu2 %vm364_vm1, %v4756_v53 }
  0xc8   : > { %v673_v56 = vpop.f32.mrf.mxu3 }
  0xc9   : > { %v674_v57 = vadd.f32 %v673_v56, %v517_v7  ;;  %v449_v59 = vpop.f32.mrf.mxu0 }
  0xca   : > { %v815_v58 = vpop.f32.mrf.mxu2 }
  0xcb   : > { %v4764_v60 = vadd.f32 %v815_v58, %v604_v54  ;;  %v605_v61 = vpop.f32.mrf.mxu1  ;;  %v4344_v58 = vld [vmem:[%s6261_s1 + $0xe] sm:$0x3] }
  0xcc   : > { %v606_v62 = vadd.f32 %v605_v61, %v449_v59  ;;  %v336_v59 = vld [vmem:[%s4569_s10 + $0xe1] sm:$0xff]  ;;  %v337_v61 = vld [vmem:[%s4569_s10 + $0xe9] sm:$0xff] }
  0xcd   : > { %v358_v2 = vpack.c.bf16 %v337_v61, %v336_v59 }
  0xd0   : > { %v675_v9 = vpop.f32.mrf.mxu3 }
  0xd1   : > { %v676_v26 = vadd.f32 %v675_v9, %v519_v21  ;;  %v452_v13 = vpop.f32.mrf.mxu0 }
  0xd2   : > { %v817_v12 = vpop.f32.mrf.mxu2 }
  0xd3   : > { %v4772_v7 = vadd.f32 %v817_v12, %v606_v62  ;;  %v608_v15 = vpop.f32.mrf.mxu1  ;;  %v281_v62 = vld [vmem:[%s4569_s10 + $0xe0] sm:$0xff]  ;;  %v4325_v12 = vld [vmem:[%s6261_s1 + $0xc] sm:$0x3] }
  0xd4   : > { %v609_v19 = vadd.f32 %v608_v15, %v452_v13  ;;  %4225 = vmatmul.msk.bf16.gmra.mxu0 %vm364_vm1, %v356_v11  ;;  %v303_v11 = vpack.c.bf16 %v282_v63, %v281_v62  ;;  %v4825_v15 = vpack.c.bf16 %v707_v0, %v706_v55 }
  0xd5   : > { %4275 = vmatmul.msk.bf16.gmra.mxu3 %vm364_vm1, %v4688_v36  ;;  %v357_v36 = vpack.c.bf16 %v335_v30, %v334_v29 }
  0xd6   : > { %4243 = vmatmul.msk.bf16.gmra.mxu1 %vm364_vm1, %v301_v14 }
  0xd7   : > { %4262 = vmatmul.msk.bf16.gmra.mxu2 %vm364_vm1, %v4774_v18 }
  0xd8   : > { %v880_v20 = vpop.f32.mrf.mxu3 }
  0xd9   : > { %v4782_v22 = vadd.f32 %v880_v20, %v669_v32  ;;  %v454_v23 = vpop.f32.mrf.mxu0 }
  0xda   : > { %v820_v21 = vpop.f32.mrf.mxu2 }
  0xdb   : > { %v4784_v5 = vadd.f32 %v820_v21, %v609_v19  ;;  %v610_v24 = vpop.f32.mrf.mxu1  ;;  %v1781_v19 = vsel %vm419_vm0, %v4325_v12, 0  ;;  %v1671_v12 = vld [vmem:[%s4569_s10 + $0x2c] sm:$0xff] }
  0xdc   : > { %v611_v27 = vadd.f32 %v610_v24, %v454_v23  ;;  %1790 = vmatpush.bf16.msrb.mxu2 %v1781_v19  ;;  %v4363_v23 = vld [vmem:[%s6261_s1 + $0x10] sm:$0x3] }
  0xdd   : > { %v2277_v24 = vsel %vm419_vm0, %v4363_v23, 0 }
  0xde   : > { %2286 = vmatpush.bf16.msra.mxu0 %v2277_v24 }
  0xe0   : > { %v882_v38 = vpop.f32.mrf.mxu3 }
  0xe1   : > { %v4792_v40 = vadd.f32 %v882_v38, %v671_v17  ;;  %v457_v41 = vpop.f32.mrf.mxu0  ;;  %v339_v38 = vld [vmem:[%s4569_s10 + $0xf9] sm:$0xff] }
  0xe2   : > { %v822_v39 = vpop.f32.mrf.mxu2 }
  0xe3   : > { %v4794_v32 = vadd.f32 %v822_v39, %v611_v27  ;;  %v613_v44 = vpop.f32.mrf.mxu1  ;;  %v284_v39 = vld [vmem:[%s4569_s10 + $0xf8] sm:$0xff] }
  0xe4   : > { %v614_v46 = vadd.f32 %v613_v44, %v457_v41  ;;  %4226 = vmatmul.msk.bf16.gmra.mxu0 %vm364_vm1, %v357_v36  ;;  %v283_v36 = vld [vmem:[%s4569_s10 + $0xf0] sm:$0xff] }
  0xe5   : > { %4276 = vmatmul.msk.bf16.gmra.mxu3 %vm364_vm1, %v4702_v47  ;;  %v2029_v47 = vsel %vm419_vm0, %v4344_v58, 0  ;;  %v708_v41 = vld [vmem:[%s4569_s10 + $0xf2] sm:$0xff] }
  0xe6   : > { %4244 = vmatmul.msk.bf16.gmra.mxu1 %vm364_vm1, %v302_v42  ;;  %2038 = vmatpush.bf16.msra.mxu3 %v2029_v47  ;;  %v709_v42 = vld [vmem:[%s4569_s10 + $0xfa] sm:$0xff] }
  0xe7   : > { %4263 = vmatmul.msk.bf16.gmra.mxu2 %vm364_vm1, %v4796_v45  ;;  %v4858_v58 = vpack.c.bf16 %v709_v42, %v708_v41  ;;  %v1672_v41 = vld [vmem:[%s4569_s10 + $0x34] sm:$0xff]  ;;  %v1673_v42 = vld [vmem:[%s4569_s10 + $0x3c] sm:$0xff] }
  0xe8   : > { %v885_v17 = vpop.f32.mrf.mxu3 }
  0xe9   : > { %v4804_v49 = vadd.f32 %v885_v17, %v674_v57  ;;  %v459_v50 = vpop.f32.mrf.mxu0 }
  0xea   : > { %v825_v43 = vpop.f32.mrf.mxu2 }
  0xeb   : > { %v4806_v52 = vadd.f32 %v825_v43, %v614_v46  ;;  %v615_v54 = vpop.f32.mrf.mxu1  ;;  %v359_v46 = vpack.c.bf16 %v339_v38, %v338_v37 }
  0xec   : > { %v616_v56 = vadd.f32 %v615_v54, %v459_v50 }
  0xf0   : > { %v887_v57 = vpop.f32.mrf.mxu3 }
  0xf1   : > { %v4818_v8 = vadd.f32 %v887_v57, %v676_v26  ;;  %v462_v9 = vpop.f32.mrf.mxu0  ;;  %v4306_v26 = vld [vmem:[%s6261_s1 + $0xa] sm:$0x3]  ;;  %v1174_v57 = vld [vmem:[%s4569_s10 + $0x13] sm:$0xff] }
  0xf2   : > { %v827_v6 = vpop.f32.mrf.mxu2  ;;  %v1533_v21 = vsel %vm419_vm0, %v4306_v26, 0 }
  0xf3   : > { %v4823_v13 = vadd.f32 %v827_v6, %v616_v56  ;;  %v618_v14 = vpop.f32.mrf.mxu1  ;;  %1542 = vmatpush.bf16.msrb.mxu1 %v1533_v21  ;;  %v1422_v6 = vld [vmem:[%s4569_s10 + $0x14] sm:$0xff] }
  0xf4   : > { %v619_v20 = vadd.f32 %v618_v14, %v462_v9  ;;  %4227 = vmatmul.msk.bf16.gmra.mxu0 %vm364_vm1, %v358_v2  ;;  %v1175_v2 = vld [vmem:[%s4569_s10 + $0x1b] sm:$0xff] }
  0xf5   : > { %4277 = vmatmul.msk.bf16.gmra.mxu3 %vm364_vm1, %v4720_v3  ;;  %v1423_v9 = vld [vmem:[%s4569_s10 + $0x1c] sm:$0xff]  ;;  %v1210_v14 = vpack.c.bf16 %v1175_v2, %v1174_v57  ;;  %v1178_v2 = vld [vmem:[%s4569_s10 + $0x33] sm:$0xff] }
  0xf6   : > { %4245 = vmatmul.msk.bf16.gmra.mxu1 %vm364_vm1, %v303_v11  ;;  %v1670_v11 = vld [vmem:[%s4569_s10 + $0x24] sm:$0xff] }
  0xf7   : > { %4264 = vmatmul.msk.bf16.gmra.mxu2 %vm364_vm1, %v4825_v15  ;;  %v1706_v24 = vpack.c.bf16 %v1671_v12, %v1670_v11  ;;  %v1675_v11 = vld [vmem:[%s4569_s10 + $0x4c] sm:$0xff] }
  0xf8   : > { %v1048_v27 = vpop.f32.mrf.mxu3 }
  0xf9   : > { %v4843_v30 = vadd.f32 %v1048_v27, %v4710_v51  ;;  %v464_v3 = vpop.f32.mrf.mxu0  ;;  %v304_v51 = vpack.c.bf16 %v284_v39, %v283_v36  ;;  %v1176_v36 = vld [vmem:[%s4569_s10 + $0x23] sm:$0xff]  ;;  %v1177_v39 = vld [vmem:[%s4569_s10 + $0x2b] sm:$0xff] }
  0xfa   : > { %v830_v29 = vpop.f32.mrf.mxu2 }
  0xfb   : > { %v4845_v33 = vadd.f32 %v830_v29, %v619_v20  ;;  %v620_v34 = vpop.f32.mrf.mxu1 }
  0xfc   : > { %v621_v31 = vadd.f32 %v620_v34, %v464_v3 }
 0x100   : > { %v1050_v44 = vpop.f32.mrf.mxu3 }
 0x101   : > { %v4854_v43 = vadd.f32 %v1050_v44, %v4718_v1  ;;  %v467_v50 = vpop.f32.mrf.mxu0 }
 0x102   : > { %v832_v17 = vpop.f32.mrf.mxu2 }
 0x103   : > { %v4856_v54 = vadd.f32 %v832_v17, %v621_v31  ;;  %v623_v56 = vpop.f32.mrf.mxu1 }
 0x104   : > { %v624_v47 = vadd.f32 %v623_v56, %v467_v50  ;;  %4228 = vmatmul.msk.bf16.gmra.mxu0 %vm364_vm1, %v359_v46  ;;  %v1707_v56 = vpack.c.bf16 %v1673_v42, %v1672_v41  ;;  %v1677_v41 = vld [vmem:[%s4569_s10 + $0x5c] sm:$0xff] }
 0x105   : > { %4278 = vmatmul.msk.bf16.gmra.mxu3 %vm364_vm1, %v4738_v28 }
 0x106   : > { %4246 = vmatmul.msk.bf16.gmra.mxu1 %vm364_vm1, %v304_v51 }
 0x107   : > { %4265 = vmatmul.msk.bf16.gmra.mxu2 %vm364_vm1, %v4858_v58 }
 0x108   : > { %v1053_v1 = vpop.f32.mrf.mxu3 }
 0x109   : > { %v4867_v61 = vadd.f32 %v1053_v1, %v4728_v10  ;;  %v469_v62 = vpop.f32.mrf.mxu0  ;;  %v1458_v10 = vpack.c.bf16 %v1423_v9, %v1422_v6  ;;  %v1179_v6 = vld [vmem:[%s4569_s10 + $0x3b] sm:$0xff]  ;;  %v1674_v9 = vld [vmem:[%s4569_s10 + $0x44] sm:$0xff] }
 0x10a   : > { %v835_v59 = vpop.f32.mrf.mxu2 }
 0x10b   : > { %v4869_v63 = vadd.f32 %v835_v59, %v624_v47  ;;  %v625_v55 = vpop.f32.mrf.mxu1 }
 0x10c   : > { %v626_v0 = vadd.f32 %v625_v55, %v469_v62 }
 0x110   : > { %v1055_v28 = vpop.f32.mrf.mxu3 }
 0x111   : > { %v4878_v20 = vadd.f32 %v1055_v28, %v4736_v25  ;;  %v472_v26 = vpop.f32.mrf.mxu0 }
 0x112   : > { %v837_v19 = vpop.f32.mrf.mxu2 }
 0x113   : > { %v4880_v21 = vadd.f32 %v837_v19, %v626_v0  ;;  %v628_v23 = vpop.f32.mrf.mxu1 }
 0x114   : > { %v629_v27 = vadd.f32 %v628_v23, %v472_v26  ;;  %4288 = vmatmul.msk.bf16.vlgmr.msrb.gmra.mxu0 %vm364_vm1, %v1210_v14 }
 0x115   : > { %4279 = vmatmul.msk.bf16.gmra.mxu3 %vm364_vm1, %v4756_v53  ;;  %v1211_v53 = vpack.c.bf16 %v1177_v39, %v1176_v36  ;;  %v1181_v36 = vld [vmem:[%s4569_s10 + $0x4b] sm:$0xff]  ;;  %v1676_v39 = vld [vmem:[%s4569_s10 + $0x54] sm:$0xff] }
 0x116   : > { %4307 = vmatmul.msk.bf16.vlgmr.msrb.gmra.mxu1 %vm364_vm1, %v1458_v10  ;;  %v1708_v10 = vpack.c.bf16 %v1675_v11, %v1674_v9  ;;  %v1678_v9 = vld [vmem:[%s4569_s10 + $0x64] sm:$0xff]  ;;  %v1679_v11 = vld [vmem:[%s4569_s10 + $0x6c] sm:$0xff] }
 0x117   : > { %4326 = vmatmul.msk.bf16.vlgmr.msrb.gmra.mxu2 %vm364_vm1, %v1706_v24 }
 0x118   : > { %v1058_v25 = vpop.f32.mrf.mxu3 }
 0x119   : > { %v4888_v3 = vadd.f32 %v1058_v25, %v4746_v35  ;;  %v474_v34 = vpop.f32.mrf.mxu0 }
 0x11a   : > { %v840_v29 = vpop.f32.mrf.mxu2 }
 0x11b   : > { %v4890_v31 = vadd.f32 %v840_v29, %v629_v27  ;;  %v630_v37 = vpop.f32.mrf.mxu1 }
 0x11c   : > { %v631_v38 = vadd.f32 %v630_v37, %v474_v34 }
 0x120   : > { %v1060_v44 = vpop.f32.mrf.mxu3 }
 0x121   : > { %v4897_v17 = vadd.f32 %v1060_v44, %v4754_v48  ;;  %v477_v50 = vpop.f32.mrf.mxu0 }
 0x122   : > { %v842_v46 = vpop.f32.mrf.mxu2 }
 0x123   : > { %v4899_v51 = vadd.f32 %v842_v46, %v631_v38  ;;  %v633_v35 = vpop.f32.mrf.mxu1  ;;  %v1180_v38 = vld [vmem:[%s4569_s10 + $0x43] sm:$0xff] }
 0x124   : > { %v634_v47 = vadd.f32 %v633_v35, %v477_v50  ;;  %4289 = vmatmul.msk.bf16.gmra.mxu0 %vm364_vm1, %v1211_v53  ;;  %v1709_v35 = vpack.c.bf16 %v1677_v41, %v1676_v39  ;;  %v1185_v39 = vld [vmem:[%s4569_s10 + $0x6b] sm:$0xff]  ;;  %v1680_v41 = vld [vmem:[%s4569_s10 + $0x74] sm:$0xff] }
 0x125   : > { %4280 = vmatmul.msk.bf16.gmra.mxu3 %vm364_vm1, %v4774_v18  ;;  %v1212_v18 = vpack.c.bf16 %v1179_v6, %v1178_v2  ;;  %v1182_v2 = vld [vmem:[%s4569_s10 + $0x53] sm:$0xff]  ;;  %v1183_v6 = vld [vmem:[%s4569_s10 + $0x5b] sm:$0xff] }
 0x126   : > { %4308 = vmatmul.msk.bf16.gmra.mxu1 %vm364_vm1, %v1706_v24 }
 0x127   : > { %4327 = vmatmul.msk.bf16.gmra.mxu2 %vm364_vm1, %v1707_v56 }
 0x128   : > { %v1063_v48 = vpop.f32.mrf.mxu3 }
 0x129   : > { %v4907_v59 = vadd.f32 %v1063_v48, %v4764_v60  ;;  %v479_v62 = vpop.f32.mrf.mxu0 }
 0x12a   : > { %v845_v1 = vpop.f32.mrf.mxu2 }
 0x12b   : > { %v4909_v55 = vadd.f32 %v845_v1, %v634_v47  ;;  %v635_v0 = vpop.f32.mrf.mxu1 }
 0x12c   : > { %v636_v57 = vadd.f32 %v635_v0, %v479_v62 }
 0x130   : > { %v1065_v12 = vpop.f32.mrf.mxu3 }
 0x131   : > { %v4916_v14 = vadd.f32 %v1065_v12, %v4772_v7  ;;  %v482_v19 = vpop.f32.mrf.mxu0 }
 0x132   : > { %v847_v28 = vpop.f32.mrf.mxu2 }
 0x133   : > { %v4918_v26 = vadd.f32 %v847_v28, %v636_v57  ;;  %v638_v60 = vpop.f32.mrf.mxu1 }
 0x134   : > { %v639_v23 = vadd.f32 %v638_v60, %v482_v19  ;;  %4290 = vmatmul.msk.bf16.gmra.mxu0 %vm364_vm1, %v1212_v18 }
 0x135   : > { %4281 = vmatmul.msk.bf16.gmra.mxu3 %vm364_vm1, %v4796_v45  ;;  %v1213_v45 = vpack.c.bf16 %v1181_v36, %v1180_v38  ;;  %v1184_v36 = vld [vmem:[%s4569_s10 + $0x63] sm:$0xff] }
 0x136   : > { %4309 = vmatmul.msk.bf16.gmra.mxu1 %vm364_vm1, %v1707_v56 }
 0x137   : > { %4328 = vmatmul.msk.bf16.gmra.mxu2 %vm364_vm1, %v1708_v10 }
 0x138   : > { %v1068_v7 = vpop.f32.mrf.mxu3 }
 0x139   : > { %v4926_v27 = vadd.f32 %v1068_v7, %v4784_v5  ;;  %v484_v25 = vpop.f32.mrf.mxu0 }
 0x13a   : > { %v850_v24 = vpop.f32.mrf.mxu2 }
 0x13b   : > { %v4928_v29 = vadd.f32 %v850_v24, %v639_v23  ;;  %v640_v34 = vpop.f32.mrf.mxu1 }
 0x13c   : > { %v641_v37 = vadd.f32 %v640_v34, %v484_v25 }
 0x140   : > { %v1070_v42 = vpop.f32.mrf.mxu3 }
 0x141   : > { %v4935_v53 = vadd.f32 %v1070_v42, %v4794_v32  ;;  %v487_v46 = vpop.f32.mrf.mxu0  ;;  %v1681_v42 = vld [vmem:[%s4569_s10 + $0x7c] sm:$0xff] }
 0x142   : > { %v852_v44 = vpop.f32.mrf.mxu2 }
 0x143   : > { %v4937_v50 = vadd.f32 %v852_v44, %v641_v37  ;;  %v643_v5 = vpop.f32.mrf.mxu1 }
 0x144   : > { %v644_v56 = vadd.f32 %v643_v5, %v487_v46  ;;  %4291 = vmatmul.msk.bf16.gmra.mxu0 %vm364_vm1, %v1213_v45 }
 0x145   : > { %4282 = vmatmul.msk.bf16.gmra.mxu3 %vm364_vm1, %v4825_v15  ;;  %v1214_v15 = vpack.c.bf16 %v1183_v6, %v1182_v2 }
 0x146   : > { %4310 = vmatmul.msk.bf16.gmra.mxu1 %vm364_vm1, %v1708_v10  ;;  %v1710_v10 = vpack.c.bf16 %v1679_v11, %v1678_v9  ;;  %v1186_v9 = vld [vmem:[%s4569_s10 + $0x73] sm:$0xff]  ;;  %v1187_v11 = vld [vmem:[%s4569_s10 + $0x7b] sm:$0xff] }
 0x147   : > { %4329 = vmatmul.msk.bf16.gmra.mxu2 %vm364_vm1, %v1709_v35 }
 0x148   : > { %v1073_v32 = vpop.f32.mrf.mxu3 }
 0x149   : > { %v4945_v48 = vadd.f32 %v1073_v32, %v4806_v52  ;;  %v489_v1 = vpop.f32.mrf.mxu0 }
 0x14a   : > { %v855_v47 = vpop.f32.mrf.mxu2 }
 0x14b   : > { %v4947_v62 = vadd.f32 %v855_v47, %v644_v56  ;;  %v645_v0 = vpop.f32.mrf.mxu1  ;;  %v1711_v56 = vpack.c.bf16 %v1681_v42, %v1680_v41  ;;  %v1188_v42 = vld [vmem:[%s4569_s10 + $0x83] sm:$0xff] }
 0x14c   : > { %v646_v57 = vadd.f32 %v645_v0, %v489_v1 }
 0x150   : > { %v1075_v12 = vpop.f32.mrf.mxu3 }
 0x151   : > { %v4954_v28 = vadd.f32 %v1075_v12, %v4823_v13  ;;  %v492_v19 = vpop.f32.mrf.mxu0  ;;  %v1682_v12 = vld [vmem:[%s4569_s10 + $0x84] sm:$0xff] }
 0x152   : > { %v857_v18 = vpop.f32.mrf.mxu2 }
 0x153   : > { %v4956_v60 = vadd.f32 %v857_v18, %v646_v57  ;;  %v648_v52 = vpop.f32.mrf.mxu1 }
 0x154   : > { %v649_v23 = vadd.f32 %v648_v52, %v492_v19  ;;  %4292 = vmatmul.msk.bf16.gmra.mxu0 %vm364_vm1, %v1214_v15  ;;  %v1683_v15 = vld [vmem:[%s4569_s10 + $0x8c] sm:$0xff] }
 0x155   : > { %4283 = vmatmul.msk.bf16.gmra.mxu3 %vm364_vm1, %v4858_v58  ;;  %v1215_v58 = vpack.c.bf16 %v1185_v39, %v1184_v36 }
 0x156   : > { %4311 = vmatmul.msk.bf16.gmra.mxu1 %vm364_vm1, %v1709_v35 }
 0x157   : > { %4330 = vmatmul.msk.bf16.gmra.mxu2 %vm364_vm1, %v1710_v10 }
 0x158   : > { %v1078_v13 = vpop.f32.mrf.mxu3 }
 0x159   : > { %v4964_v24 = vadd.f32 %v1078_v13, %v4845_v33  ;;  %v494_v25 = vpop.f32.mrf.mxu0  ;;  %v1712_v13 = vpack.c.bf16 %v1683_v15, %v1682_v12 }
 0x15a   : > { %v860_v7 = vpop.f32.mrf.mxu2 }
 0x15b   : > { %v4966_v34 = vadd.f32 %v860_v7, %v649_v23  ;;  %v650_v37 = vpop.f32.mrf.mxu1 }
 0x15c   : > { %v651_v38 = vadd.f32 %v650_v37, %v494_v25 }
 0x160   : > { %v1080_v45 = vpop.f32.mrf.mxu3 }
 0x161   : > { %v4973_v46 = vadd.f32 %v1080_v45, %v4856_v54  ;;  %v497_v5 = vpop.f32.mrf.mxu0  ;;  %v1189_v45 = vld [vmem:[%s4569_s10 + $0x8b] sm:$0xff] }
 0x162   : > { %v862_v44 = vpop.f32.mrf.mxu2 }
 0x163   : > { %v4975_v35 = vadd.f32 %v862_v44, %v651_v38  ;;  %v653_v33 = vpop.f32.mrf.mxu1  ;;  %v961_v44 = vld [vmem:[%s4569_s10 + $0x12a] sm:$0xff] }
 0x164   : > { %v654_v32 = vadd.f32 %v653_v33, %v497_v5  ;;  %4293 = vmatmul.msk.bf16.gmra.mxu0 %vm364_vm1, %v1215_v58  ;;  %v960_v58 = vld [vmem:[%s4569_s10 + $0x122] sm:$0xff]  ;;  %v1684_v5 = vld [vmem:[%s4569_s10 + $0x94] sm:$0xff] }
 0x165   : > { %4284 = vmatmul.msk.bf16.gmra.mxu3 %vm364_vm1, %v4640_v4  ;;  %v1216_v4 = vpack.c.bf16 %v1187_v11, %v1186_v9 }
 0x166   : > { %4312 = vmatmul.msk.bf16.gmra.mxu1 %vm364_vm1, %v1710_v10 }
 0x167   : > { %4331 = vmatmul.msk.bf16.gmra.mxu2 %vm364_vm1, %v1711_v56 }
 0x168   : > { %v1083_v54 = vpop.f32.mrf.mxu3 }
 0x169   : > { %v4983_v1 = vadd.f32 %v1083_v54, %v4869_v63  ;;  %v499_v0 = vpop.f32.mrf.mxu0 }
 0x16a   : > { %v865_v47 = vpop.f32.mrf.mxu2 }
 0x16b   : > { %v4985_v57 = vadd.f32 %v865_v47, %v654_v32  ;;  %v655_v2 = vpop.f32.mrf.mxu1 }
 0x16c   : > { %v656_v6 = vadd.f32 %v655_v2, %v499_v0 }
 0x170   : > { %v1085_v18 = vpop.f32.mrf.mxu3 }
 0x171   : > { %v4992_v52 = vadd.f32 %v1085_v18, %v4880_v21  ;;  %v502_v10 = vpop.f32.mrf.mxu0 }
 0x172   : > { %v867_v19 = vpop.f32.mrf.mxu2 }
 0x173   : > { %v4994_v23 = vadd.f32 %v867_v19, %v656_v6  ;;  %v658_v63 = vpop.f32.mrf.mxu1 }
 0x174   : > { %v659_v7 = vadd.f32 %v658_v63, %v502_v10  ;;  %4294 = vmatmul.msk.bf16.gmra.mxu0 %vm364_vm1, %v1216_v4  ;;  %v1190_v10 = vld [vmem:[%s4569_s10 + $0x93] sm:$0xff]  ;;  %v1191_v63 = vld [vmem:[%s4569_s10 + $0x9b] sm:$0xff] }
 0x175   : > { %4285 = vmatmul.msk.bf16.gmra.mxu3 %vm364_vm1, %v4658_v16  ;;  %v1685_v16 = vld [vmem:[%s4569_s10 + $0x9c] sm:$0xff] }
 0x176   : > { %4313 = vmatmul.msk.bf16.gmra.mxu1 %vm364_vm1, %v1711_v56  ;;  %v1217_v56 = vpack.c.bf16 %v1189_v45, %v1188_v42  ;;  %v1713_v6 = vpack.c.bf16 %v1685_v16, %v1684_v5 }
 0x177   : > { %4332 = vmatmul.msk.bf16.gmra.mxu2 %vm364_vm1, %v1712_v13 }
 0x178   : > { %v1088_v21 = vpop.f32.mrf.mxu3 }
 0x179   : > { %v5002_v37 = vadd.f32 %v1088_v21, %v4890_v31  ;;  %v504_v38 = vpop.f32.mrf.mxu0  ;;  %v979_v31 = vpack.c.bf16 %v961_v44, %v960_v58  ;;  %v1919_v21 = vld [vmem:[%s4569_s10 + $0x2d] sm:$0xff] }
 0x17a   : > { %v870_v25 = vpop.f32.mrf.mxu2 }
 0x17b   : > { %v5004_v36 = vadd.f32 %v870_v25, %v659_v7  ;;  %v660_v39 = vpop.f32.mrf.mxu1  ;;  %v1918_v7 = vld [vmem:[%s4569_s10 + $0x25] sm:$0xff] }
 0x17c   : > { %v661_v41 = vadd.f32 %v660_v39, %v504_v38  ;;  %v1686_v25 = vld [vmem:[%s4569_s10 + $0xa4] sm:$0xff]  ;;  %v1687_v38 = vld [vmem:[%s4569_s10 + $0xac] sm:$0xff] }
 0x17d   : > { %v1714_v16 = vpack.c.bf16 %v1687_v38, %v1686_v25 }
 0x180   : > { %v1090_v33 = vpop.f32.mrf.mxu3 }
 0x181   : > { %v5013_v54 = vadd.f32 %v1090_v33, %v4899_v51  ;;  %v507_v47 = vpop.f32.mrf.mxu0 }
 0x182   : > { %v872_v32 = vpop.f32.mrf.mxu2 }
 0x183   : > { %v5015_v0 = vadd.f32 %v872_v32, %v661_v41  ;;  %v663_v2 = vpop.f32.mrf.mxu1 }
 0x184   : > { %v664_v9 = vadd.f32 %v663_v2, %v507_v47  ;;  %4295 = vmatmul.msk.bf16.gmra.mxu0 %vm364_vm1, %v1217_v56 }
 0x185   : > { %4286 = vmatmul.msk.bf16.gmra.mxu3 %vm364_vm1, %v979_v31 }
 0x186   : > { %4314 = vmatmul.msk.bf16.gmra.mxu1 %vm364_vm1, %v1712_v13  ;;  %v1218_v13 = vpack.c.bf16 %v1191_v63, %v1190_v10 }
 0x187   : > { %4333 = vmatmul.msk.bf16.gmra.mxu2 %vm364_vm1, %v1713_v6 }
 0x188   : > { %v1093_v51 = vpop.f32.mrf.mxu3 }
 0x189   : > { %v5022_v12 = vadd.f32 %v1093_v51, %v4909_v55  ;;  %v509_v15 = vpop.f32.mrf.mxu0  ;;  %v1954_v55 = vpack.c.bf16 %v1919_v21, %v1918_v7  ;;  %v1192_v51 = vld [vmem:[%s4569_s10 + $0xa3] sm:$0xff] }
 0x18a   : > { %v875_v11 = vpop.f32.mrf.mxu2 }
 0x18b   : > { %v5024_v18 = vadd.f32 %v875_v11, %v664_v9  ;;  %v665_v4 = vpop.f32.mrf.mxu1  ;;  %v1193_v11 = vld [vmem:[%s4569_s10 + $0xab] sm:$0xff] }
 0x18c   : > { %v666_v19 = vadd.f32 %v665_v4, %v509_v15  ;;  %v1920_v15 = vld [vmem:[%s4569_s10 + $0x35] sm:$0xff]  ;;  %v1921_v4 = vld [vmem:[%s4569_s10 + $0x3d] sm:$0xff]  ;;  %v1219_v63 = vpack.c.bf16 %v1193_v11, %v1192_v51 }
 0x18d   : > { %v1955_v25 = vpack.c.bf16 %v1921_v4, %v1920_v15 }
 0x190   : > { %v1095_v39 = vpop.f32.mrf.mxu3 }
 0x191   : > { %v5033_v42 = vadd.f32 %v1095_v39, %v4918_v26  ;;  %v1296_v45 = vpop.f32.mrf.mxu0 }
 0x192   : > { %v877_v41 = vpop.f32.mrf.mxu2  ;;  %v1386_v44 = vadd.f32 %v1296_v45, %v4843_v30 }
 0x193   : > { %v5035_v58 = vadd.f32 %v877_v41, %v666_v19  ;;  %v1544_v5 = vpop.f32.mrf.mxu1  ;;  %v1688_v19 = vld [vmem:[%s4569_s10 + $0xb4] sm:$0xff] }
 0x194   : > { %v1634_v33 = vadd.f32 %v1544_v5, %v1386_v44  ;;  %4296 = vmatmul.msk.bf16.gmra.mxu0 %vm364_vm1, %v1218_v13 }
 0x195   : > { %4345 = vmatmul.msk.bf16.vlgmr.msra.gmra.mxu3 %vm364_vm1, %v1954_v55 }
 0x196   : > { %4315 = vmatmul.msk.bf16.gmra.mxu1 %vm364_vm1, %v1713_v6  ;;  %v1689_v6 = vld [vmem:[%s4569_s10 + $0xbc] sm:$0xff] }
 0x197   : > { %4334 = vmatmul.msk.bf16.gmra.mxu2 %vm364_vm1, %v1714_v16  ;;  %v1715_v13 = vpack.c.bf16 %v1689_v6, %v1688_v19 }
 0x198   : > { %v1098_v26 = vpop.f32.mrf.mxu3 }
 0x199   : > { %v5043_v30 = vadd.f32 %v1098_v26, %v4928_v29  ;;  %v1298_v32 = vpop.f32.mrf.mxu0 }
 0x19a   : > { %v1792_v56 = vpop.f32.mrf.mxu2  ;;  %v1387_v31 = vadd.f32 %v1298_v32, %v4854_v43  ;;  %v1195_v32 = vld [vmem:[%s4569_s10 + $0xbb] sm:$0xff] }
 0x19b   : > { %v5045_v47 = vadd.f32 %v1792_v56, %v1634_v33  ;;  %v1546_v2 = vpop.f32.mrf.mxu1  ;;  %v1194_v56 = vld [vmem:[%s4569_s10 + $0xb3] sm:$0xff] }
 0x19c   : > { %v1635_v9 = vadd.f32 %v1546_v2, %v1387_v31  ;;  %v1922_v31 = vld [vmem:[%s4569_s10 + $0x45] sm:$0xff]  ;;  %v1923_v2 = vld [vmem:[%s4569_s10 + $0x4d] sm:$0xff]  ;;  %v1220_v11 = vpack.c.bf16 %v1195_v32, %v1194_v56 }
 0x19d   : > { %v1956_v19 = vpack.c.bf16 %v1923_v2, %v1922_v31 }
 0x1a0   : > { %v1100_v10 = vpop.f32.mrf.mxu3 }
 0x1a1   : > { %v5055_v7 = vadd.f32 %v1100_v10, %v4937_v50  ;;  %v1301_v21 = vpop.f32.mrf.mxu0 }
 0x1a2   : > { %v1794_v29 = vpop.f32.mrf.mxu2  ;;  %v1388_v43 = vadd.f32 %v1301_v21, %v4867_v61 }
 0x1a3   : > { %v5057_v38 = vadd.f32 %v1794_v29, %v1635_v9  ;;  %v1549_v39 = vpop.f32.mrf.mxu1  ;;  %v1690_v9 = vld [vmem:[%s4569_s10 + $0xc4] sm:$0xff] }
 0x1a4   : > { %v1636_v41 = vadd.f32 %v1549_v39, %v1388_v43  ;;  %4297 = vmatmul.msk.bf16.gmra.mxu0 %vm364_vm1, %v1219_v63 }
 0x1a5   : > { %4346 = vmatmul.msk.bf16.gmra.mxu3 %vm364_vm1, %v1955_v25 }
 0x1a6   : > { %4316 = vmatmul.msk.bf16.gmra.mxu1 %vm364_vm1, %v1714_v16  ;;  %v1691_v16 = vld [vmem:[%s4569_s10 + $0xcc] sm:$0xff] }
 0x1a7   : > { %4335 = vmatmul.msk.bf16.gmra.mxu2 %vm364_vm1, %v1715_v13  ;;  %v1716_v63 = vpack.c.bf16 %v1691_v16, %v1690_v9 }
 0x1a8   : > { %v1103_v50 = vpop.f32.mrf.mxu3 }
 0x1a9   : > { %v5065_v61 = vadd.f32 %v1103_v50, %v4947_v62  ;;  %v1303_v55 = vpop.f32.mrf.mxu0 }
 0x1aa   : > { %v1797_v45 = vpop.f32.mrf.mxu2  ;;  %v1389_v5 = vadd.f32 %v1303_v55, %v4878_v20  ;;  %v1197_v55 = vld [vmem:[%s4569_s10 + $0xcb] sm:$0xff] }
 0x1ab   : > { %v5067_v44 = vadd.f32 %v1797_v45, %v1636_v41  ;;  %v1551_v33 = vpop.f32.mrf.mxu1  ;;  %v1196_v45 = vld [vmem:[%s4569_s10 + $0xc3] sm:$0xff] }
 0x1ac   : > { %v1637_v26 = vadd.f32 %v1551_v33, %v1389_v5  ;;  %v1924_v5 = vld [vmem:[%s4569_s10 + $0x55] sm:$0xff]  ;;  %v1925_v33 = vld [vmem:[%s4569_s10 + $0x5d] sm:$0xff]  ;;  %v1221_v32 = vpack.c.bf16 %v1197_v55, %v1196_v45 }
 0x1ad   : > { %v1957_v9 = vpack.c.bf16 %v1925_v33, %v1924_v5 }
 0x1b0   : > { %v1105_v51 = vpop.f32.mrf.mxu3 }
 0x1b1   : > { %v5077_v15 = vadd.f32 %v1105_v51, %v4956_v60  ;;  %v1306_v4 = vpop.f32.mrf.mxu0 }
 0x1b2   : > { %v1799_v62 = vpop.f32.mrf.mxu2  ;;  %v1390_v20 = vadd.f32 %v1306_v4, %v4888_v3 }
 0x1b3   : > { %v5079_v6 = vadd.f32 %v1799_v62, %v1637_v26  ;;  %v1554_v10 = vpop.f32.mrf.mxu1  ;;  %v1692_v26 = vld [vmem:[%s4569_s10 + $0xd4] sm:$0xff] }
 0x1b4   : > { %v1638_v29 = vadd.f32 %v1554_v10, %v1390_v20  ;;  %4298 = vmatmul.msk.bf16.gmra.mxu0 %vm364_vm1, %v1220_v11 }
 0x1b5   : > { %4347 = vmatmul.msk.bf16.gmra.mxu3 %vm364_vm1, %v1956_v19 }
 0x1b6   : > { %4317 = vmatmul.msk.bf16.gmra.mxu1 %vm364_vm1, %v1715_v13  ;;  %v1693_v13 = vld [vmem:[%s4569_s10 + $0xdc] sm:$0xff] }
 0x1b7   : > { %4336 = vmatmul.msk.bf16.gmra.mxu2 %vm364_vm1, %v1716_v63  ;;  %v1717_v11 = vpack.c.bf16 %v1693_v13, %v1692_v26 }
 0x1b8   : > { %v1108_v60 = vpop.f32.mrf.mxu3 }
 0x1b9   : > { %v5087_v3 = vadd.f32 %v1108_v60, %v4966_v34  ;;  %v1308_v25 = vpop.f32.mrf.mxu0 }
 0x1ba   : > { %v1802_v21 = vpop.f32.mrf.mxu2  ;;  %v1391_v39 = vadd.f32 %v1308_v25, %v4897_v17  ;;  %v1199_v25 = vld [vmem:[%s4569_s10 + $0xdb] sm:$0xff] }
 0x1bb   : > { %v5089_v43 = vadd.f32 %v1802_v21, %v1638_v29  ;;  %v1556_v41 = vpop.f32.mrf.mxu1  ;;  %v1198_v21 = vld [vmem:[%s4569_s10 + $0xd3] sm:$0xff] }
 0x1bc   : > { %v1639_v50 = vadd.f32 %v1556_v41, %v1391_v39  ;;  %v1926_v39 = vld [vmem:[%s4569_s10 + $0x65] sm:$0xff]  ;;  %v1927_v41 = vld [vmem:[%s4569_s10 + $0x6d] sm:$0xff]  ;;  %v1222_v55 = vpack.c.bf16 %v1199_v25, %v1198_v21 }
 0x1bd   : > { %v1958_v26 = vpack.c.bf16 %v1927_v41, %v1926_v39 }
 0x1c0   : > { %v1110_v56 = vpop.f32.mrf.mxu3 }
 0x1c1   : > { %v5099_v31 = vadd.f32 %v1110_v56, %v4975_v35  ;;  %v1311_v2 = vpop.f32.mrf.mxu0 }
 0x1c2   : > { %v1804_v34 = vpop.f32.mrf.mxu2  ;;  %v1392_v17 = vadd.f32 %v1311_v2, %v4907_v59 }
 0x1c3   : > { %v5101_v16 = vadd.f32 %v1804_v34, %v1639_v50  ;;  %v1559_v51 = vpop.f32.mrf.mxu1  ;;  %v1694_v50 = vld [vmem:[%s4569_s10 + $0xe4] sm:$0xff] }
 0x1c4   : > { %v1640_v62 = vadd.f32 %v1559_v51, %v1392_v17  ;;  %4299 = vmatmul.msk.bf16.gmra.mxu0 %vm364_vm1, %v1221_v32 }
 0x1c5   : > { %4348 = vmatmul.msk.bf16.gmra.mxu3 %vm364_vm1, %v1957_v9 }
 0x1c6   : > { %4318 = vmatmul.msk.bf16.gmra.mxu1 %vm364_vm1, %v1716_v63  ;;  %v1695_v63 = vld [vmem:[%s4569_s10 + $0xec] sm:$0xff] }
 0x1c7   : > { %4337 = vmatmul.msk.bf16.gmra.mxu2 %vm364_vm1, %v1717_v11  ;;  %v1718_v32 = vpack.c.bf16 %v1695_v63, %v1694_v50 }
 0x1c8   : > { %v1113_v35 = vpop.f32.mrf.mxu3 }
 0x1c9   : > { %v5109_v59 = vadd.f32 %v1113_v35, %v4985_v57  ;;  %v1313_v19 = vpop.f32.mrf.mxu0 }
 0x1ca   : > { %v1807_v4 = vpop.f32.mrf.mxu2  ;;  %v1393_v10 = vadd.f32 %v1313_v19, %v4916_v14  ;;  %v1201_v19 = vld [vmem:[%s4569_s10 + $0xeb] sm:$0xff] }
 0x1cb   : > { %v5111_v20 = vadd.f32 %v1807_v4, %v1640_v62  ;;  %v1561_v29 = vpop.f32.mrf.mxu1  ;;  %v1200_v4 = vld [vmem:[%s4569_s10 + $0xe3] sm:$0xff] }
 0x1cc   : > { %v1641_v60 = vadd.f32 %v1561_v29, %v1393_v10  ;;  %v1928_v10 = vld [vmem:[%s4569_s10 + $0x75] sm:$0xff]  ;;  %v1929_v29 = vld [vmem:[%s4569_s10 + $0x7d] sm:$0xff]  ;;  %v1223_v25 = vpack.c.bf16 %v1201_v19, %v1200_v4 }
 0x1cd   : > { %v1959_v50 = vpack.c.bf16 %v1929_v29, %v1928_v10 }
 0x1d0   : > { %v1115_v45 = vpop.f32.mrf.mxu3 }
 0x1d1   : > { %v5121_v5 = vadd.f32 %v1115_v45, %v4994_v23  ;;  %v1316_v33 = vpop.f32.mrf.mxu0 }
 0x1d2   : > { %v1809_v57 = vpop.f32.mrf.mxu2  ;;  %v1394_v14 = vadd.f32 %v1316_v33, %v4926_v27 }
 0x1d3   : > { %v5123_v13 = vadd.f32 %v1809_v57, %v1641_v60  ;;  %v1564_v56 = vpop.f32.mrf.mxu1  ;;  %v1696_v60 = vld [vmem:[%s4569_s10 + $0xf4] sm:$0xff] }
 0x1d4   : > { %v1642_v34 = vadd.f32 %v1564_v56, %v1394_v14  ;;  %4300 = vmatmul.msk.bf16.gmra.mxu0 %vm364_vm1, %v1222_v55 }
 0x1d5   : > { %4349 = vmatmul.msk.bf16.gmra.mxu3 %vm364_vm1, %v1958_v26 }
 0x1d6   : > { %4319 = vmatmul.msk.bf16.gmra.mxu1 %vm364_vm1, %v1717_v11  ;;  %v1697_v11 = vld [vmem:[%s4569_s10 + $0xfc] sm:$0xff] }
 0x1d7   : > { %4338 = vmatmul.msk.bf16.gmra.mxu2 %vm364_vm1, %v1718_v32  ;;  %v1719_v55 = vpack.c.bf16 %v1697_v11, %v1696_v60 }
 0x1d8   : > { %v1118_v23 = vpop.f32.mrf.mxu3 }
 0x1d9   : > { %v5131_v27 = vadd.f32 %v1118_v23, %v5004_v36  ;;  %v1318_v9 = vpop.f32.mrf.mxu0 }
 0x1da   : > { %v1812_v2 = vpop.f32.mrf.mxu2  ;;  %v1395_v51 = vadd.f32 %v1318_v9, %v4935_v53  ;;  %v1203_v9 = vld [vmem:[%s4569_s10 + $0xfb] sm:$0xff] }
 0x1db   : > { %v5133_v17 = vadd.f32 %v1812_v2, %v1642_v34  ;;  %v1566_v62 = vpop.f32.mrf.mxu1  ;;  %v1202_v2 = vld [vmem:[%s4569_s10 + $0xf3] sm:$0xff] }
 0x1dc   : > { %v1643_v35 = vadd.f32 %v1566_v62, %v1395_v51  ;;  %v1930_v51 = vld [vmem:[%s4569_s10 + $0x85] sm:$0xff]  ;;  %v1931_v62 = vld [vmem:[%s4569_s10 + $0x8d] sm:$0xff]  ;;  %v1224_v19 = vpack.c.bf16 %v1203_v9, %v1202_v2 }
 0x1dd   : > { %v1960_v60 = vpack.c.bf16 %v1931_v62, %v1930_v51 }
 0x1e0   : > { %v1120_v21 = vpop.f32.mrf.mxu3 }
 0x1e1   : > { %v5143_v39 = vadd.f32 %v1120_v21, %v5015_v0  ;;  %v1321_v41 = vpop.f32.mrf.mxu0 }
 0x1e2   : > { %v1814_v36 = vpop.f32.mrf.mxu2  ;;  %v1396_v53 = vadd.f32 %v1321_v41, %v4945_v48 }
 0x1e3   : > { %v5145_v63 = vadd.f32 %v1814_v36, %v1643_v35  ;;  %v1569_v45 = vpop.f32.mrf.mxu1  ;;  %v1698_v35 = vld [vmem:[%s4569_s10 + $0x104] sm:$0xff] }
 0x1e4   : > { %v1644_v57 = vadd.f32 %v1569_v45, %v1396_v53  ;;  %4301 = vmatmul.msk.bf16.gmra.mxu0 %vm364_vm1, %v1223_v25 }
 0x1e5   : > { %4350 = vmatmul.msk.bf16.gmra.mxu3 %vm364_vm1, %v1959_v50 }
 0x1e6   : > { %4320 = vmatmul.msk.bf16.gmra.mxu1 %vm364_vm1, %v1718_v32  ;;  %v1699_v32 = vld [vmem:[%s4569_s10 + $0x10c] sm:$0xff] }
 0x1e7   : > { %4339 = vmatmul.msk.bf16.gmra.mxu2 %vm364_vm1, %v1719_v55  ;;  %v1720_v25 = vpack.c.bf16 %v1699_v32, %v1698_v35 }
 0x1e8   : > { %v1123_v0 = vpop.f32.mrf.mxu3 }
 0x1e9   : > { %v5153_v48 = vadd.f32 %v1123_v0, %v5024_v18  ;;  %v1323_v26 = vpop.f32.mrf.mxu0  ;;  %v1205_v0 = vld [vmem:[%s4569_s10 + $0x10b] sm:$0xff] }
 0x1ea   : > { %v1817_v33 = vpop.f32.mrf.mxu2  ;;  %v1397_v56 = vadd.f32 %v1323_v26, %v4954_v28  ;;  %v1933_v26 = vld [vmem:[%s4569_s10 + $0x9d] sm:$0xff] }
 0x1eb   : > { %v5155_v14 = vadd.f32 %v1817_v33, %v1644_v57  ;;  %v1571_v34 = vpop.f32.mrf.mxu1  ;;  %v1204_v57 = vld [vmem:[%s4569_s10 + $0x103] sm:$0xff]  ;;  %v1932_v33 = vld [vmem:[%s4569_s10 + $0x95] sm:$0xff] }
 0x1ec   : > { %v1645_v23 = vadd.f32 %v1571_v34, %v1397_v56  ;;  %v1700_v56 = vld [vmem:[%s4569_s10 + $0x114] sm:$0xff]  ;;  %v1701_v34 = vld [vmem:[%s4569_s10 + $0x11c] sm:$0xff]  ;;  %v1961_v9 = vpack.c.bf16 %v1933_v26, %v1932_v33 }
 0x1ed   : > { %v1721_v51 = vpack.c.bf16 %v1701_v34, %v1700_v56  ;;  %v1208_v56 = vld [vmem:[%s4569_s10 + $0x123] sm:$0xff]  ;;  %v1209_v34 = vld [vmem:[%s4569_s10 + $0x12b] sm:$0xff] }
 0x1f0   : > { %v1125_v4 = vpop.f32.mrf.mxu3 }
 0x1f1   : > { %v5165_v10 = vadd.f32 %v1125_v4, %v5035_v58  ;;  %v1326_v29 = vpop.f32.mrf.mxu0  ;;  %v1206_v4 = vld [vmem:[%s4569_s10 + $0x113] sm:$0xff] }
 0x1f2   : > { %v1819_v18 = vpop.f32.mrf.mxu2  ;;  %v1398_v28 = vadd.f32 %v1326_v29, %v4964_v24  ;;  %v1934_v29 = vld [vmem:[%s4569_s10 + $0xa5] sm:$0xff] }
 0x1f3   : > { %v5167_v11 = vadd.f32 %v1819_v18, %v1645_v23  ;;  %v1574_v21 = vpop.f32.mrf.mxu1  ;;  %v1225_v23 = vpack.c.bf16 %v1205_v0, %v1204_v57  ;;  %v4382_v57 = vld [vmem:[%s6263_s3 + $0x2] sm:$0x3] }
 0x1f4   : > { %v1646_v36 = vadd.f32 %v1574_v21, %v1398_v28  ;;  %4302 = vmatmul.msk.bf16.gmra.mxu0 %vm364_vm1, %v1224_v19  ;;  %v1207_v19 = vld [vmem:[%s4569_s10 + $0x11b] sm:$0xff]  ;;  %v1702_v28 = vld [vmem:[%s4569_s10 + $0x124] sm:$0xff]  ;;  %v1703_v21 = vld [vmem:[%s4569_s10 + $0x12c] sm:$0xff]  ;;  %v2942_v0 = vsel %vm419_vm0, %v4382_v57, 0 }
 0x1f5   : > { %4351 = vmatmul.msk.bf16.gmra.mxu3 %vm364_vm1, %v1960_v60  ;;  %v1935_v60 = vld [vmem:[%s4569_s10 + $0xad] sm:$0xff]  ;;  %2951 = vmatpush.bf16.msra.mxu1 %v2942_v0 }
 0x1f6   : > { %4321 = vmatmul.msk.bf16.gmra.mxu1 %vm364_vm1, %v1719_v55 }
 0x1f7   : > { %4340 = vmatmul.msk.bf16.gmra.mxu2 %vm364_vm1, %v1720_v25 }
 0x1f8   : > { %v1128_v58 = vpop.f32.mrf.mxu3 }
 0x1f9   : > { %v5175_v41 = vadd.f32 %v1128_v58, %v4782_v22  ;;  %v1328_v50 = vpop.f32.mrf.mxu0  ;;  %v1962_v58 = vpack.c.bf16 %v1935_v60, %v1934_v29 }
 0x1fa   : > { %v1822_v24 = vpop.f32.mrf.mxu2  ;;  %v5180_v45 = vadd.f32 %v1328_v50, %v4973_v46  ;;  %v1722_v50 = vpack.c.bf16 %v1703_v21, %v1702_v28  ;;  %v2491_v28 = vld [vmem:[%s6265_s5 + $0x8] sm:$0xff] }
 0x1fb   : > { %v5177_v53 = vadd.f32 %v1822_v24, %v1646_v36  ;;  %v2166_v21 = vld [vmem:[%s4569_s10 + $0x26] sm:$0xff] }
 0x200   : > { %v1130_v55 = vpop.f32.mrf.mxu3 }
 0x201   : > { %v5189_v22 = vadd.f32 %v1130_v55, %v4792_v40  ;;  %v1331_v2 = vpop.f32.mrf.mxu0  ;;  %v1936_v55 = vld [vmem:[%s4569_s10 + $0xb5] sm:$0xff] }
 0x202   : > { %v5192_v46 = vadd.f32 %v1331_v2, %v4983_v1  ;;  %v2866_v1 = vld [vmem:[%s6263_s3] sm:$0x3]  ;;  %v1704_v2 = vld [vmem:[%s4569_s10 + $0x134] sm:$0xff] }
 0x203   : > { %v3026_v18 = vsel %vm419_vm0, %v2866_v1, 0 }
 0x204   : > { %4303 = vmatmul.msk.bf16.gmra.mxu0 %vm364_vm1, %v1225_v23  ;;  %3035 = vmatpush.bf16.msra.mxu2 %v3026_v18  ;;  %v1937_v23 = vld [vmem:[%s4569_s10 + $0xbd] sm:$0xff] }
 0x205   : > { %4352 = vmatmul.msk.bf16.gmra.mxu3 %vm364_vm1, %v1961_v9  ;;  %v1705_v9 = vld [vmem:[%s4569_s10 + $0x13c] sm:$0xff] }
 0x206   : > { %4322 = vmatmul.msk.bf16.gmra.mxu1 %vm364_vm1, %v1720_v25 }
 0x207   : > { %4341 = vmatmul.msk.bf16.gmra.mxu2 %vm364_vm1, %v1721_v51 }
 0x208   : > { %v1133_v40 = vpop.f32.mrf.mxu3 }
 0x209   : > { %v5199_v62 = vadd.f32 %v1133_v40, %v4804_v49  ;;  %v1333_v35 = vpop.f32.mrf.mxu0  ;;  %v1226_v49 = vpack.c.bf16 %v1207_v19, %v1206_v4  ;;  %v1963_v4 = vpack.c.bf16 %v1937_v23, %v1936_v55  ;;  %v1723_v19 = vpack.c.bf16 %v1705_v9, %v1704_v2  ;;  %v2168_v55 = vld [vmem:[%s4569_s10 + $0x36] sm:$0xff]  ;;  %v2169_v23 = vld [vmem:[%s4569_s10 + $0x3e] sm:$0xff] }
 0x20a   : > { %v5202_v32 = vadd.f32 %v1333_v35, %v4992_v52  ;;  %v1227_v35 = vpack.c.bf16 %v1209_v34, %v1208_v56  ;;  %v1940_v2 = vld [vmem:[%s4569_s10 + $0xd5] sm:$0xff]  ;;  %v1941_v9 = vld [vmem:[%s4569_s10 + $0xdd] sm:$0xff] }
 0x210   : > { %v1135_v25 = vpop.f32.mrf.mxu3 }
 0x211   : > { %v5215_v36 = vadd.f32 %v1135_v25, %v4818_v8  ;;  %v1336_v52 = vpop.f32.mrf.mxu0  ;;  %v2167_v25 = vld [vmem:[%s4569_s10 + $0x2e] sm:$0xff] }
 0x212   : > { %v5218_v24 = vadd.f32 %v1336_v52, %v5002_v37  ;;  %v1939_v52 = vld [vmem:[%s4569_s10 + $0xcd] sm:$0xff] }
 0x214   : > { %4304 = vmatmul.msk.bf16.gmra.mxu0 %vm364_vm1, %v1226_v49  ;;  %v1938_v49 = vld [vmem:[%s4569_s10 + $0xc5] sm:$0xff] }
 0x215   : > { %4353 = vmatmul.msk.bf16.gmra.mxu3 %vm364_vm1, %v1962_v58  ;;  %v1964_v57 = vpack.c.bf16 %v1939_v52, %v1938_v49 }
 0x216   : > { %4323 = vmatmul.msk.bf16.gmra.mxu1 %vm364_vm1, %v1721_v51 }
 0x217   : > { %4342 = vmatmul.msk.bf16.gmra.mxu2 %vm364_vm1, %v1722_v50 }
 0x218   : > { %v2040_v8 = vpop.f32.mrf.mxu3 }
 0x219   : > { %v5229_v37 = vadd.f32 %v2040_v8, %v5045_v47  ;;  %v1338_v33 = vpop.f32.mrf.mxu0  ;;  %v2492_v8 = vld [vmem:[%s6265_s5 + $0x10] sm:$0xff] }
 0x21a   : > { %v5232_v26 = vadd.f32 %v1338_v33, %v5013_v54  ;;  %v2490_v54 = vld [vmem:[%s6265_s5] sm:$0xff] }
 0x220   : > { %v2042_v40 = vpop.f32.mrf.mxu3 }
 0x221   : > { %v5241_v51 = vadd.f32 %v2042_v40, %v5057_v38  ;;  %v1341_v1 = vpop.f32.mrf.mxu0  ;;  %v4502_v38 = vmov 0  }
 0x222   : > { %v5244_v47 = vadd.f32 %v1341_v1, %v5022_v12  ;;  %4488 = vset.pattern.permute.xlu0 %v4502_v38  ;;  %4489 = vset.pattern.permute.xlu1 %v4502_v38  ;;  %v1965_v1 = vpack.c.bf16 %v1941_v9, %v1940_v2 }
 0x223   : > { %2528 = vperm.xlu0 %4488, %v2490_v54   ;;  %4490 = vset.pattern.permute.xlu2 %v4502_v38 }
 0x224   : > { %4305 = vmatmul.msk.bf16.gmra.mxu0 %vm364_vm1, %v1227_v35  ;;  %2538 = vperm.xlu1 %4489, %v2492_v8   ;;  %v2497_v8 = vld [vmem:[%s6265_s5 + $0x38] sm:$0xff] }
 0x225   : > { %4354 = vmatmul.msk.bf16.gmra.mxu3 %vm364_vm1, %v1963_v4 }
 0x226   : > { %4324 = vmatmul.msk.bf16.gmra.mxu1 %vm364_vm1, %v1722_v50  ;;  %v2202_v50 = vpack.c.bf16 %v2167_v25, %v2166_v21  ;;  %v1943_v21 = vld [vmem:[%s4569_s10 + $0xed] sm:$0xff] }
 0x227   : > { %4343 = vmatmul.msk.bf16.gmra.mxu2 %vm364_vm1, %v1723_v19 }
 0x228   : > { %v2045_v12 = vpop.f32.mrf.mxu3 }
 0x229   : > { %v5254_v18 = vadd.f32 %v2045_v12, %v5067_v44  ;;  %v1343_v29 = vpop.f32.mrf.mxu0 }
 0x22a   : > { %v5257_v60 = vadd.f32 %v1343_v29, %v5033_v42  ;;  %v2170_v29 = vld [vmem:[%s4569_s10 + $0x46] sm:$0xff] }
 0x22b   : > { %2533 = vperm.xlu0 %4488, %v2491_v28   ;;  %v1942_v28 = vld [vmem:[%s4569_s10 + $0xe5] sm:$0xff] }
 0x230   : > { %v2047_v58 = vpop.f32.mrf.mxu3 }
 0x231   : > { %v5267_v44 = vadd.f32 %v2047_v58, %v5079_v6  ;;  %v1346_v42 = vpop.f32.mrf.mxu0  ;;  %v1966_v58 = vpack.c.bf16 %v1943_v21, %v1942_v28  ;;  %v2174_v28 = vld [vmem:[%s4569_s10 + $0x66] sm:$0xff]  ;;  %v2175_v21 = vld [vmem:[%s4569_s10 + $0x6e] sm:$0xff] }
 0x232   : > { %v5270_v0 = vadd.f32 %v1346_v42, %v5043_v30  ;;  %v2493_v30 = vld [vmem:[%s6265_s5 + $0x18] sm:$0xff] }
 0x233   : > { %2543 = vperm.xlu1 %4489, %v2493_v30   ;;  %v1944_v30 = vld [vmem:[%s4569_s10 + $0xf5] sm:$0xff] }
 0x234   : > { %4364 = vmatmul.msk.bf16.vlgmr.msra.gmra.mxu0 %vm364_vm1, %v2202_v50 }
 0x235   : > { %4355 = vmatmul.msk.bf16.gmra.mxu3 %vm364_vm1, %v1964_v57 }
 0x238   : > { %v2050_v33 = vpop.f32.mrf.mxu3 }
 0x239   : > { %v5278_v56 = vadd.f32 %v2050_v33, %v5089_v43  ;;  %v1348_v6 = vpop.f32.mrf.mxu0  ;;  %v2203_v43 = vpack.c.bf16 %v2169_v23, %v2168_v55  ;;  %v2172_v33 = vld [vmem:[%s4569_s10 + $0x56] sm:$0xff] }
 0x23a   : > { %v5281_v34 = vadd.f32 %v1348_v6, %v5055_v7  ;;  %v2173_v6 = vld [vmem:[%s4569_s10 + $0x5e] sm:$0xff] }
 0x23b   : > { %2563 = vperm.xlu1 %4489, %v2497_v8   ;;  %v1945_v55 = vld [vmem:[%s4569_s10 + $0xfd] sm:$0xff]  ;;  %v2205_v23 = vpack.c.bf16 %v2173_v6, %v2172_v33 }
 0x23c   : > { %v1967_v9 = vpack.c.bf16 %v1945_v55, %v1944_v30  ;;  %v2498_v55 = vld [vmem:[%s6265_s5 + $0x40] sm:$0xff] }
 0x240   : > { %v2052_v40 = vpop.f32.mrf.mxu3 }
 0x241   : > { %v5291_v35 = vadd.f32 %v2052_v40, %v5101_v16  ;;  %v1351_v7 = vpop.f32.mrf.mxu0  ;;  %v2171_v16 = vld [vmem:[%s4569_s10 + $0x4e] sm:$0xff] }
 0x242   : > { %v5294_v4 = vadd.f32 %v1351_v7, %v5065_v61  ;;  %v2204_v61 = vpack.c.bf16 %v2171_v16, %v2170_v29  ;;  %v5357_v29 = vpop.f32.mrf.mxu2  ;;  %v2502_v16 = vld [vmem:[%s6265_s5 + $0x60] sm:$0xff] }
 0x244   : > { %6267 = vst [vmem:[#allocation3_spill] sm:$0xff] %v5294_v4  ;;  %4365 = vmatmul.msk.bf16.gmra.mxu0 %vm364_vm1, %v2203_v43  ;;  %v2495_v43 = vld [vmem:[%s6265_s5 + $0x28] sm:$0xff] }
 0x245   : > { %4356 = vmatmul.msk.bf16.gmra.mxu3 %vm364_vm1, %v1965_v1 }
 0x248   : > { %v2055_v19 = vpop.f32.mrf.mxu3 }
 0x249   : > { %v5299_v54 = vadd.f32 %v2055_v19, %v5111_v20  ;;  %v1353_v38 = vpop.f32.mrf.mxu0  ;;  %v5352_v19 = vpop.f32.mrf.mxu1 }
 0x24a   : > { %v5302_v12 = vadd.f32 %v1353_v38, %v5077_v15  ;;  %v2496_v15 = vld [vmem:[%s6265_s5 + $0x30] sm:$0xff] }
 0x24b   : > { %2558 = vperm.xlu0 %4488, %v2496_v15  }
 0x24c   : > { %6268 = vst [vmem:[#allocation4_spill] sm:$0xff] %v5302_v12 }
 0x250   : > { %v2057_v25 = vpop.f32.mrf.mxu3 }
 0x251   : > { %v5309_v49 = vadd.f32 %v2057_v25, %v5123_v13  ;;  %v1356_v52 = vpop.f32.mrf.mxu0  ;;  %v1946_v25 = vld [vmem:[%s4569_s10 + $0x105] sm:$0xff] }
 0x252   : > { %v5312_v20 = vadd.f32 %v1356_v52, %v5087_v3  ;;  %v2494_v3 = vld [vmem:[%s6265_s5 + $0x20] sm:$0xff] }
 0x253   : > { %2548 = vperm.xlu2 %4490, %v2494_v3   ;;  %v5375_v3 = vpop.f32.mrf.mxu2 }
 0x254   : > { %6269 = vst [vmem:[#allocation5_spill] sm:$0xff] %v5312_v20  ;;  %4366 = vmatmul.msk.bf16.gmra.mxu0 %vm364_vm1, %v2204_v61  ;;  %v1947_v61 = vld [vmem:[%s4569_s10 + $0x10d] sm:$0xff] }
 0x255   : > { %4357 = vmatmul.msk.bf16.gmra.mxu3 %vm364_vm1, %v1966_v58 }
 0x258   : > { %v2060_v50 = vpop.f32.mrf.mxu3 }
 0x259   : > { %v5320_v13 = vadd.f32 %v2060_v50, %v5133_v17  ;;  %v1358_v42 = vpop.f32.mrf.mxu0  ;;  %v1968_v50 = vpack.c.bf16 %v1947_v61, %v1946_v25  ;;  %v2506_v25 = vld [vmem:[%s6265_s5 + $0x80] sm:$0xff]  ;;  %v2511_v61 = vld [vmem:[%s6265_s5 + $0xa8] sm:$0xff] }
 0x25a   : > { %v5323_v57 = vadd.f32 %v1358_v42, %v5099_v31  ;;  %v5372_v42 = vpop.f32.mrf.mxu1 }
 0x25b   : > { %2553 = vperm.xlu2 %4490, %v2495_v43   ;;  %v1948_v43 = vld [vmem:[%s4569_s10 + $0x115] sm:$0xff] }
 0x25c   : > { %6270 = vst [vmem:[#allocation6_spill] sm:$0xff] %v5323_v57 }
 0x260   : > { %v2062_v17 = vpop.f32.mrf.mxu3 }
 0x261   : > { %v5336_v2 = vadd.f32 %v2062_v17, %v5145_v63  ;;  %v1361_v31 = vpop.f32.mrf.mxu0  ;;  %v2499_v63 = vld [vmem:[%s6265_s5 + $0x48] sm:$0xff] }
 0x262   : > { %v5339_v40 = vadd.f32 %v1361_v31, %v5109_v59  ;;  %2573 = vperm.xlu0 %4488, %v2499_v63   ;;  %v2503_v17 = vld [vmem:[%s6265_s5 + $0x68] sm:$0xff]  ;;  %v2176_v31 = vld [vmem:[%s4569_s10 + $0x76] sm:$0xff]  ;;  %v5405_v63 = vpop.f32.mrf.mxu2 }
 0x263   : > { %2568 = vperm.xlu2 %4490, %v2498_v55   ;;  %v2179_v55 = vld [vmem:[%s4569_s10 + $0x8e] sm:$0xff] }
 0x264   : > { %6271 = vst [vmem:[#allocation7_spill] sm:$0xff] %v5339_v40  ;;  %4367 = vmatmul.msk.bf16.gmra.mxu0 %vm364_vm1, %v2205_v23  ;;  %v2508_v23 = vld [vmem:[%s6265_s5 + $0x90] sm:$0xff] }
 0x265   : > { %4358 = vmatmul.msk.bf16.gmra.mxu3 %vm364_vm1, %v1967_v9  ;;  %v2177_v9 = vld [vmem:[%s4569_s10 + $0x7e] sm:$0xff] }
 0x268   : > { %v2065_v7 = vpop.f32.mrf.mxu3 }
 0x269   : > { %v5350_v59 = vadd.f32 %v2065_v7, %v5155_v14  ;;  %v1363_v1 = vpop.f32.mrf.mxu0  ;;  %v2206_v14 = vpack.c.bf16 %v2175_v21, %v2174_v28 }
 0x26a   : > { %v5355_v38 = vadd.f32 %v1363_v1, %v5121_v5  ;;  %2588 = vperm.xlu0 %4488, %v2502_v16   ;;  %v2207_v1 = vpack.c.bf16 %v2177_v9, %v2176_v31 }
 0x26c   : > { %6272 = vst [vmem:[#allocation8_spill] sm:$0xff] %v5355_v38 }
 0x270   : > { %v2067_v52 = vpop.f32.mrf.mxu3 }
 0x271   : > { %v5367_v58 = vadd.f32 %v2067_v52, %v5167_v11  ;;  %v1366_v15 = vpop.f32.mrf.mxu0  ;;  %v2500_v11 = vld [vmem:[%s6265_s5 + $0x50] sm:$0xff] }
 0x272   : > { %v5370_v5 = vadd.f32 %v1366_v15, %v5131_v27  ;;  %v2505_v27 = vld [vmem:[%s6265_s5 + $0x78] sm:$0xff]  ;;  %2578 = vperm.xlu1 %4489, %v2500_v11  }
 0x273   : > { %2603 = vperm.xlu0 %4488, %v2505_v27   ;;  %v2501_v11 = vld [vmem:[%s6265_s5 + $0x58] sm:$0xff] }
 0x274   : > { %6273 = vst [vmem:[#allocation9_spill] sm:$0xff] %v5370_v5  ;;  %4368 = vmatmul.msk.bf16.gmra.mxu0 %vm364_vm1, %v2206_v14  ;;  %v5424_v14 = vpop.f32.mrf.mxu2  ;;  %v2509_v27 = vld [vmem:[%s6265_s5 + $0x98] sm:$0xff]  ;;  %2583 = vperm.xlu2 %4490, %v2501_v11  }
 0x275   : > { %4359 = vmatmul.msk.bf16.gmra.mxu3 %vm364_vm1, %v1968_v50 }
 0x278   : > { %v2070_v8 = vpop.f32.mrf.mxu3 }
 0x279   : > { %v5385_v33 = vadd.f32 %v2070_v8, %v5177_v53  ;;  %v1368_v6 = vpop.f32.mrf.mxu0  ;;  %v5401_v53 = vpop.f32.mrf.mxu1  ;;  %v2514_v8 = vld [vmem:[%s6265_s5 + $0xc0] sm:$0xff] }
 0x27a   : > { %v5388_v30 = vadd.f32 %v1368_v6, %v5143_v39  ;;  %v1949_v39 = vld [vmem:[%s4569_s10 + $0x11d] sm:$0xff]  ;;  %2593 = vperm.xlu1 %4489, %v2503_v17   ;;  %v2178_v6 = vld [vmem:[%s4569_s10 + $0x86] sm:$0xff] }
 0x27b   : > { %2618 = vperm.xlu0 %4488, %v2508_v23   ;;  %v1969_v28 = vpack.c.bf16 %v1949_v39, %v1948_v43  ;;  %v1950_v17 = vld [vmem:[%s4569_s10 + $0x125] sm:$0xff]  ;;  %v1951_v23 = vld [vmem:[%s4569_s10 + $0x12d] sm:$0xff]  ;;  %v2208_v31 = vpack.c.bf16 %v2179_v55, %v2178_v6 }
 0x27c   : > { %6274 = vst [vmem:[#allocation10_spill] sm:$0xff] %v5388_v30  ;;  %v1970_v43 = vpack.c.bf16 %v1951_v23, %v1950_v17  ;;  %v1952_v17 = vld [vmem:[%s4569_s10 + $0x135] sm:$0xff] }
 0x280   : > { %v5407_v7 = vpop.f32.mrf.mxu3 }
 0x281   : > { %v1371_v16 = vpop.f32.mrf.mxu0  ;;  %v5420_v52 = vpop.f32.mrf.mxu1 }
 0x282   : > { %v5410_v21 = vadd.f32 %v1371_v16, %v5153_v48  ;;  %2608 = vperm.xlu1 %4489, %v2506_v25   ;;  %v5449_v16 = vpop.f32.mrf.mxu2  ;;  %v2512_v25 = vld [vmem:[%s6265_s5 + $0xb0] sm:$0xff] }
 0x283   : > { %2633 = vperm.xlu0 %4488, %v2511_v61   ;;  %v2517_v61 = vld [vmem:[%s6265_s5 + $0xd8] sm:$0xff] }
 0x284   : > { %6275 = vst [vmem:[#allocation11_spill] sm:$0xff] %v5410_v21  ;;  %4369 = vmatmul.msk.bf16.gmra.mxu0 %vm364_vm1, %v2207_v1 }
 0x285   : > { %4360 = vmatmul.msk.bf16.gmra.mxu3 %vm364_vm1, %v1969_v28  ;;  %v2504_v28 = vld [vmem:[%s6265_s5 + $0x70] sm:$0xff] }
 0x286   : > { %2598 = vperm.xlu2 %4490, %v2504_v28   ;;  %v2515_v28 = vld [vmem:[%s6265_s5 + $0xc8] sm:$0xff] }
 0x288   : > { %v5422_v48 = vpop.f32.mrf.mxu3 }
 0x289   : > { %v1373_v15 = vpop.f32.mrf.mxu0  ;;  %v5444_v39 = vpop.f32.mrf.mxu1 }
 0x28a   : > { %v5427_v50 = vadd.f32 %v1373_v15, %v5165_v10  ;;  %2623 = vperm.xlu1 %4489, %v2509_v27   ;;  %v4503_v15 = vmov 0.0   ;;  %v5490_v23 = vpop.f32.mrf.mxu2 }
 0x28b   : > { %2648 = vperm.xlu0 %4488, %v2514_v8   ;;  %2744 = vst.msk [vmem:[#allocation2 + $0x10] sm:$0xff] %vm364_vm1, %v4503_v15 }
 0x28c   : > { %6276 = vst [vmem:[#allocation12_spill] sm:$0xff] %v5427_v50 }
 0x28d   : > { %2745 = vst.msk [vmem:[#allocation2 + $0x18] sm:$0xff] %vm364_vm1, %v4503_v15 }
 0x28e   : > { %2742 = vst.msk [vmem:[#allocation2] sm:$0xff] %vm364_vm1, %v4503_v15 }
 0x28f   : > { %2743 = vst.msk [vmem:[#allocation2 + $0x8] sm:$0xff] %vm364_vm1, %v4503_v15 }
 0x290   : > { %v5442_v10 = vpop.f32.mrf.mxu3  ;;  %2746 = vst.msk [vmem:[#allocation2 + $0x20] sm:$0xff] %vm364_vm1, %v4503_v15 }
 0x291   : > { %v1376_v9 = vpop.f32.mrf.mxu0  ;;  %2747 = vst.msk [vmem:[#allocation2 + $0x28] sm:$0xff] %vm364_vm1, %v4503_v15  ;;  %v5485_v55 = vpop.f32.mrf.mxu1 }
 0x292   : > { %v5447_v1 = vadd.f32 %v1376_v9, %v5175_v41  ;;  %v4401_v41 = vld [vmem:[%s6263_s3 + $0x4] sm:$0x3]  ;;  %2638 = vperm.xlu1 %4489, %v2512_v25   ;;  %2748 = vst.msk [vmem:[#allocation2 + $0x30] sm:$0xff] %vm364_vm1, %v4503_v15  ;;  %v2180_v9 = vld [vmem:[%s4569_s10 + $0x96] sm:$0xff] }
 0x293   : > { %2663 = vperm.xlu0 %4488, %v2517_v61   ;;  %v3157_v11 = vsel %vm419_vm0, %v4401_v41, 0  ;;  %2749 = vst.msk [vmem:[#allocation2 + $0x38] sm:$0xff] %vm364_vm1, %v4503_v15  ;;  %v2520_v25 = vld [vmem:[%s6265_s5 + $0xf0] sm:$0xff] }
 0x294   : > { %6277 = vst [vmem:[#allocation13_spill] sm:$0xff] %v5447_v1  ;;  %4370 = vmatmul.msk.bf16.gmra.mxu0 %vm364_vm1, %v2208_v31  ;;  %3166 = vmatpush.bf16.msrb.mxu3 %v3157_v11  ;;  %v1953_v31 = vld [vmem:[%s4569_s10 + $0x13d] sm:$0xff] }
 0x295   : > { %4361 = vmatmul.msk.bf16.gmra.mxu3 %vm364_vm1, %v1970_v43  ;;  %v2181_v43 = vld [vmem:[%s4569_s10 + $0x9e] sm:$0xff]  ;;  %2750 = vst.msk [vmem:[#allocation2 + $0x40] sm:$0xff] %vm364_vm1, %v4503_v15 }
 0x296   : > { %2751 = vst.msk [vmem:[#allocation2 + $0x48] sm:$0xff] %vm364_vm1, %v4503_v15  ;;  %v2209_v41 = vpack.c.bf16 %v2181_v43, %v2180_v9  ;;  %v5542_v43 = vpop.f32.mrf.mxu2  ;;  %v2539_v40 = vpop.permute.xlu1 %2538 }
 0x297   : > { %2752 = vst.msk [vmem:[#allocation2 + $0x50] sm:$0xff] %vm364_vm1, %v4503_v15 }
 0x298   : > { %v5472_v27 = vpop.f32.mrf.mxu3  ;;  %2753 = vst.msk [vmem:[#allocation2 + $0x58] sm:$0xff] %vm364_vm1, %v4503_v15 }
 0x299   : > { %v1378_v8 = vpop.f32.mrf.mxu0  ;;  %2754 = vst.msk [vmem:[#allocation2 + $0x60] sm:$0xff] %vm364_vm1, %v4503_v15  ;;  %v5538_v9 = vpop.f32.mrf.mxu1 }
 0x29a   : > { %v5479_v6 = vadd.f32 %v1378_v8, %v5189_v22  ;;  %v2507_v22 = vld [vmem:[%s6265_s5 + $0x88] sm:$0xff]  ;;  %2653 = vperm.xlu1 %4489, %v2515_v28   ;;  %v1971_v8 = vpack.c.bf16 %v1953_v31, %v1952_v17  ;;  %2755 = vst.msk [vmem:[#allocation2 + $0x68] sm:$0xff] %vm364_vm1, %v4503_v15  ;;  %v2510_v17 = vld [vmem:[%s6265_s5 + $0xa0] sm:$0xff] }
 0x29b   : > { %2613 = vperm.xlu2 %4490, %v2507_v22   ;;  %2678 = vperm.xlu0 %4488, %v2520_v25   ;;  %2756 = vst.msk [vmem:[#allocation2 + $0x70] sm:$0xff] %vm364_vm1, %v4503_v15  ;;  %v2523_v31 = vld [vmem:[%s6265_s5 + $0x108] sm:$0xff] }
 0x29c   : > { %6278 = vst [vmem:[#allocation14_spill] sm:$0xff] %v5479_v6 }
 0x29d   : > { %2757 = vst.msk [vmem:[#allocation2 + $0x78] sm:$0xff] %vm364_vm1, %v4503_v15 }
 0x29e   : > { %2758 = vst.msk [vmem:[#allocation2 + $0x80] sm:$0xff] %vm364_vm1, %v4503_v15 }
 0x29f   : > { %2759 = vst.msk [vmem:[#allocation2 + $0x88] sm:$0xff] %vm364_vm1, %v4503_v15 }
 0x2a0   : > { %v5510_v61 = vpop.f32.mrf.mxu3  ;;  %2760 = vst.msk [vmem:[#allocation2 + $0x90] sm:$0xff] %vm364_vm1, %v4503_v15 }
 0x2a1   : > { %v1381_v11 = vpop.f32.mrf.mxu0  ;;  %2761 = vst.msk [vmem:[#allocation2 + $0x98] sm:$0xff] %vm364_vm1, %v4503_v15 }
 0x2a2   : > { %v5517_v6 = vadd.f32 %v1381_v11, %v5199_v62  ;;  %v2518_v62 = vld [vmem:[%s6265_s5 + $0xe0] sm:$0xff]  ;;  %2762 = vst.msk [vmem:[#allocation2 + $0xa0] sm:$0xff] %vm364_vm1, %v4503_v15  ;;  %v2183_v11 = vld [vmem:[%s4569_s10 + $0xae] sm:$0xff] }
 0x2a3   : > { %2628 = vperm.xlu2 %4490, %v2510_v17   ;;  %2668 = vperm.xlu1 %4489, %v2518_v62   ;;  %2763 = vst.msk [vmem:[#allocation2 + $0xa8] sm:$0xff] %vm364_vm1, %v4503_v15  ;;  %v5575_v17 = vpop.f32.mrf.mxu1 }
 0x2a4   : > { %6279 = vst [vmem:[#allocation15_spill] sm:$0xff] %v5517_v6  ;;  %4371 = vmatmul.msk.bf16.gmra.mxu0 %vm364_vm1, %v2209_v41  ;;  %2693 = vperm.xlu0 %4488, %v2523_v31   ;;  %v2182_v41 = vld [vmem:[%s4569_s10 + $0xa6] sm:$0xff]  ;;  %v5582_v31 = vld [vmem:[%s6262_s2] ss:$0 sm:$0xff] }
 0x2a5   : > { %4362 = vmatmul.msk.bf16.gmra.mxu3 %vm364_vm1, %v1971_v8  ;;  %2764 = vst.msk [vmem:[#allocation2 + $0xb0] sm:$0xff] %vm364_vm1, %v4503_v15  ;;  %v2513_v8 = vld [vmem:[%s6265_s5 + $0xb8] sm:$0xff] }
 0x2a6   : > { %2765 = vst.msk [vmem:[#allocation2 + $0xb8] sm:$0xff] %vm364_vm1, %v4503_v15 }
 0x2a7   : > { %2766 = vst.msk [vmem:[#allocation2 + $0xc0] sm:$0xff] %vm364_vm1, %v4503_v15 }
 0x2a8   : > { %v5546_v22 = vpop.f32.mrf.mxu3  ;;  %2767 = vst.msk [vmem:[#allocation2 + $0xc8] sm:$0xff] %vm364_vm1, %v4503_v15 }
 0x2a9   : > { %v1383_v28 = vpop.f32.mrf.mxu0  ;;  %2768 = vst.msk [vmem:[#allocation2 + $0xd0] sm:$0xff] %vm364_vm1, %v4503_v15 }
 0x2aa   : > { %v5553_v25 = vadd.f32 %v1383_v28, %v5215_v36  ;;  %v2521_v36 = vld [vmem:[%s6265_s5 + $0xf8] sm:$0xff]  ;;  %v2210_v28 = vpack.c.bf16 %v2183_v11, %v2182_v41  ;;  %2769 = vst.msk [vmem:[#allocation2 + $0xd8] sm:$0xff] %vm364_vm1, %v4503_v15  ;;  %v2516_v11 = vld [vmem:[%s6265_s5 + $0xd0] sm:$0xff] }
 0x2ab   : > { %2643 = vperm.xlu2 %4490, %v2513_v8   ;;  %2683 = vperm.xlu1 %4489, %v2521_v36   ;;  %2770 = vst.msk [vmem:[#allocation2 + $0xe0] sm:$0xff] %vm364_vm1, %v4503_v15  ;;  %v2529_v36 = vpop.permute.xlu0 %2528  ;;  %v5617_v1 = vpop.f32.mrf.mxu1 }
 0x2ac   : > { %6280 = vst [vmem:[#allocation16_spill] sm:$0xff] %v5553_v25  ;;  %v5586_v25 = vpop.f32.mrf.mxu2 }
 0x2ad   : > { %2771 = vst.msk [vmem:[#allocation2 + $0xe8] sm:$0xff] %vm364_vm1, %v4503_v15 }
 0x2ae   : > { %2772 = vst.msk [vmem:[#allocation2 + $0xf0] sm:$0xff] %vm364_vm1, %v4503_v15 }
 0x2af   : > { %2773 = vst.msk [vmem:[#allocation2 + $0xf8] sm:$0xff] %vm364_vm1, %v4503_v15 }
 0x2b0   : > { %v5577_v62 = vpop.f32.mrf.mxu3  ;;  %2774 = vst.msk [vmem:[#allocation2 + $0x100] sm:$0xff] %vm364_vm1, %v4503_v15 }
 0x2b1   : > { %v2288_v6 = vpop.f32.mrf.mxu0  ;;  %2775 = vst.msk [vmem:[#allocation2 + $0x108] sm:$0xff] %vm364_vm1, %v4503_v15 }
 0x2b2   : > { %v2378_v8 = vadd.f32 %v2288_v6, %v5229_v37  ;;  %v2524_v37 = vld [vmem:[%s6265_s5 + $0x110] sm:$0xff]  ;;  %2776 = vst.msk [vmem:[#allocation2 + $0x110] sm:$0xff] %vm364_vm1, %v4503_v15 }
 0x2b3   : > { %2658 = vperm.xlu2 %4490, %v2516_v11   ;;  %2698 = vperm.xlu1 %4489, %v2524_v37   ;;  %2777 = vst.msk [vmem:[#allocation2 + $0x118] sm:$0xff] %vm364_vm1, %v4503_v15  ;;  %v2519_v37 = vld [vmem:[%s6265_s5 + $0xe8] sm:$0xff]  ;;  %v5641_v57 = vpop.f32.mrf.mxu1 }
 0x2b4   : > { %v2418_v41 = vadd.f32 %v5582_v31, %v2378_v8  ;;  %4372 = vmatmul.msk.bf16.gmra.mxu0 %vm364_vm1, %v2210_v28  ;;  %2778 = vst.msk [vmem:[#allocation2 + $0x120] sm:$0xff] %vm364_vm1, %v4503_v15  ;;  %v5621_v11 = vpop.f32.mrf.mxu2 }
 0x2b5   : > { %2779 = vst.msk [vmem:[#allocation2 + $0x128] sm:$0xff] %vm364_vm1, %v4503_v15 }
 0x2b6   : > { %v2454_v6 = vmax.f32 %v2418_v41, 0.0  ;;  %2780 = vst.msk [vmem:[#allocation2 + $0x130] sm:$0xff] %vm364_vm1, %v4503_v15 }
 0x2b7   : > { %2781 = vst.msk [vmem:[#allocation2 + $0x138] sm:$0xff] %vm364_vm1, %v4503_v15 }
 0x2b8   : > { %v2706_v28 = vmul.f32 %v2529_v36, %v2454_v6  ;;  %v5613_v8 = vpop.f32.mrf.mxu3  ;;  %v2534_v6 = vpop.permute.xlu0 %2533  ;;  %2782 = vst.msk [vmem:[#allocation2 + $0x140] sm:$0xff] %vm364_vm1, %v4503_v15  ;;  %v2522_v15 = vld [vmem:[%s6265_s5 + $0x100] sm:$0xff] }
 0x2b9   : > { %v2290_v41 = vpop.f32.mrf.mxu0  ;;  %6281 = vst [vmem:[#allocation17_spill] sm:$0xff] %v5641_v57 }
 0x2ba   : > { %2786 = vst.msk [vmem:[#allocation2 + $0x13] sm:$0xff] %vm364_vm1, %v2706_v28  ;;  %v2379_v50 = vadd.f32 %v2290_v41, %v5241_v51  ;;  %v2184_v28 = vld [vmem:[%s4569_s10 + $0xb6] sm:$0xff]  ;;  %v2185_v51 = vld [vmem:[%s4569_s10 + $0xbe] sm:$0xff] }
 0x2bb   : > { %2673 = vperm.xlu2 %4490, %v2519_v37   ;;  %v2211_v5 = vpack.c.bf16 %v2185_v51, %v2184_v28  ;;  %v2822_v28 = vld [vmem:[#allocation2] ss:$2 sm:$0xff]  ;;  %v5663_v4 = vpop.f32.mrf.mxu1 }
 0x2bc   : > { %v2419_v36 = vadd.f32 %v5582_v31, %v2379_v50  ;;  %v3083_v51 = vld [vmem:[#allocation2 + $0x2] ss:$2 sm:$0xff] }
 0x2be   : > { %v2455_v41 = vmax.f32 %v2419_v36, 0.0  ;;  %v5648_v36 = vpop.f32.mrf.mxu2 }
 0x2bf   : > { %6282 = vst [vmem:[#allocation18_spill] sm:$0xff] %v5648_v36 }
 0x2c0   : > { %v2707_v21 = vmul.f32 %v2534_v6, %v2455_v41  ;;  %v5637_v30 = vpop.f32.mrf.mxu3  ;;  %v2868_v6 = vld [vmem:[#allocation2 + $0x1] ss:$2 sm:$0xff] }
 0x2c1   : > { %v2293_v50 = vpop.f32.mrf.mxu0 }
 0x2c2   : > { %2787 = vst.msk [vmem:[#allocation2 + $0x1b] sm:$0xff] %vm364_vm1, %v2707_v21  ;;  %v2380_v38 = vadd.f32 %v2293_v50, %v5254_v18 }
 0x2c3   : > { %2688 = vperm.xlu2 %4490, %v2522_v15   ;;  %v2544_v15 = vpop.permute.xlu1 %2543 }
 0x2c4   : > { %v2420_v20 = vadd.f32 %v5582_v31, %v2380_v38  ;;  %4373 = vmatmul.msk.bf16.gmra.mxu0 %vm364_vm1, %v2211_v5 }
 0x2c6   : > { %v2456_v37 = vmax.f32 %v2420_v20, 0.0 }
 0x2c8   : > { %v2708_v21 = vmul.f32 %v2539_v40, %v2456_v37  ;;  %v5650_v18 = vpop.f32.mrf.mxu3  ;;  %v2186_v37 = vld [vmem:[%s4569_s10 + $0xc6] sm:$0xff] }
 0x2c9   : > { %6283 = vst [vmem:[#allocation19_spill] sm:$0xff] %v5650_v18  ;;  %v2295_v41 = vpop.f32.mrf.mxu0  ;;  %v2870_v38 = vld [vmem:[#allocation2 + $0x11] ss:$2 sm:$0xff]  ;;  %v2824_v50 = vld [vmem:[#allocation2 + $0x10] ss:$2 sm:$0xff] }
 0x2ca   : > { %v3085_v5 = vld [vmem:[#allocation2 + $0x12] ss:$2 sm:$0xff]  ;;  %2788 = vst.msk [vmem:[#allocation2 + $0x23] sm:$0xff] %vm364_vm1, %v2708_v21  ;;  %v2381_v12 = vadd.f32 %v2295_v41, %v5267_v44  ;;  %v2903_v57 = vpack.c.bf16 %v2870_v38, %v2868_v6  ;;  %v2857_v36 = vpack.c.bf16 %v2824_v50, %v2822_v28  ;;  %v5665_v6 = vpop.f32.mrf.mxu2  ;;  %v2549_v41 = vpop.permute.xlu2 %2548 }
 0x2cb   : > { %v3118_v20 = vpack.c.bf16 %v3085_v5, %v3083_v51  ;;  %v2187_v18 = vld [vmem:[%s4569_s10 + $0xce] sm:$0xff]  ;;  %v2525_v21 = vld [vmem:[%s6265_s5 + $0x118] sm:$0xff]  ;;  %v5673_v5 = vpop.f32.mrf.mxu1 }
 0x2cc   : > { %4383 = vmatmul.msk.bf16.vlgmr.msra.gmra.mxu1 %vm364_vm1, %v2903_v57  ;;  %4392 = vmatmul.msk.bf16.vlgmr.msra.gmra.mxu2 %vm364_vm1, %v2857_v36  ;;  %v2421_v40 = vadd.f32 %v5582_v31, %v2381_v12  ;;  %v2212_v28 = vpack.c.bf16 %v2187_v18, %v2186_v37  ;;  %6284 = vst [vmem:[#allocation20_spill] sm:$0xff] %v5673_v5 }
 0x2cd   : > { %4402 = vmatmul.msk.bf16.vlgmr.msrb.gmra.mxu3 %vm364_vm1, %v3118_v20  ;;  %2703 = vperm.xlu2 %4490, %v2525_v21  }
 0x2ce   : > { %v2457_v44 = vmax.f32 %v2421_v40, 0.0 }
 0x2d0   : > { %v2709_v57 = vmul.f32 %v2544_v15, %v2457_v44  ;;  %v5667_v36 = vpop.f32.mrf.mxu3  ;;  %v2188_v44 = vld [vmem:[%s4569_s10 + $0xd6] sm:$0xff] }
 0x2d1   : > { %v2298_v12 = vpop.f32.mrf.mxu0 }
 0x2d2   : > { %2789 = vst.msk [vmem:[#allocation2 + $0x2b] sm:$0xff] %vm364_vm1, %v2709_v57  ;;  %v2382_v51 = vadd.f32 %v2298_v12, %v5278_v56  ;;  %v5675_v40 = vpop.f32.mrf.mxu2  ;;  %v2554_v21 = vpop.permute.xlu2 %2553  ;;  %v2189_v57 = vld [vmem:[%s4569_s10 + $0xde] sm:$0xff] }
 0x2d3   : > { %6285 = vst [vmem:[#allocation21_spill] sm:$0xff] %v5675_v40  ;;  %v5684_v5 = vpop.f32.mrf.mxu1 }
 0x2d4   : > { %v2422_v38 = vadd.f32 %v5582_v31, %v2382_v51  ;;  %4374 = vmatmul.msk.bf16.gmra.mxu0 %vm364_vm1, %v2212_v28  ;;  %v2213_v51 = vpack.c.bf16 %v2189_v57, %v2188_v44  ;;  %6287 = vst [vmem:[#allocation23_spill] sm:$0xff] %v5684_v5 }
 0x2d6   : > { %v2458_v50 = vmax.f32 %v2422_v38, 0.0 }
 0x2d8   : > { %v2710_v20 = vmul.f32 %v2549_v41, %v2458_v50  ;;  %v5679_v37 = vpop.f32.mrf.mxu3 }
 0x2d9   : > { %v2300_v18 = vpop.f32.mrf.mxu0  ;;  %6286 = vst [vmem:[#allocation22_spill] sm:$0xff] %v5679_v37  ;;  %v2826_v44 = vld [vmem:[#allocation2 + $0x20] ss:$2 sm:$0xff] }
 0x2da   : > { %2790 = vst.msk [vmem:[#allocation2 + $0x33] sm:$0xff] %vm364_vm1, %v2710_v20  ;;  %v2383_v15 = vadd.f32 %v2300_v18, %v5291_v35  ;;  %v5688_v50 = vpop.f32.mrf.mxu2  ;;  %v2559_v18 = vpop.permute.xlu0 %2558  ;;  %v3087_v57 = vld [vmem:[#allocation2 + $0x22] ss:$2 sm:$0xff] }
 0x2db   : > { %6288 = vst [vmem:[#allocation24_spill] sm:$0xff] %v5688_v50  ;;  %v2190_v37 = vld [vmem:[%s4569_s10 + $0xe6] sm:$0xff] }
 0x2dc   : > { %v2423_v56 = vadd.f32 %v5582_v31, %v2383_v15 }
 0x2de   : > { %v2459_v12 = vmax.f32 %v2423_v56, 0.0 }
 0x2e0   : > { %v2711_v28 = vmul.f32 %v2554_v21, %v2459_v12  ;;  %v5692_v20 = vpop.f32.mrf.mxu3  ;;  %v2872_v21 = vld [vmem:[#allocation2 + $0x21] ss:$2 sm:$0xff] }
 0x2e1   : > { %v2303_v38 = vpop.f32.mrf.mxu0  ;;  %6289 = vst [vmem:[#allocation25_spill] sm:$0xff] %v5692_v20  ;;  %v5696_v20 = vpop.f32.mrf.mxu1 }
 0x2e2   : > { %2791 = vst.msk [vmem:[#allocation2 + $0x3b] sm:$0xff] %vm364_vm1, %v2711_v28  ;;  %v2384_v41 = vadd.f32 %v2303_v38, %v5299_v54 }
 0x2e4   : > { %v2424_v35 = vadd.f32 %v5582_v31, %v2384_v41  ;;  %4375 = vmatmul.msk.bf16.gmra.mxu0 %vm364_vm1, %v2213_v51 }
 0x2e6   : > { %v2460_v15 = vmax.f32 %v2424_v35, 0.0 }
 0x2e8   : > { %v2712_v56 = vmul.f32 %v2559_v18, %v2460_v15  ;;  %v5701_v18 = vpop.f32.mrf.mxu2  ;;  %v2564_v15 = vpop.permute.xlu1 %2563 }
 0x2e9   : > { %v2305_v12 = vpop.f32.mrf.mxu0  ;;  %v2874_v5 = vld [vmem:[#allocation2 + $0x31] ss:$2 sm:$0xff]  ;;  %v2828_v28 = vld [vmem:[#allocation2 + $0x30] ss:$2 sm:$0xff] }
 0x2ea   : > { %v3089_v54 = vld [vmem:[#allocation2 + $0x32] ss:$2 sm:$0xff]  ;;  %2792 = vst.msk [vmem:[#allocation2 + $0x43] sm:$0xff] %vm364_vm1, %v2712_v56  ;;  %v2385_v38 = vadd.f32 %v2305_v12, %v5309_v49  ;;  %v2904_v41 = vpack.c.bf16 %v2874_v5, %v2872_v21  ;;  %v2858_v51 = vpack.c.bf16 %v2828_v28, %v2826_v44  ;;  %v5706_v49 = vpop.f32.mrf.mxu3  ;;  %v5712_v28 = vpop.f32.mrf.mxu1 }
 0x2eb   : > { %v3119_v50 = vpack.c.bf16 %v3089_v54, %v3087_v57  ;;  %v2191_v56 = vld [vmem:[%s4569_s10 + $0xee] sm:$0xff] }
 0x2ec   : > { %4384 = vmatmul.msk.bf16.gmra.mxu1 %vm364_vm1, %v2904_v41  ;;  %4393 = vmatmul.msk.bf16.gmra.mxu2 %vm364_vm1, %v2858_v51  ;;  %v2425_v35 = vadd.f32 %v5582_v31, %v2385_v38  ;;  %v2214_v21 = vpack.c.bf16 %v2191_v56, %v2190_v37 }
 0x2ed   : > { %4403 = vmatmul.msk.bf16.gmra.mxu3 %vm364_vm1, %v3119_v50  ;;  %v2569_v50 = vpop.permute.xlu2 %2568 }
 0x2ee   : > { %v2461_v40 = vmax.f32 %v2425_v35, 0.0  ;;  %v2192_v35 = vld [vmem:[%s4569_s10 + $0xf6] sm:$0xff] }
 0x2f0   : > { %v2713_v5 = vmul.f32 %v2564_v15, %v2461_v40  ;;  %v5714_v38 = vpop.f32.mrf.mxu2  ;;  %v2193_v15 = vld [vmem:[%s4569_s10 + $0xfe] sm:$0xff] }
 0x2f1   : > { %v2308_v44 = vpop.f32.mrf.mxu0  ;;  %6290 = vst [vmem:[#allocation26_spill] sm:$0xff] %v5714_v38 }
 0x2f2   : > { %2793 = vst.msk [vmem:[#allocation2 + $0x4b] sm:$0xff] %vm364_vm1, %v2713_v5  ;;  %v2386_v57 = vadd.f32 %v2308_v44, %v5320_v13  ;;  %v5716_v40 = vpop.f32.mrf.mxu3  ;;  %v2574_v5 = vpop.permute.xlu0 %2573 }
 0x2f3   : > { %6291 = vst [vmem:[#allocation27_spill] sm:$0xff] %v5716_v40 }
 0x2f4   : > { %v2426_v12 = vadd.f32 %v5582_v31, %v2386_v57  ;;  %4376 = vmatmul.msk.bf16.gmra.mxu0 %vm364_vm1, %v2214_v21  ;;  %v5723_v21 = vpop.f32.mrf.mxu1  ;;  %v2215_v57 = vpack.c.bf16 %v2193_v15, %v2192_v35 }
 0x2f5   : > { %6292 = vst [vmem:[#allocation28_spill] sm:$0xff] %v5723_v21  ;;  %v2584_v38 = vpop.permute.xlu2 %2583 }
 0x2f6   : > { %v2462_v54 = vmax.f32 %v2426_v12, 0.0 }
 0x2f8   : > { %v2714_v41 = vmul.f32 %v2569_v50, %v2462_v54  ;;  %v5725_v12 = vpop.f32.mrf.mxu2 }
 0x2f9   : > { %v2310_v37 = vpop.f32.mrf.mxu0  ;;  %6293 = vst [vmem:[#allocation29_spill] sm:$0xff] %v5725_v12  ;;  %v2876_v40 = vld [vmem:[#allocation2 + $0x41] ss:$2 sm:$0xff]  ;;  %v2830_v21 = vld [vmem:[#allocation2 + $0x40] ss:$2 sm:$0xff] }
 0x2fa   : > { %2794 = vst.msk [vmem:[#allocation2 + $0x53] sm:$0xff] %vm364_vm1, %v2714_v41  ;;  %v2387_v51 = vadd.f32 %v2310_v37, %v5336_v2  ;;  %v5729_v41 = vpop.f32.mrf.mxu3  ;;  %v2579_v37 = vpop.permute.xlu1 %2578 }
 0x2fb   : > { %6294 = vst [vmem:[#allocation30_spill] sm:$0xff] %v5729_v41  ;;  %v2195_v41 = vld [vmem:[%s4569_s10 + $0x10e] sm:$0xff] }
 0x2fc   : > { %v2427_v13 = vadd.f32 %v5582_v31, %v2387_v51  ;;  %v5733_v12 = vpop.f32.mrf.mxu1 }
 0x2fd   : > { %6295 = vst [vmem:[#allocation31_spill] sm:$0xff] %v5733_v12  ;;  %v2194_v12 = vld [vmem:[%s4569_s10 + $0x106] sm:$0xff] }
 0x2fe   : > { %v2463_v56 = vmax.f32 %v2427_v13, 0.0 }
 0x300   : > { %v2715_v44 = vmul.f32 %v2574_v5, %v2463_v56  ;;  %v3091_v56 = vld [vmem:[#allocation2 + $0x42] ss:$2 sm:$0xff] }
 0x301   : > { %v2313_v50 = vpop.f32.mrf.mxu0 }
 0x302   : > { %2795 = vst.msk [vmem:[#allocation2 + $0x5b] sm:$0xff] %vm364_vm1, %v2715_v44  ;;  %v2388_v54 = vadd.f32 %v2313_v50, %v5350_v59 }
 0x304   : > { %v2428_v2 = vadd.f32 %v5582_v31, %v2388_v54  ;;  %4377 = vmatmul.msk.bf16.gmra.mxu0 %vm364_vm1, %v2215_v57 }
 0x306   : > { %v2464_v51 = vmax.f32 %v2428_v2, 0.0  ;;  %v5737_v2 = vpop.f32.mrf.mxu2 }
 0x308   : > { %v2716_v13 = vmul.f32 %v2579_v37, %v2464_v51  ;;  %v5742_v51 = vpop.f32.mrf.mxu3 }
 0x309   : > { %v2315_v35 = vpop.f32.mrf.mxu0  ;;  %v2878_v15 = vld [vmem:[#allocation2 + $0x51] ss:$2 sm:$0xff]  ;;  %v2832_v5 = vld [vmem:[#allocation2 + $0x50] ss:$2 sm:$0xff] }
 0x30a   : > { %v3093_v44 = vld [vmem:[#allocation2 + $0x52] ss:$2 sm:$0xff]  ;;  %2796 = vst.msk [vmem:[#allocation2 + $0x63] sm:$0xff] %vm364_vm1, %v2716_v13  ;;  %v2389_v59 = vadd.f32 %v2315_v35, %v5367_v58  ;;  %v2905_v50 = vpack.c.bf16 %v2878_v15, %v2876_v40  ;;  %v2859_v57 = vpack.c.bf16 %v2832_v5, %v2830_v21  ;;  %v2216_v40 = vpack.c.bf16 %v2195_v41, %v2194_v12  ;;  %v5751_v15 = vpop.f32.mrf.mxu1  ;;  %v2589_v41 = vpop.permute.xlu0 %2588 }
 0x30b   : > { %v3120_v54 = vpack.c.bf16 %v3093_v44, %v3091_v56  ;;  %v1647_v35 = vadd.f32 %v5352_v19, %v5180_v45 }
 0x30c   : > { %v2429_v37 = vadd.f32 %v5582_v31, %v2389_v59  ;;  %4385 = vmatmul.msk.bf16.gmra.mxu1 %vm364_vm1, %v2905_v50  ;;  %4394 = vmatmul.msk.bf16.gmra.mxu2 %vm364_vm1, %v2859_v57  ;;  %v1648_v57 = vadd.f32 %v5372_v42, %v5192_v46  ;;  %v1649_v42 = vadd.f32 %v5401_v53, %v5202_v32 }
 0x30d   : > { %4404 = vmatmul.msk.bf16.gmra.mxu3 %vm364_vm1, %v3120_v54 }
 0x30e   : > { %v2465_v13 = vmax.f32 %v2429_v37, 0.0  ;;  %v5755_v44 = vpop.f32.mrf.mxu2  ;;  %v2196_v37 = vld [vmem:[%s4569_s10 + $0x116] sm:$0xff] }
 0x310   : > { %v2717_v58 = vmul.f32 %v2584_v38, %v2465_v13  ;;  %v1895_v38 = vadd.f32 %v5357_v29, %v1647_v35  ;;  %v5758_v59 = vpop.f32.mrf.mxu3  ;;  %v2197_v13 = vld [vmem:[%s4569_s10 + $0x11e] sm:$0xff]  ;;  %v1896_v29 = vadd.f32 %v5375_v3, %v1648_v57 }
 0x311   : > { %v2318_v21 = vpop.f32.mrf.mxu0 }
 0x312   : > { %2797 = vst.msk [vmem:[#allocation2 + $0x6b] sm:$0xff] %vm364_vm1, %v2717_v58  ;;  %v2390_v56 = vadd.f32 %v2318_v21, %v5385_v33  ;;  %v2143_v33 = vadd.f32 %v5407_v7, %v1895_v38  ;;  %v5768_v58 = vpop.f32.mrf.mxu1  ;;  %v2594_v7 = vpop.permute.xlu1 %2593 }
 0x314   : > { %v2430_v5 = vadd.f32 %v5582_v31, %v2390_v56  ;;  %4378 = vmatmul.msk.bf16.gmra.mxu0 %vm364_vm1, %v2216_v40  ;;  %v2144_v56 = vadd.f32 %v5422_v48, %v1896_v29 }
 0x316   : > { %v2466_v12 = vmax.f32 %v2430_v5, 0.0  ;;  %v5770_v21 = vpop.f32.mrf.mxu2  ;;  %v2217_v5 = vpack.c.bf16 %v2197_v13, %v2196_v37 }
 0x318   : > { %v2718_v50 = vmul.f32 %v2589_v41, %v2466_v12  ;;  %v5773_v38 = vpop.f32.mrf.mxu3  ;;  %v1897_v41 = vadd.f32 %v5405_v63, %v1649_v42  ;;  %v2199_v42 = vld [vmem:[%s4569_s10 + $0x12e] sm:$0xff] }
 0x319   : > { %v2320_v45 = vpop.f32.mrf.mxu0  ;;  %v2880_v57 = vld [vmem:[#allocation2 + $0x61] ss:$2 sm:$0xff]  ;;  %v3095_v37 = vld [vmem:[#allocation2 + $0x62] ss:$2 sm:$0xff] }
 0x31a   : > { %2798 = vst.msk [vmem:[#allocation2 + $0x73] sm:$0xff] %vm364_vm1, %v2718_v50  ;;  %v2391_v19 = vadd.f32 %v2320_v45, %v2143_v33  ;;  %v2599_v50 = vpop.permute.xlu2 %2598  ;;  %v2145_v48 = vadd.f32 %v5442_v10, %v1897_v41  ;;  %v5782_v45 = vpop.f32.mrf.mxu1 }
 0x31c   : > { %v2431_v54 = vadd.f32 %v5582_v31, %v2391_v19 }
 0x31e   : > { %v2467_v40 = vmax.f32 %v2431_v54, 0.0  ;;  %v2834_v54 = vld [vmem:[#allocation2 + $0x60] ss:$2 sm:$0xff]  ;;  %v5784_v13 = vpop.f32.mrf.mxu2 }
 0x320   : > { %v2719_v35 = vmul.f32 %v2594_v7, %v2467_v40 }
 0x321   : > { %v2323_v12 = vpop.f32.mrf.mxu0 }
 0x322   : > { %2799 = vst.msk [vmem:[#allocation2 + $0x7b] sm:$0xff] %vm364_vm1, %v2719_v35  ;;  %v2392_v46 = vadd.f32 %v2323_v12, %v2144_v56  ;;  %v5787_v35 = vpop.f32.mrf.mxu3 }
 0x324   : > { %v2432_v3 = vadd.f32 %v5582_v31, %v2392_v46  ;;  %4379 = vmatmul.msk.bf16.gmra.mxu0 %vm364_vm1, %v2217_v5  ;;  %v1650_v5 = vadd.f32 %v5420_v52, %v5218_v24  ;;  %v2198_v46 = vld [vmem:[%s4569_s10 + $0x126] sm:$0xff]  ;;  %v5802_v52 = vpop.f32.mrf.mxu1 }
 0x325   : > { %v4441_v24 = vld [vmem:[%s6263_s3 + $0xc] sm:$0x3] }
 0x326   : > { %v2468_v33 = vmax.f32 %v2432_v3, 0.0  ;;  %v1898_v3 = vadd.f32 %v5424_v14, %v1650_v5  ;;  %v4421_v14 = vld [vmem:[%s6263_s3 + $0x8] sm:$0x3]  ;;  %v2609_v5 = vpop.permute.xlu1 %2608 }
 0x328   : > { %v2720_v19 = vmul.f32 %v2599_v50, %v2468_v33  ;;  %v2604_v33 = vpop.permute.xlu0 %2603  ;;  %v2146_v50 = vadd.f32 %v5472_v27, %v1898_v3  ;;  %v4411_v27 = vld [vmem:[%s6263_s3 + $0x6] sm:$0x3] }
 0x329   : > { %v2325_v32 = vpop.f32.mrf.mxu0  ;;  %v2882_v53 = vld [vmem:[#allocation2 + $0x71] ss:$2 sm:$0xff]  ;;  %v2836_v29 = vld [vmem:[#allocation2 + $0x70] ss:$2 sm:$0xff] }
 0x32a   : > { %v3097_v40 = vld [vmem:[#allocation2 + $0x72] ss:$2 sm:$0xff]  ;;  %2800 = vst.msk [vmem:[#allocation2 + $0x83] sm:$0xff] %vm364_vm1, %v2720_v19  ;;  %v2393_v63 = vadd.f32 %v2325_v32, %v2145_v48  ;;  %v2906_v7 = vpack.c.bf16 %v2882_v53, %v2880_v57  ;;  %v2860_v56 = vpack.c.bf16 %v2836_v29, %v2834_v54  ;;  %v2218_v19 = vpack.c.bf16 %v2199_v42, %v2198_v46  ;;  %v5812_v32 = vpop.f32.mrf.mxu2 }
 0x32b   : > { %v3121_v10 = vpack.c.bf16 %v3097_v40, %v3095_v37  ;;  %v3719_v37 = vsel %vm419_vm0, %v4441_v24, 0  ;;  %v3438_v53 = vsel %vm419_vm0, %v4421_v14, 0  ;;  %v3289_v29 = vsel %vm419_vm0, %v4411_v27, 0 }
 0x32c   : > { %v2433_v12 = vadd.f32 %v5582_v31, %v2393_v63  ;;  %4386 = vmatmul.msk.bf16.gmra.mxu1 %vm364_vm1, %v2906_v7  ;;  %4395 = vmatmul.msk.bf16.gmra.mxu2 %vm364_vm1, %v2860_v56  ;;  %v1651_v40 = vadd.f32 %v5444_v39, %v5232_v26  ;;  %v5820_v7 = vpop.f32.mrf.mxu3  ;;  %v1652_v39 = vadd.f32 %v5485_v55, %v5244_v47  ;;  %v5827_v3 = vpop.f32.mrf.mxu1 }
 0x32d   : > { %4405 = vmatmul.msk.bf16.gmra.mxu3 %vm364_vm1, %v3121_v10  ;;  %3728 = vmatpush.bf16.msrb.mxu0 %v3719_v37  ;;  %v1653_v55 = vadd.f32 %v5538_v9, %v5257_v60 }
 0x32e   : > { %v2469_v41 = vmax.f32 %v2433_v12, 0.0  ;;  %3447 = vmatpush.bf16.msrb.mxu2 %v3438_v53  ;;  %3298 = vmatpush.bf16.msrb.mxu1 %v3289_v29  ;;  %v1899_v56 = vadd.f32 %v5449_v16, %v1651_v40  ;;  %v2201_v16 = vld [vmem:[%s4569_s10 + $0x13e] sm:$0xff] }
 0x330   : > { %v2721_v48 = vmul.f32 %v2604_v33, %v2469_v41  ;;  %v2147_v12 = vadd.f32 %v5510_v61, %v1899_v56  ;;  %v2614_v61 = vpop.permute.xlu2 %2613 }
 0x331   : > { %v2328_v57 = vpop.f32.mrf.mxu0 }
 0x332   : > { %2801 = vst.msk [vmem:[#allocation2 + $0x8b] sm:$0xff] %vm364_vm1, %v2721_v48  ;;  %v2394_v54 = vadd.f32 %v2328_v57, %v2146_v50  ;;  %v5830_v33 = vpop.f32.mrf.mxu2  ;;  %v2200_v50 = vld [vmem:[%s4569_s10 + $0x136] sm:$0xff]  ;;  %v1900_v48 = vadd.f32 %v5490_v23, %v1652_v39  ;;  %v1901_v23 = vadd.f32 %v5542_v43, %v1653_v55 }
 0x333   : > { %v2219_v14 = vpack.c.bf16 %v2201_v16, %v2200_v50  ;;  %v1654_v16 = vadd.f32 %v5575_v17, %v5270_v0 }
 0x334   : > { %v2434_v63 = vadd.f32 %v5582_v31, %v2394_v54  ;;  %4380 = vmatmul.msk.bf16.gmra.mxu0 %vm364_vm1, %v2218_v19  ;;  %v5835_v57 = vpop.f32.mrf.mxu3  ;;  %v2148_v24 = vadd.f32 %v5546_v22, %v1900_v48  ;;  %v5844_v53 = vpop.f32.mrf.mxu1 }
 0x335   : > { %v2619_v22 = vpop.permute.xlu0 %2618  ;;  %v1902_v48 = vadd.f32 %v5586_v25, %v1654_v16  ;;  %v1655_v25 = vadd.f32 %v5617_v1, %v5281_v34  ;;  %v6298_v1 = vld [vmem:[#allocation18_spill] sm:$0xff] }
 0x336   : > { %v2470_v10 = vmax.f32 %v2434_v63, 0.0  ;;  %v2149_v63 = vadd.f32 %v5577_v62, %v1901_v23  ;;  %v3664_v16 = vld [vmem:[#allocation2 + $0x54] ss:$2 sm:$0xff] }
 0x338   : > { %v2722_v46 = vmul.f32 %v2609_v5, %v2470_v10 }
 0x339   : > { %v2330_v42 = vpop.f32.mrf.mxu0  ;;  %v2884_v10 = vld [vmem:[#allocation2 + $0x81] ss:$2 sm:$0xff]  ;;  %v2838_v5 = vld [vmem:[#allocation2 + $0x80] ss:$2 sm:$0xff] }
 0x33a   : > { %2802 = vst.msk [vmem:[#allocation2 + $0x93] sm:$0xff] %vm364_vm1, %v2722_v46  ;;  %v2395_v26 = vadd.f32 %v2330_v42, %v2147_v12  ;;  %v5846_v40 = vpop.f32.mrf.mxu2  ;;  %v3099_v12 = vld [vmem:[#allocation2 + $0x82] ss:$2 sm:$0xff] }
 0x33c   : > { %v2435_v41 = vadd.f32 %v5582_v31, %v2395_v26  ;;  %v5849_v46 = vpop.f32.mrf.mxu3 }
 0x33e   : > { %v2471_v19 = vmax.f32 %v2435_v41, 0.0 }
 0x340   : > { %v2723_v54 = vmul.f32 %v2614_v61, %v2471_v19  ;;  %v2624_v19 = vpop.permute.xlu1 %2623 }
 0x341   : > { %v2333_v37 = vpop.f32.mrf.mxu0 }
 0x342   : > { %2803 = vst.msk [vmem:[#allocation2 + $0x9b] sm:$0xff] %vm364_vm1, %v2723_v54  ;;  %v2396_v47 = vadd.f32 %v2333_v37, %v2148_v24  ;;  %v2150_v37 = vadd.f32 %v5613_v8, %v1902_v48  ;;  %v1903_v8 = vadd.f32 %v5621_v11, %v1655_v25  ;;  %v6299_v11 = vld [vmem:[#allocation19_spill] sm:$0xff] }
 0x344   : > { %v2436_v27 = vadd.f32 %v5582_v31, %v2396_v47  ;;  %4381 = vmatmul.msk.bf16.gmra.mxu0 %vm364_vm1, %v2219_v14  ;;  %v3662_v14 = vld [vmem:[#allocation2 + $0x34] ss:$2 sm:$0xff] }
 0x346   : > { %v2472_v29 = vmax.f32 %v2436_v27, 0.0  ;;  %v3661_v27 = vld [vmem:[#allocation2 + $0x24] ss:$2 sm:$0xff] }
 0x348   : > { %v2724_v56 = vmul.f32 %v2619_v22, %v2472_v29  ;;  %v3680_v22 = vpack.c.bf16 %v3662_v14, %v3661_v27 }
 0x349   : > { %v2335_v60 = vpop.f32.mrf.mxu0  ;;  %v2886_v9 = vld [vmem:[#allocation2 + $0x91] ss:$2 sm:$0xff]  ;;  %v2840_v42 = vld [vmem:[#allocation2 + $0x90] ss:$2 sm:$0xff]  ;;  %v2953_v24 = vpop.f32.mrf.mxu1 }
 0x34a   : > { %v3101_v26 = vld [vmem:[#allocation2 + $0x92] ss:$2 sm:$0xff]  ;;  %2804 = vst.msk [vmem:[#allocation2 + $0xa3] sm:$0xff] %vm364_vm1, %v2724_v56  ;;  %v2397_v43 = vadd.f32 %v2335_v60, %v2149_v63  ;;  %v2907_v39 = vpack.c.bf16 %v2886_v9, %v2884_v10  ;;  %v2861_v41 = vpack.c.bf16 %v2840_v42, %v2838_v5  ;;  %v2629_v10 = vpop.permute.xlu2 %2628  ;;  %v2151_v5 = vadd.f32 %v5637_v30, %v1903_v8 }
 0x34b   : > { %v3122_v50 = vpack.c.bf16 %v3101_v26, %v3099_v12  ;;  %v6296_v42 = vld [vmem:[#allocation3_spill] sm:$0xff]  ;;  %v6297_v26 = vld [vmem:[#allocation17_spill] sm:$0xff] }
 0x34c   : > { %v2437_v62 = vadd.f32 %v5582_v31, %v2397_v43  ;;  %4387 = vmatmul.msk.bf16.gmra.mxu1 %vm364_vm1, %v2907_v39  ;;  %4396 = vmatmul.msk.bf16.gmra.mxu2 %vm364_vm1, %v2861_v41  ;;  %v1656_v43 = vadd.f32 %v6297_v26, %v6296_v42  ;;  %v3663_v30 = vld [vmem:[#allocation2 + $0x44] ss:$2 sm:$0xff] }
 0x34d   : > { %4406 = vmatmul.msk.bf16.gmra.mxu3 %vm364_vm1, %v3122_v50  ;;  %v2634_v50 = vpop.permute.xlu0 %2633  ;;  %v6301_v26 = vld [vmem:[#allocation5_spill] sm:$0xff] }
 0x34e   : > { %v2473_v61 = vmax.f32 %v2437_v62, 0.0  ;;  %v1904_v39 = vadd.f32 %v6298_v1, %v1656_v43  ;;  %v6302_v43 = vld [vmem:[#allocation20_spill] sm:$0xff]  ;;  %v6303_v1 = vld [vmem:[#allocation21_spill] sm:$0xff] }
 0x34f   : > { %v3037_v54 = vpop.f32.mrf.mxu2 }
 0x350   : > { %v2725_v47 = vmul.f32 %v2624_v19, %v2473_v61  ;;  %v3038_v55 = vadd.f32 %v3037_v54, %v2953_v24  ;;  %v3168_v0 = vpop.f32.mrf.mxu3  ;;  %v2152_v62 = vadd.f32 %v6299_v11, %v1904_v39  ;;  %v3681_v24 = vpack.c.bf16 %v3664_v16, %v3663_v30  ;;  %v6300_v54 = vld [vmem:[#allocation4_spill] sm:$0xff] }
 0x351   : > { %v2338_v17 = vpop.f32.mrf.mxu0  ;;  %v1657_v14 = vadd.f32 %v5663_v4, %v6300_v54 }
 0x352   : > { %2805 = vst.msk [vmem:[#allocation2 + $0xab] sm:$0xff] %vm364_vm1, %v2725_v47  ;;  %v5861_v23 = vadd.f32 %v3168_v0, %v3038_v55  ;;  %v2398_v29 = vadd.f32 %v2338_v17, %v2150_v37  ;;  %v2639_v55 = vpop.permute.xlu1 %2638  ;;  %v5881_v17 = vpop.f32.mrf.mxu1 }
 0x353   : > { %v1905_v47 = vadd.f32 %v5665_v6, %v1657_v14  ;;  %v3665_v14 = vld [vmem:[#allocation2 + $0x64] ss:$2 sm:$0xff] }
 0x354   : > { %v2438_v63 = vadd.f32 %v5582_v31, %v2398_v29  ;;  %4442 = vmatmul.msk.bf16.vlgmr.msrb.gmra.mxu0 %vm364_vm1, %v3680_v22 }
 0x355   : > { %v2153_v29 = vadd.f32 %v5667_v36, %v1905_v47 }
 0x356   : > { %v2474_v56 = vmax.f32 %v2438_v63, 0.0 }
 0x357   : > { %v5883_v27 = vpop.f32.mrf.mxu2 }
 0x358   : > { %v2726_v12 = vmul.f32 %v2629_v10, %v2474_v56  ;;  %v5886_v56 = vpop.f32.mrf.mxu3 }
 0x359   : > { %v2340_v60 = vpop.f32.mrf.mxu0  ;;  %v2888_v25 = vld [vmem:[#allocation2 + $0xa1] ss:$2 sm:$0xff]  ;;  %v2842_v63 = vld [vmem:[#allocation2 + $0xa0] ss:$2 sm:$0xff] }
 0x35a   : > { %2806 = vst.msk [vmem:[#allocation2 + $0xb3] sm:$0xff] %vm364_vm1, %v2726_v12  ;;  %v2399_v9 = vadd.f32 %v2340_v60, %v2151_v5  ;;  %v3103_v8 = vld [vmem:[#allocation2 + $0xa2] ss:$2 sm:$0xff] }
 0x35c   : > { %v2439_v34 = vadd.f32 %v5582_v31, %v2399_v9 }
 0x35e   : > { %v2475_v41 = vmax.f32 %v2439_v34, 0.0  ;;  %v1658_v34 = vadd.f32 %v6302_v43, %v6301_v26 }
 0x360   : > { %v2727_v48 = vmul.f32 %v2634_v50, %v2475_v41  ;;  %v1906_v39 = vadd.f32 %v6303_v1, %v1658_v34  ;;  %v2644_v41 = vpop.permute.xlu2 %2643  ;;  %v2654_v1 = vpop.permute.xlu1 %2653 }
 0x361   : > { %v2343_v19 = vpop.f32.mrf.mxu0 }
 0x362   : > { %2807 = vst.msk [vmem:[#allocation2 + $0xbb] sm:$0xff] %vm364_vm1, %v2727_v48  ;;  %v2400_v61 = vadd.f32 %v2343_v19, %v2152_v62  ;;  %v3666_v62 = vld [vmem:[#allocation2 + $0x74] ss:$2 sm:$0xff] }
 0x363   : > { %v6304_v48 = vld [vmem:[#allocation22_spill] sm:$0xff] }
 0x364   : > { %v2440_v37 = vadd.f32 %v5582_v31, %v2400_v61  ;;  %4443 = vmatmul.msk.bf16.gmra.mxu0 %vm364_vm1, %v3681_v24  ;;  %v2154_v19 = vadd.f32 %v6304_v48, %v1906_v39  ;;  %v3668_v39 = vld [vmem:[#allocation2 + $0x94] ss:$2 sm:$0xff] }
 0x366   : > { %v2476_v0 = vmax.f32 %v2440_v37, 0.0 }
 0x368   : > { %v2728_v22 = vmul.f32 %v2639_v55, %v2476_v0  ;;  %v3682_v55 = vpack.c.bf16 %v3666_v62, %v3665_v14  ;;  %v6305_v0 = vld [vmem:[#allocation6_spill] sm:$0xff] }
 0x369   : > { %v2345_v4 = vpop.f32.mrf.mxu0  ;;  %v2890_v10 = vld [vmem:[#allocation2 + $0xb1] ss:$2 sm:$0xff]  ;;  %v2844_v5 = vld [vmem:[#allocation2 + $0xb0] ss:$2 sm:$0xff]  ;;  %v2958_v16 = vpop.f32.mrf.mxu1 }
 0x36a   : > { %v3105_v12 = vld [vmem:[#allocation2 + $0xb2] ss:$2 sm:$0xff]  ;;  %2808 = vst.msk [vmem:[#allocation2 + $0xc3] sm:$0xff] %vm364_vm1, %v2728_v22  ;;  %v2401_v6 = vadd.f32 %v2345_v4, %v2153_v29  ;;  %v2908_v60 = vpack.c.bf16 %v2890_v10, %v2888_v25  ;;  %v2862_v9 = vpack.c.bf16 %v2844_v5, %v2842_v63  ;;  %v2649_v10 = vpop.permute.xlu0 %2648  ;;  %v6308_v5 = vld [vmem:[#allocation25_spill] sm:$0xff] }
 0x36b   : > { %v3123_v42 = vpack.c.bf16 %v3105_v12, %v3103_v8  ;;  %v6306_v29 = vld [vmem:[#allocation23_spill] sm:$0xff]  ;;  %v6307_v63 = vld [vmem:[#allocation24_spill] sm:$0xff] }
 0x36c   : > { %v2441_v36 = vadd.f32 %v5582_v31, %v2401_v6  ;;  %4388 = vmatmul.msk.bf16.gmra.mxu1 %vm364_vm1, %v2908_v60  ;;  %4397 = vmatmul.msk.bf16.gmra.mxu2 %vm364_vm1, %v2862_v9  ;;  %v1659_v22 = vadd.f32 %v6306_v29, %v6305_v0 }
 0x36d   : > { %4407 = vmatmul.msk.bf16.gmra.mxu3 %vm364_vm1, %v3123_v42  ;;  %v6309_v42 = vld [vmem:[#allocation7_spill] sm:$0xff] }
 0x36e   : > { %v2477_v50 = vmax.f32 %v2441_v36, 0.0  ;;  %v1907_v8 = vadd.f32 %v6307_v63, %v1659_v22  ;;  %v1660_v26 = vadd.f32 %v5696_v20, %v6309_v42  ;;  %v6314_v42 = vld [vmem:[#allocation28_spill] sm:$0xff] }
 0x36f   : > { %v3042_v11 = vpop.f32.mrf.mxu2 }
 0x370   : > { %v2729_v30 = vmul.f32 %v2644_v41, %v2477_v50  ;;  %v3043_v61 = vadd.f32 %v3042_v11, %v2958_v16  ;;  %v3173_v24 = vpop.f32.mrf.mxu3  ;;  %v2155_v12 = vadd.f32 %v6308_v5, %v1907_v8  ;;  %v1908_v34 = vadd.f32 %v5701_v18, %v1660_v26  ;;  %v3667_v11 = vld [vmem:[#allocation2 + $0x84] ss:$2 sm:$0xff] }
 0x371   : > { %v2348_v54 = vpop.f32.mrf.mxu0  ;;  %v3683_v48 = vpack.c.bf16 %v3668_v39, %v3667_v11  ;;  %v6311_v18 = vld [vmem:[#allocation26_spill] sm:$0xff]  ;;  %v5918_v14 = vpop.f32.mrf.mxu1 }
 0x372   : > { %2809 = vst.msk [vmem:[#allocation2 + $0xcb] sm:$0xff] %vm364_vm1, %v2729_v30  ;;  %v5898_v37 = vadd.f32 %v3173_v24, %v3043_v61  ;;  %v2402_v47 = vadd.f32 %v2348_v54, %v2154_v19  ;;  %v2156_v41 = vadd.f32 %v5706_v49, %v1908_v34  ;;  %v6310_v19 = vld [vmem:[#allocation8_spill] sm:$0xff]  ;;  %v2659_v24 = vpop.permute.xlu2 %2658  ;;  %v6315_v34 = vld [vmem:[#allocation29_spill] sm:$0xff]  ;;  %v6316_v11 = vld [vmem:[#allocation30_spill] sm:$0xff] }
 0x373   : > { %v1661_v30 = vadd.f32 %v5712_v28, %v6310_v19 }
 0x374   : > { %v2442_v25 = vadd.f32 %v5582_v31, %v2402_v47  ;;  %4444 = vmatmul.msk.bf16.gmra.mxu0 %vm364_vm1, %v3682_v55  ;;  %v6312_v47 = vld [vmem:[#allocation27_spill] sm:$0xff] }
 0x375   : > { %v1909_v61 = vadd.f32 %v6311_v18, %v1661_v30  ;;  %v3669_v18 = vld [vmem:[#allocation2 + $0xa4] ss:$2 sm:$0xff] }
 0x376   : > { %v2478_v4 = vmax.f32 %v2442_v25, 0.0 }
 0x377   : > { %v5920_v49 = vpop.f32.mrf.mxu2  ;;  %v2157_v55 = vadd.f32 %v6312_v47, %v1909_v61  ;;  %v6317_v47 = vld [vmem:[#allocation10_spill] sm:$0xff] }
 0x378   : > { %v2730_v6 = vmul.f32 %v2649_v10, %v2478_v4  ;;  %v5923_v63 = vpop.f32.mrf.mxu3 }
 0x379   : > { %v2350_v60 = vpop.f32.mrf.mxu0  ;;  %v2892_v29 = vld [vmem:[#allocation2 + $0xc1] ss:$2 sm:$0xff]  ;;  %v2846_v22 = vld [vmem:[#allocation2 + $0xc0] ss:$2 sm:$0xff] }
 0x37a   : > { %2810 = vst.msk [vmem:[#allocation2 + $0xd3] sm:$0xff] %vm364_vm1, %v2730_v6  ;;  %v2403_v9 = vadd.f32 %v2350_v60, %v2155_v12  ;;  %v3107_v25 = vld [vmem:[#allocation2 + $0xc2] ss:$2 sm:$0xff] }
 0x37c   : > { %v2443_v43 = vadd.f32 %v5582_v31, %v2403_v9  ;;  %v6313_v9 = vld [vmem:[#allocation9_spill] sm:$0xff] }
 0x37d   : > { %v1662_v26 = vadd.f32 %v6314_v42, %v6313_v9 }
 0x37e   : > { %v2479_v36 = vmax.f32 %v2443_v43, 0.0 }
 0x380   : > { %v2731_v50 = vmul.f32 %v2654_v1, %v2479_v36  ;;  %v1910_v36 = vadd.f32 %v6315_v34, %v1662_v26  ;;  %v2664_v1 = vpop.permute.xlu0 %2663  ;;  %v2674_v26 = vpop.permute.xlu2 %2673 }
 0x381   : > { %v2353_v16 = vpop.f32.mrf.mxu0 }
 0x382   : > { %2811 = vst.msk [vmem:[#allocation2 + $0xdb] sm:$0xff] %vm364_vm1, %v2731_v50  ;;  %v2404_v62 = vadd.f32 %v2353_v16, %v2156_v41  ;;  %v3670_v16 = vld [vmem:[#allocation2 + $0xb4] ss:$2 sm:$0xff] }
 0x384   : > { %v2444_v20 = vadd.f32 %v5582_v31, %v2404_v62  ;;  %4445 = vmatmul.msk.bf16.gmra.mxu0 %vm364_vm1, %v3683_v48  ;;  %v2158_v62 = vadd.f32 %v6316_v11, %v1910_v36 }
 0x386   : > { %v2480_v54 = vmax.f32 %v2444_v20, 0.0 }
 0x388   : > { %v2732_v0 = vmul.f32 %v2659_v24, %v2480_v54  ;;  %v3684_v54 = vpack.c.bf16 %v3670_v16, %v3669_v18 }
 0x389   : > { %v2355_v28 = vpop.f32.mrf.mxu0  ;;  %v2894_v8 = vld [vmem:[#allocation2 + $0xd1] ss:$2 sm:$0xff]  ;;  %v2848_v4 = vld [vmem:[#allocation2 + $0xd0] ss:$2 sm:$0xff]  ;;  %v2963_v41 = vpop.f32.mrf.mxu1 }
 0x38a   : > { %v3109_v10 = vld [vmem:[#allocation2 + $0xd2] ss:$2 sm:$0xff]  ;;  %2812 = vst.msk [vmem:[#allocation2 + $0xe3] sm:$0xff] %vm364_vm1, %v2732_v0  ;;  %v2405_v5 = vadd.f32 %v2355_v28, %v2157_v55  ;;  %v2909_v12 = vpack.c.bf16 %v2894_v8, %v2892_v29  ;;  %v2863_v6 = vpack.c.bf16 %v2848_v4, %v2846_v22  ;;  %v2669_v28 = vpop.permute.xlu1 %2668 }
 0x38b   : > { %v3124_v60 = vpack.c.bf16 %v3109_v10, %v3107_v25  ;;  %v6318_v55 = vld [vmem:[#allocation31_spill] sm:$0xff] }
 0x38c   : > { %v2445_v43 = vadd.f32 %v5582_v31, %v2405_v5  ;;  %4389 = vmatmul.msk.bf16.gmra.mxu1 %vm364_vm1, %v2909_v12  ;;  %4398 = vmatmul.msk.bf16.gmra.mxu2 %vm364_vm1, %v2863_v6  ;;  %v1663_v0 = vadd.f32 %v6318_v55, %v6317_v47  ;;  %v6319_v12 = vld [vmem:[#allocation11_spill] sm:$0xff] }
 0x38d   : > { %4408 = vmatmul.msk.bf16.gmra.mxu3 %vm364_vm1, %v3124_v60  ;;  %v1664_v6 = vadd.f32 %v5751_v15, %v6319_v12 }
 0x38e   : > { %v2481_v39 = vmax.f32 %v2445_v43, 0.0  ;;  %v1911_v22 = vadd.f32 %v5737_v2, %v1663_v0  ;;  %v3672_v43 = vld [vmem:[#allocation2 + $0xd4] ss:$2 sm:$0xff] }
 0x38f   : > { %v3047_v50 = vpop.f32.mrf.mxu2  ;;  %v1912_v9 = vadd.f32 %v5755_v44, %v1664_v6 }
 0x390   : > { %v2733_v48 = vmul.f32 %v2664_v1, %v2481_v39  ;;  %v3048_v19 = vadd.f32 %v3047_v50, %v2963_v41  ;;  %v3178_v30 = vpop.f32.mrf.mxu3  ;;  %v2159_v8 = vadd.f32 %v5742_v51, %v1911_v22  ;;  %v3671_v51 = vld [vmem:[#allocation2 + $0xc4] ss:$2 sm:$0xff] }
 0x391   : > { %v2358_v20 = vpop.f32.mrf.mxu0  ;;  %v2160_v2 = vadd.f32 %v5758_v59, %v1912_v9  ;;  %v3685_v39 = vpack.c.bf16 %v3672_v43, %v3671_v51  ;;  %v6320_v41 = vld [vmem:[#allocation12_spill] sm:$0xff]  ;;  %v2679_v59 = vpop.permute.xlu0 %2678 }
 0x392   : > { %2813 = vst.msk [vmem:[#allocation2 + $0xeb] sm:$0xff] %vm364_vm1, %v2733_v48  ;;  %v5935_v61 = vadd.f32 %v3178_v30, %v3048_v19  ;;  %v2406_v24 = vadd.f32 %v2358_v20, %v2158_v62  ;;  %v1665_v50 = vadd.f32 %v5768_v58, %v6320_v41  ;;  %v5960_v11 = vpop.f32.mrf.mxu1 }
 0x394   : > { %v2446_v29 = vadd.f32 %v5582_v31, %v2406_v24  ;;  %4446 = vmatmul.msk.bf16.gmra.mxu0 %vm364_vm1, %v3684_v54  ;;  %v1913_v44 = vadd.f32 %v5770_v21, %v1665_v50 }
 0x396   : > { %v2482_v25 = vmax.f32 %v2446_v29, 0.0  ;;  %v2161_v48 = vadd.f32 %v5773_v38, %v1913_v44 }
 0x397   : > { %v5962_v62 = vpop.f32.mrf.mxu2 }
 0x398   : > { %v2734_v4 = vmul.f32 %v2669_v28, %v2482_v25  ;;  %v5965_v18 = vpop.f32.mrf.mxu3  ;;  %v6321_v25 = vld [vmem:[#allocation13_spill] sm:$0xff] }
 0x399   : > { %v2360_v10 = vpop.f32.mrf.mxu0  ;;  %v2896_v19 = vld [vmem:[#allocation2 + $0xe1] ss:$2 sm:$0xff]  ;;  %v2850_v30 = vld [vmem:[#allocation2 + $0xe0] ss:$2 sm:$0xff]  ;;  %v1666_v28 = vadd.f32 %v5782_v45, %v6321_v25 }
 0x39a   : > { %2814 = vst.msk [vmem:[#allocation2 + $0xf3] sm:$0xff] %vm364_vm1, %v2734_v4  ;;  %v2407_v5 = vadd.f32 %v2360_v10, %v2159_v8  ;;  %v3111_v20 = vld [vmem:[#allocation2 + $0xe2] ss:$2 sm:$0xff]  ;;  %v2684_v4 = vpop.permute.xlu1 %2683 }
 0x39b   : > { %v1914_v8 = vadd.f32 %v5784_v13, %v1666_v28  ;;  %v3673_v43 = vld [vmem:[#allocation2 + $0xe4] ss:$2 sm:$0xff] }
 0x39c   : > { %v2447_v60 = vadd.f32 %v5582_v31, %v2407_v5  ;;  %v5955_v31 = vld [vmem:[%s6262_s2] ss:$0 sm:$0xff]  ;;  %v4431_v13 = vld [vmem:[%s6263_s3 + $0xa] sm:$0x3] }
 0x39d   : > { %v3587_v51 = vsel %vm419_vm0, %v4431_v13, 0 }
 0x39e   : > { %v2483_v42 = vmax.f32 %v2447_v60, 0.0  ;;  %v2162_v60 = vadd.f32 %v5787_v35, %v1914_v8  ;;  %3596 = vmatpush.bf16.msra.mxu3 %v3587_v51 }
 0x3a0   : > { %v2735_v34 = vmul.f32 %v2674_v26, %v2483_v42 }
 0x3a1   : > { %v2363_v36 = vpop.f32.mrf.mxu0 }
 0x3a2   : > { %2815 = vst.msk [vmem:[#allocation2 + $0xfb] sm:$0xff] %vm364_vm1, %v2735_v34  ;;  %v2408_v1 = vadd.f32 %v2363_v36, %v2160_v2  ;;  %v2699_v28 = vpop.permute.xlu1 %2698 }
 0x3a4   : > { %v2448_v15 = vadd.f32 %v5955_v31, %v2408_v1  ;;  %4447 = vmatmul.msk.bf16.gmra.mxu0 %vm364_vm1, %v3685_v39  ;;  %v6322_v1 = vld [vmem:[#allocation14_spill] sm:$0xff] }
 0x3a5   : > { %v1667_v35 = vadd.f32 %v5802_v52, %v6322_v1 }
 0x3a6   : > { %v2484_v16 = vmax.f32 %v2448_v15, 0.0  ;;  %v2689_v15 = vpop.permute.xlu2 %2688 }
 0x3a7   : > { %v1915_v41 = vadd.f32 %v5812_v32, %v1667_v35  ;;  %v4451_v32 = vld [vmem:[%s6263_s3 + $0xe] sm:$0x3] }
 0x3a8   : > { %v2736_v58 = vmul.f32 %v2679_v59, %v2484_v16 }
 0x3a9   : > { %v2365_v24 = vpop.f32.mrf.mxu0  ;;  %v2898_v54 = vld [vmem:[#allocation2 + $0xf1] ss:$2 sm:$0xff]  ;;  %v2852_v47 = vld [vmem:[#allocation2 + $0xf0] ss:$2 sm:$0xff]  ;;  %v2968_v5 = vpop.f32.mrf.mxu1  ;;  %v2163_v44 = vadd.f32 %v5820_v7, %v1915_v41 }
 0x3aa   : > { %v3113_v55 = vld [vmem:[#allocation2 + $0xf2] ss:$2 sm:$0xff]  ;;  %2816 = vst.msk [vmem:[#allocation2 + $0x103] sm:$0xff] %vm364_vm1, %v2736_v58  ;;  %v2409_v21 = vadd.f32 %v2365_v24, %v2161_v48  ;;  %v2910_v0 = vpack.c.bf16 %v2898_v54, %v2896_v19  ;;  %v2864_v29 = vpack.c.bf16 %v2852_v47, %v2850_v30  ;;  %v4461_v30 = vld [vmem:[%s6263_s3 + $0x10] sm:$0x3]  ;;  %v3868_v54 = vsel %vm419_vm0, %v4451_v32, 0  ;;  %v2694_v47 = vpop.permute.xlu0 %2693 }
 0x3ab   : > { %v3125_v22 = vpack.c.bf16 %v3113_v55, %v3111_v20  ;;  %v3674_v6 = vld [vmem:[#allocation2 + $0xf4] ss:$2 sm:$0xff]  ;;  %v4017_v24 = vsel %vm419_vm0, %v4461_v30, 0  ;;  %3877 = vmatpush.bf16.msra.mxu1 %v3868_v54 }
 0x3ac   : > { %v2449_v38 = vadd.f32 %v5955_v31, %v2409_v21  ;;  %4390 = vmatmul.msk.bf16.gmra.mxu1 %vm364_vm1, %v2910_v0  ;;  %4399 = vmatmul.msk.bf16.gmra.mxu2 %vm364_vm1, %v2864_v29  ;;  %v3686_v36 = vpack.c.bf16 %v3674_v6, %v3673_v43  ;;  %v6323_v58 = vld [vmem:[#allocation15_spill] sm:$0xff]  ;;  %v6324_v29 = vld [vmem:[#allocation16_spill] sm:$0xff] }
 0x3ad   : > { %4409 = vmatmul.msk.bf16.gmra.mxu3 %vm364_vm1, %v3125_v22  ;;  %v1668_v19 = vadd.f32 %v5827_v3, %v6323_v58  ;;  %4026 = vmatpush.bf16.msra.mxu2 %v4017_v24  ;;  %v1669_v22 = vadd.f32 %v5844_v53, %v6324_v29  ;;  %v3515_v58 = vld [vmem:[#allocation2 + $0x24] ss:$2 sm:$0xff] }
 0x3ae   : > { %v2485_v10 = vmax.f32 %v2449_v38, 0.0  ;;  %v2704_v1 = vpop.permute.xlu2 %2703 }
 0x3af   : > { %v3052_v12 = vpop.f32.mrf.mxu2  ;;  %v1916_v7 = vadd.f32 %v5830_v33, %v1668_v19  ;;  %v1917_v25 = vadd.f32 %v5846_v40, %v1669_v22  ;;  %v3231_v19 = vld [vmem:[#allocation2 + $0x12] ss:$2 sm:$0xff] }
 0x3b0   : > { %v2737_v9 = vmul.f32 %v2684_v4, %v2485_v10  ;;  %v3053_v42 = vadd.f32 %v3052_v12, %v2968_v5  ;;  %v3183_v45 = vpop.f32.mrf.mxu3  ;;  %v3233_v22 = vld [vmem:[#allocation2 + $0x32] ss:$2 sm:$0xff] }
 0x3b1   : > { %v2368_v26 = vpop.f32.mrf.mxu0  ;;  %v2164_v3 = vadd.f32 %v5835_v57, %v1916_v7  ;;  %v6008_v8 = vpop.f32.mrf.mxu1  ;;  %v2165_v57 = vadd.f32 %v5849_v46, %v1917_v25 }
 0x3b2   : > { %2817 = vst.msk [vmem:[#allocation2 + $0x10b] sm:$0xff] %vm364_vm1, %v2737_v9  ;;  %v5977_v2 = vadd.f32 %v3183_v45, %v3053_v42  ;;  %v2410_v34 = vadd.f32 %v2368_v26, %v2162_v60 }
 0x3b4   : > { %v2450_v39 = vadd.f32 %v5955_v31, %v2410_v34  ;;  %4448 = vmatmul.msk.bf16.gmra.mxu0 %vm364_vm1, %v3686_v36 }
 0x3b6   : > { %v2486_v50 = vmax.f32 %v2450_v39, 0.0 }
 0x3b7   : > { %v6010_v4 = vpop.f32.mrf.mxu2 }
 0x3b8   : > { %v2738_v59 = vmul.f32 %v2689_v15, %v2486_v50  ;;  %v6013_v60 = vpop.f32.mrf.mxu3 }
 0x3b9   : > { %v2370_v16 = vpop.f32.mrf.mxu0  ;;  %v2900_v5 = vld [vmem:[#allocation2 + $0x101] ss:$2 sm:$0xff]  ;;  %v2854_v12 = vld [vmem:[#allocation2 + $0x100] ss:$2 sm:$0xff] }
 0x3ba   : > { %2818 = vst.msk [vmem:[#allocation2 + $0x113] sm:$0xff] %vm364_vm1, %v2738_v59  ;;  %v2411_v48 = vadd.f32 %v2370_v16, %v2163_v44  ;;  %v3115_v6 = vld [vmem:[#allocation2 + $0x102] ss:$2 sm:$0xff]  ;;  %v3366_v16 = vld [vmem:[#allocation2 + $0x23] ss:$2 sm:$0xff] }
 0x3bb   : > { %v3675_v36 = vld [vmem:[#allocation2 + $0x104] ss:$2 sm:$0xff] }
 0x3bc   : > { %v2451_v52 = vadd.f32 %v5955_v31, %v2411_v48  ;;  %v3679_v48 = vld [vmem:[#allocation2 + $0x134] ss:$2 sm:$0xff] }
 0x3be   : > { %v2487_v20 = vmax.f32 %v2451_v52, 0.0  ;;  %v3364_v52 = vld [vmem:[#allocation2 + $0x13] ss:$2 sm:$0xff] }
 0x3bf   : > { %v3399_v7 = vpack.c.bf16 %v3366_v16, %v3364_v52  ;;  %v3525_v16 = vld [vmem:[#allocation2 + $0x74] ss:$2 sm:$0xff] }
 0x3c0   : > { %v2739_v55 = vmul.f32 %v2694_v47, %v2487_v20  ;;  %v3513_v20 = vld [vmem:[#allocation2 + $0x14] ss:$2 sm:$0xff] }
 0x3c1   : > { %v2373_v21 = vpop.f32.mrf.mxu0  ;;  %v3548_v54 = vpack.c.bf16 %v3515_v58, %v3513_v20  ;;  %v3382_v20 = vld [vmem:[#allocation2 + $0xa3] ss:$2 sm:$0xff] }
 0x3c2   : > { %2819 = vst.msk [vmem:[#allocation2 + $0x11b] sm:$0xff] %vm364_vm1, %v2739_v55  ;;  %v2412_v0 = vadd.f32 %v2373_v21, %v2164_v3  ;;  %v3234_v55 = vld [vmem:[#allocation2 + $0x42] ss:$2 sm:$0xff]  ;;  %v3370_v21 = vld [vmem:[#allocation2 + $0x43] ss:$2 sm:$0xff] }
 0x3c3   : > { %v3251_v25 = vpack.c.bf16 %v3234_v55, %v3233_v22  ;;  %v3380_v55 = vld [vmem:[#allocation2 + $0x93] ss:$2 sm:$0xff]  ;;  %v3529_v22 = vld [vmem:[#allocation2 + $0x94] ss:$2 sm:$0xff] }
 0x3c4   : > { %v2452_v33 = vadd.f32 %v5955_v31, %v2412_v0  ;;  %v3519_v0 = vld [vmem:[#allocation2 + $0x44] ss:$2 sm:$0xff] }
 0x3c6   : > { %v2488_v38 = vmax.f32 %v2452_v33, 0.0  ;;  %v3368_v33 = vld [vmem:[#allocation2 + $0x33] ss:$2 sm:$0xff] }
 0x3c8   : > { %v2740_v10 = vmul.f32 %v2699_v28, %v2488_v38  ;;  %v3400_v28 = vpack.c.bf16 %v3370_v21, %v3368_v33  ;;  %v3517_v38 = vld [vmem:[#allocation2 + $0x34] ss:$2 sm:$0xff] }
 0x3c9   : > { %v2375_v9 = vpop.f32.mrf.mxu0  ;;  %v2902_v53 = vld [vmem:[#allocation2 + $0x111] ss:$2 sm:$0xff]  ;;  %v2856_v42 = vld [vmem:[#allocation2 + $0x110] ss:$2 sm:$0xff]  ;;  %v2973_v39 = vpop.f32.mrf.mxu1 }
 0x3ca   : > { %v3117_v45 = vld [vmem:[#allocation2 + $0x112] ss:$2 sm:$0xff]  ;;  %2820 = vst.msk [vmem:[#allocation2 + $0x123] sm:$0xff] %vm364_vm1, %v2740_v10  ;;  %v2413_v40 = vadd.f32 %v2375_v9, %v2165_v57  ;;  %v2911_v26 = vpack.c.bf16 %v2902_v53, %v2900_v5  ;;  %v2865_v43 = vpack.c.bf16 %v2856_v42, %v2854_v12  ;;  %v3549_v57 = vpack.c.bf16 %v3519_v0, %v3517_v38  ;;  %v3236_v53 = vld [vmem:[#allocation2 + $0x62] ss:$2 sm:$0xff] }
 0x3cb   : > { %v3126_v34 = vpack.c.bf16 %v3117_v45, %v3115_v6  ;;  %v3676_v13 = vld [vmem:[#allocation2 + $0x114] ss:$2 sm:$0xff]  ;;  %v3374_v42 = vld [vmem:[#allocation2 + $0x63] ss:$2 sm:$0xff]  ;;  %v3523_v45 = vld [vmem:[#allocation2 + $0x64] ss:$2 sm:$0xff]  ;;  %v3403_v0 = vpack.c.bf16 %v3382_v20, %v3380_v55 }
 0x3cc   : > { %v3687_v51 = vpack.c.bf16 %v3676_v13, %v3675_v36  ;;  %v2453_v46 = vadd.f32 %v5955_v31, %v2413_v40  ;;  %4391 = vmatmul.msk.bf16.gmra.mxu1 %vm364_vm1, %v2911_v26  ;;  %4400 = vmatmul.msk.bf16.gmra.mxu2 %vm364_vm1, %v2865_v43  ;;  %v3232_v31 = vld [vmem:[#allocation2 + $0x22] ss:$2 sm:$0xff]  ;;  %v3235_v40 = vld [vmem:[#allocation2 + $0x52] ss:$2 sm:$0xff]  ;;  %v3372_v26 = vld [vmem:[#allocation2 + $0x53] ss:$2 sm:$0xff] }
 0x3cd   : > { %4410 = vmatmul.msk.bf16.gmra.mxu3 %vm364_vm1, %v3126_v34  ;;  %v3250_v32 = vpack.c.bf16 %v3232_v31, %v3231_v19  ;;  %v3252_v43 = vpack.c.bf16 %v3236_v53, %v3235_v40  ;;  %v3401_v34 = vpack.c.bf16 %v3374_v42, %v3372_v26  ;;  %v3521_v36 = vld [vmem:[#allocation2 + $0x54] ss:$2 sm:$0xff]  ;;  %v3543_v20 = vld [vmem:[#allocation2 + $0x104] ss:$2 sm:$0xff]  ;;  %v3392_v55 = vld [vmem:[#allocation2 + $0xf3] ss:$2 sm:$0xff] }
 0x3ce   : > { %4449 = vmatmul.msk.bf16.gmra.mxu0 %vm364_vm1, %v3687_v51  ;;  %v2489_v35 = vmax.f32 %v2453_v46, 0.0  ;;  %v3550_v13 = vpack.c.bf16 %v3523_v45, %v3521_v36  ;;  %v3242_v38 = vld [vmem:[#allocation2 + $0xc2] ss:$2 sm:$0xff] }
 0x3cf   : > { %v3057_v41 = vpop.f32.mrf.mxu2  ;;  %v3533_v45 = vld [vmem:[#allocation2 + $0xb4] ss:$2 sm:$0xff] }
 0x3d0   : > { %v2741_v50 = vmul.f32 %v2704_v1, %v2489_v35  ;;  %v3058_v15 = vadd.f32 %v3057_v41, %v2973_v39  ;;  %v3188_v44 = vpop.f32.mrf.mxu3  ;;  %v3238_v1 = vld [vmem:[#allocation2 + $0x82] ss:$2 sm:$0xff]  ;;  %v3378_v35 = vld [vmem:[#allocation2 + $0x83] ss:$2 sm:$0xff] }
 0x3d1   : > { %v6028_v47 = vpop.f32.mrf.mxu1  ;;  %v3527_v39 = vld [vmem:[#allocation2 + $0x84] ss:$2 sm:$0xff] }
 0x3d2   : > { %2821 = vst.msk [vmem:[#allocation2 + $0x12b] sm:$0xff] %vm364_vm1, %v2741_v50  ;;  %v6022_v59 = vadd.f32 %v3188_v44, %v3058_v15  ;;  %v3237_v50 = vld [vmem:[#allocation2 + $0x72] ss:$2 sm:$0xff]  ;;  %v3376_v15 = vld [vmem:[#allocation2 + $0x73] ss:$2 sm:$0xff] }
 0x3d3   : > { %v3253_v44 = vpack.c.bf16 %v3238_v1, %v3237_v50  ;;  %v3402_v31 = vpack.c.bf16 %v3378_v35, %v3376_v15  ;;  %v3244_v1 = vld [vmem:[#allocation2 + $0xe2] ss:$2 sm:$0xff]  ;;  %v3390_v35 = vld [vmem:[#allocation2 + $0xe3] ss:$2 sm:$0xff]  ;;  %v3243_v50 = vld [vmem:[#allocation2 + $0xd2] ss:$2 sm:$0xff] }
 0x3d4   : > { %v3388_v15 = vld [vmem:[#allocation2 + $0xd3] ss:$2 sm:$0xff] }
 0x3d7   : > { %v6030_v3 = vpop.f32.mrf.mxu2 }
 0x3d8   : > { %v6032_v29 = vpop.f32.mrf.mxu3 }
 0x3d9   : > { %v3677_v30 = vld [vmem:[#allocation2 + $0x124] ss:$2 sm:$0xff] }
 0x3da   : > { %v3688_v24 = vpack.c.bf16 %v3679_v48, %v3677_v30  ;;  %v3551_v48 = vpack.c.bf16 %v3527_v39, %v3525_v16  ;;  %v3539_v39 = vld [vmem:[#allocation2 + $0xe4] ss:$2 sm:$0xff]  ;;  %v3537_v16 = vld [vmem:[#allocation2 + $0xd4] ss:$2 sm:$0xff] }
 0x3dc   : > { %4412 = vmatmul.msk.bf16.vlgmr.msrb.gmra.mxu1 %vm364_vm1, %v3250_v32  ;;  %4422 = vmatmul.msk.bf16.vlgmr.msrb.gmra.mxu2 %vm364_vm1, %v3399_v7  ;;  %v3240_v7 = vld [vmem:[#allocation2 + $0xa2] ss:$2 sm:$0xff] }
 0x3dd   : > { %4432 = vmatmul.msk.bf16.vlgmr.msra.gmra.mxu3 %vm364_vm1, %v3548_v54  ;;  %v3239_v54 = vld [vmem:[#allocation2 + $0x92] ss:$2 sm:$0xff] }
 0x3de   : > { %4450 = vmatmul.msk.bf16.gmra.mxu0 %vm364_vm1, %v3688_v24  ;;  %v3531_v24 = vld [vmem:[#allocation2 + $0xa4] ss:$2 sm:$0xff]  ;;  %v3254_v21 = vpack.c.bf16 %v3240_v7, %v3239_v54 }
 0x3df   : > { %v3552_v33 = vpack.c.bf16 %v3531_v24, %v3529_v22  ;;  %v3245_v54 = vld [vmem:[#allocation2 + $0xf2] ss:$2 sm:$0xff] }
 0x3e0   : > { %v3541_v22 = vld [vmem:[#allocation2 + $0xf4] ss:$2 sm:$0xff] }
 0x3e9   : > { %v2978_v10 = vpop.f32.mrf.mxu1 }
 0x3ec   : > { %4413 = vmatmul.msk.bf16.gmra.mxu1 %vm364_vm1, %v3251_v25  ;;  %4423 = vmatmul.msk.bf16.gmra.mxu2 %vm364_vm1, %v3400_v28 }
 0x3ed   : > { %4433 = vmatmul.msk.bf16.gmra.mxu3 %vm364_vm1, %v3549_v57  ;;  %v3386_v57 = vld [vmem:[#allocation2 + $0xc3] ss:$2 sm:$0xff] }
 0x3ef   : > { %v3062_v5 = vpop.f32.mrf.mxu2 }
 0x3f0   : > { %v3063_v12 = vadd.f32 %v3062_v5, %v2978_v10  ;;  %v3193_v6 = vpop.f32.mrf.mxu3  ;;  %v3535_v10 = vld [vmem:[#allocation2 + $0xc4] ss:$2 sm:$0xff] }
 0x3f1   : > { %v6042_v51 = vpop.f32.mrf.mxu1  ;;  %v3553_v40 = vpack.c.bf16 %v3535_v10, %v3533_v45  ;;  %v3398_v45 = vld [vmem:[#allocation2 + $0x123] ss:$2 sm:$0xff] }
 0x3f2   : > { %v6037_v9 = vadd.f32 %v3193_v6, %v3063_v12  ;;  %v3241_v12 = vld [vmem:[#allocation2 + $0xb2] ss:$2 sm:$0xff]  ;;  %v3384_v6 = vld [vmem:[#allocation2 + $0xb3] ss:$2 sm:$0xff] }
 0x3f3   : > { %v3255_v53 = vpack.c.bf16 %v3242_v38, %v3241_v12  ;;  %v3404_v42 = vpack.c.bf16 %v3386_v57, %v3384_v6 }
 0x3f7   : > { %v6044_v46 = vpop.f32.mrf.mxu2 }
 0x3f8   : > { %v6046_v41 = vpop.f32.mrf.mxu3 }
 0x3fc   : > { %4414 = vmatmul.msk.bf16.gmra.mxu1 %vm364_vm1, %v3252_v43  ;;  %4424 = vmatmul.msk.bf16.gmra.mxu2 %vm364_vm1, %v3401_v34 }
 0x3fd   : > { %4434 = vmatmul.msk.bf16.gmra.mxu3 %vm364_vm1, %v3550_v13 }
 0x409   : > { %v2983_v58 = vpop.f32.mrf.mxu1 }
 0x40c   : > { %4415 = vmatmul.msk.bf16.gmra.mxu1 %vm364_vm1, %v3253_v44  ;;  %4425 = vmatmul.msk.bf16.gmra.mxu2 %vm364_vm1, %v3402_v31  ;;  %v3256_v44 = vpack.c.bf16 %v3244_v1, %v3243_v50  ;;  %v3405_v31 = vpack.c.bf16 %v3390_v35, %v3388_v15  ;;  %v3396_v1 = vld [vmem:[#allocation2 + $0x113] ss:$2 sm:$0xff] }
 0x40d   : > { %4435 = vmatmul.msk.bf16.gmra.mxu3 %vm364_vm1, %v3551_v48  ;;  %v3554_v48 = vpack.c.bf16 %v3539_v39, %v3537_v16  ;;  %v3407_v15 = vpack.c.bf16 %v3398_v45, %v3396_v1 }
 0x40f   : > { %v3067_v19 = vpop.f32.mrf.mxu2 }
 0x410   : > { %v3068_v52 = vadd.f32 %v3067_v19, %v2983_v58  ;;  %v3198_v30 = vpop.f32.mrf.mxu3 }
 0x411   : > { %v6056_v25 = vpop.f32.mrf.mxu1 }
 0x412   : > { %v6051_v32 = vadd.f32 %v3198_v30, %v3068_v52  ;;  %v3246_v52 = vld [vmem:[#allocation2 + $0x102] ss:$2 sm:$0xff]  ;;  %v3394_v30 = vld [vmem:[#allocation2 + $0x103] ss:$2 sm:$0xff] }
 0x417   : > { %v6058_v28 = vpop.f32.mrf.mxu2 }
 0x418   : > { %v6060_v5 = vpop.f32.mrf.mxu3 }
 0x41c   : > { %4416 = vmatmul.msk.bf16.gmra.mxu1 %vm364_vm1, %v3254_v21  ;;  %4426 = vmatmul.msk.bf16.gmra.mxu2 %vm364_vm1, %v3403_v0  ;;  %v3257_v21 = vpack.c.bf16 %v3246_v52, %v3245_v54  ;;  %v3406_v0 = vpack.c.bf16 %v3394_v30, %v3392_v55  ;;  %v3796_v54 = vld [vmem:[#allocation2 + $0x35] ss:$2 sm:$0xff]  ;;  %v3945_v55 = vld [vmem:[#allocation2 + $0x36] ss:$2 sm:$0xff] }
 0x41d   : > { %4436 = vmatmul.msk.bf16.gmra.mxu3 %vm364_vm1, %v3552_v33  ;;  %v3555_v33 = vpack.c.bf16 %v3543_v20, %v3541_v22  ;;  %v3794_v22 = vld [vmem:[#allocation2 + $0x25] ss:$2 sm:$0xff] }
 0x429   : > { %v2988_v26 = vpop.f32.mrf.mxu1 }
 0x42c   : > { %4417 = vmatmul.msk.bf16.gmra.mxu1 %vm364_vm1, %v3255_v53  ;;  %4427 = vmatmul.msk.bf16.gmra.mxu2 %vm364_vm1, %v3404_v42  ;;  %v3249_v42 = vld [vmem:[#allocation2 + $0x122] ss:$2 sm:$0xff] }
 0x42d   : > { %4437 = vmatmul.msk.bf16.gmra.mxu3 %vm364_vm1, %v3553_v40 }
 0x42f   : > { %v3072_v43 = vpop.f32.mrf.mxu2 }
 0x430   : > { %v3073_v34 = vadd.f32 %v3072_v43, %v2988_v26  ;;  %v3203_v36 = vpop.f32.mrf.mxu3  ;;  %v3547_v26 = vld [vmem:[#allocation2 + $0x124] ss:$2 sm:$0xff] }
 0x431   : > { %v6070_v58 = vpop.f32.mrf.mxu1 }
 0x432   : > { %v6065_v13 = vadd.f32 %v3203_v36, %v3073_v34  ;;  %v3247_v36 = vld [vmem:[#allocation2 + $0x112] ss:$2 sm:$0xff] }
 0x433   : > { %v3258_v50 = vpack.c.bf16 %v3249_v42, %v3247_v36  ;;  %v3947_v36 = vld [vmem:[#allocation2 + $0x46] ss:$2 sm:$0xff] }
 0x437   : > { %v6072_v19 = vpop.f32.mrf.mxu2 }
 0x438   : > { %v6074_v7 = vpop.f32.mrf.mxu3 }
 0x43c   : > { %4418 = vmatmul.msk.bf16.gmra.mxu1 %vm364_vm1, %v3256_v44  ;;  %4428 = vmatmul.msk.bf16.gmra.mxu2 %vm364_vm1, %v3405_v31  ;;  %v3545_v44 = vld [vmem:[#allocation2 + $0x114] ss:$2 sm:$0xff] }
 0x43d   : > { %4438 = vmatmul.msk.bf16.gmra.mxu3 %vm364_vm1, %v3554_v48  ;;  %v3556_v31 = vpack.c.bf16 %v3547_v26, %v3545_v44  ;;  %v3040_v48 = vadd.f32 %v5883_v27, %v5881_v17  ;;  %v3045_v27 = vadd.f32 %v5920_v49, %v5918_v14  ;;  %v3949_v26 = vld [vmem:[#allocation2 + $0x56] ss:$2 sm:$0xff]  ;;  %v3050_v49 = vadd.f32 %v5962_v62, %v5960_v11 }
 0x43e   : > { %v3055_v62 = vadd.f32 %v6010_v4, %v6008_v8  ;;  %v3060_v4 = vadd.f32 %v6030_v3, %v6028_v47  ;;  %v3065_v3 = vadd.f32 %v6044_v46, %v6042_v51  ;;  %v3070_v51 = vadd.f32 %v6058_v28, %v6056_v25  ;;  %v3967_v25 = vld [vmem:[#allocation2 + $0xe6] ss:$2 sm:$0xff] }
 0x43f   : > { %v3214_v20 = vadd.f32 %v5886_v56, %v3040_v48  ;;  %v3218_v44 = vadd.f32 %v5965_v18, %v3050_v49  ;;  %v3804_v48 = vld [vmem:[#allocation2 + $0x75] ss:$2 sm:$0xff]  ;;  %v3959_v49 = vld [vmem:[#allocation2 + $0xa6] ss:$2 sm:$0xff] }
 0x449   : > { %v2993_v24 = vpop.f32.mrf.mxu1 }
 0x44c   : > { %4419 = vmatmul.msk.bf16.gmra.mxu1 %vm364_vm1, %v3257_v21  ;;  %4429 = vmatmul.msk.bf16.gmra.mxu2 %vm364_vm1, %v3406_v0 }
 0x44d   : > { %4439 = vmatmul.msk.bf16.gmra.mxu3 %vm364_vm1, %v3555_v33  ;;  %v3943_v33 = vld [vmem:[#allocation2 + $0x26] ss:$2 sm:$0xff] }
 0x44f   : > { %v3077_v38 = vpop.f32.mrf.mxu2 }
 0x450   : > { %v3078_v57 = vadd.f32 %v3077_v38, %v2993_v24  ;;  %v3208_v10 = vpop.f32.mrf.mxu3 }
 0x451   : > { %v2995_v12 = vpop.f32.mrf.mxu1 }
 0x452   : > { %v6079_v6 = vadd.f32 %v3208_v10, %v3078_v57  ;;  %v3829_v57 = vpack.c.bf16 %v3796_v54, %v3794_v22  ;;  %v3978_v10 = vpack.c.bf16 %v3945_v55, %v3943_v33  ;;  %v3220_v33 = vadd.f32 %v6013_v60, %v3055_v62 }
 0x457   : > { %v3079_v53 = vpop.f32.mrf.mxu2 }
 0x458   : > { %v3080_v40 = vadd.f32 %v3079_v53, %v2995_v12  ;;  %v3210_v43 = vpop.f32.mrf.mxu3  ;;  %v3216_v53 = vadd.f32 %v5923_v63, %v3045_v27 }
 0x459   : > { %v3300_v34 = vpop.f32.mrf.mxu1 }
 0x45a   : > { %v6081_v35 = vadd.f32 %v3210_v43, %v3080_v40  ;;  %v3345_v39 = vadd.f32 %v3300_v34, %v5861_v23  ;;  %v3800_v40 = vld [vmem:[#allocation2 + $0x55] ss:$2 sm:$0xff]  ;;  %v3798_v34 = vld [vmem:[#allocation2 + $0x45] ss:$2 sm:$0xff] }
 0x45c   : > { %4420 = vmatmul.msk.bf16.gmra.mxu1 %vm364_vm1, %v3258_v50  ;;  %4430 = vmatmul.msk.bf16.gmra.mxu2 %vm364_vm1, %v3407_v15  ;;  %v3979_v50 = vpack.c.bf16 %v3949_v26, %v3947_v36 }
 0x45d   : > { %4440 = vmatmul.msk.bf16.gmra.mxu3 %vm364_vm1, %v3556_v31 }
 0x45f   : > { %v3449_v16 = vpop.f32.mrf.mxu2 }
 0x460   : > { %v6089_v52 = vadd.f32 %v3449_v16, %v3345_v39  ;;  %v3830_v39 = vpack.c.bf16 %v3800_v40, %v3798_v34 }
 0x461   : > { %v3302_v30 = vpop.f32.mrf.mxu1 }
 0x462   : > { %v3346_v23 = vadd.f32 %v3302_v30, %v3214_v20  ;;  %v3953_v30 = vld [vmem:[#allocation2 + $0x76] ss:$2 sm:$0xff] }
 0x467   : > { %v3451_v24 = vpop.f32.mrf.mxu2 }
 0x468   : > { %v6092_v21 = vadd.f32 %v3451_v24, %v3346_v23  ;;  %v3802_v23 = vld [vmem:[#allocation2 + $0x65] ss:$2 sm:$0xff]  ;;  %v3951_v24 = vld [vmem:[#allocation2 + $0x66] ss:$2 sm:$0xff] }
 0x469   : > { %v3305_v0 = vpop.f32.mrf.mxu1  ;;  %v3831_v55 = vpack.c.bf16 %v3804_v48, %v3802_v23  ;;  %v3224_v48 = vadd.f32 %v6046_v41, %v3065_v3  ;;  %v3816_v23 = vld [vmem:[#allocation2 + $0xd5] ss:$2 sm:$0xff]  ;;  %v3226_v41 = vadd.f32 %v6060_v5, %v3070_v51  ;;  %v3075_v5 = vadd.f32 %v6072_v19, %v6070_v58  ;;  %v3822_v19 = vld [vmem:[#allocation2 + $0x105] ss:$2 sm:$0xff] }
 0x46a   : > { %v3347_v38 = vadd.f32 %v3305_v0, %v5898_v37  ;;  %v3980_v0 = vpack.c.bf16 %v3953_v30, %v3951_v24  ;;  %v3965_v24 = vld [vmem:[#allocation2 + $0xd6] ss:$2 sm:$0xff] }
 0x46c   : > { %4452 = vmatmul.msk.bf16.vlgmr.msra.gmra.mxu1 %vm364_vm1, %v3829_v57  ;;  %4462 = vmatmul.msk.bf16.vlgmr.msra.gmra.mxu2 %vm364_vm1, %v3978_v10  ;;  %v3808_v10 = vld [vmem:[#allocation2 + $0x95] ss:$2 sm:$0xff] }
 0x46f   : > { %v3454_v17 = vpop.f32.mrf.mxu2 }
 0x470   : > { %v6099_v56 = vadd.f32 %v3454_v17, %v3347_v38  ;;  %v3957_v17 = vld [vmem:[#allocation2 + $0x96] ss:$2 sm:$0xff] }
 0x471   : > { %v3307_v12 = vpop.f32.mrf.mxu1 }
 0x472   : > { %v3348_v42 = vadd.f32 %v3307_v12, %v3216_v53  ;;  %v3806_v12 = vld [vmem:[#allocation2 + $0x85] ss:$2 sm:$0xff]  ;;  %v3955_v53 = vld [vmem:[#allocation2 + $0x86] ss:$2 sm:$0xff] }
 0x473   : > { %v3981_v40 = vpack.c.bf16 %v3957_v17, %v3955_v53 }
 0x477   : > { %v3456_v45 = vpop.f32.mrf.mxu2 }
 0x478   : > { %v6102_v37 = vadd.f32 %v3456_v45, %v3348_v42  ;;  %v3832_v45 = vpack.c.bf16 %v3808_v10, %v3806_v12  ;;  %v3598_v10 = vpop.f32.mrf.mxu3 }
 0x479   : > { %v3310_v43 = vpop.f32.mrf.mxu1 }
 0x47a   : > { %v3349_v1 = vadd.f32 %v3310_v43, %v5935_v61  ;;  %v3222_v43 = vadd.f32 %v6032_v29, %v3060_v4 }
 0x47c   : > { %4453 = vmatmul.msk.bf16.gmra.mxu1 %vm364_vm1, %v3830_v39  ;;  %4463 = vmatmul.msk.bf16.gmra.mxu2 %vm364_vm1, %v3979_v50  ;;  %v3961_v39 = vld [vmem:[#allocation2 + $0xb6] ss:$2 sm:$0xff] }
 0x47f   : > { %v3459_v14 = vpop.f32.mrf.mxu2 }
 0x480   : > { %v6109_v63 = vadd.f32 %v3459_v14, %v3349_v1  ;;  %v3812_v1 = vld [vmem:[#allocation2 + $0xb5] ss:$2 sm:$0xff]  ;;  %v3810_v14 = vld [vmem:[#allocation2 + $0xa5] ss:$2 sm:$0xff]  ;;  %v3600_v4 = vpop.f32.mrf.mxu3 }
 0x481   : > { %v3312_v15 = vpop.f32.mrf.mxu1 }
 0x482   : > { %v3350_v31 = vadd.f32 %v3312_v15, %v3218_v44  ;;  %v3833_v44 = vpack.c.bf16 %v3812_v1, %v3810_v14  ;;  %v3973_v14 = vld [vmem:[#allocation2 + $0x116] ss:$2 sm:$0xff] }
 0x487   : > { %v3461_v16 = vpop.f32.mrf.mxu2 }
 0x488   : > { %v6112_v61 = vadd.f32 %v3461_v16, %v3350_v31  ;;  %v3982_v31 = vpack.c.bf16 %v3961_v39, %v3959_v49 }
 0x489   : > { %v3315_v20 = vpop.f32.mrf.mxu1 }
 0x48a   : > { %v3351_v54 = vadd.f32 %v3315_v20, %v5977_v2 }
 0x48c   : > { %4454 = vmatmul.msk.bf16.gmra.mxu1 %vm364_vm1, %v3831_v55  ;;  %4464 = vmatmul.msk.bf16.gmra.mxu2 %vm364_vm1, %v3980_v0  ;;  %v3814_v55 = vld [vmem:[#allocation2 + $0xc5] ss:$2 sm:$0xff]  ;;  %v3963_v0 = vld [vmem:[#allocation2 + $0xc6] ss:$2 sm:$0xff] }
 0x48d   : > { %v3834_v62 = vpack.c.bf16 %v3816_v23, %v3814_v55  ;;  %v3826_v55 = vld [vmem:[#allocation2 + $0x125] ss:$2 sm:$0xff] }
 0x48f   : > { %v3464_v11 = vpop.f32.mrf.mxu2 }
 0x490   : > { %v6119_v18 = vadd.f32 %v3464_v11, %v3351_v54 }
 0x491   : > { %v3317_v22 = vpop.f32.mrf.mxu1 }
 0x492   : > { %v3352_v38 = vadd.f32 %v3317_v22, %v3220_v33  ;;  %v3983_v22 = vpack.c.bf16 %v3965_v24, %v3963_v0  ;;  %v3828_v24 = vld [vmem:[#allocation2 + $0x135] ss:$2 sm:$0xff]  ;;  %v3975_v0 = vld [vmem:[#allocation2 + $0x126] ss:$2 sm:$0xff] }
 0x497   : > { %v3466_v57 = vpop.f32.mrf.mxu2 }
 0x498   : > { %v6122_v2 = vadd.f32 %v3466_v57, %v3352_v38 }
 0x499   : > { %v3320_v27 = vpop.f32.mrf.mxu1 }
 0x49a   : > { %v3353_v42 = vadd.f32 %v3320_v27, %v6022_v59  ;;  %v3820_v27 = vld [vmem:[#allocation2 + $0xf5] ss:$2 sm:$0xff] }
 0x49c   : > { %4455 = vmatmul.msk.bf16.gmra.mxu1 %vm364_vm1, %v3832_v45  ;;  %4465 = vmatmul.msk.bf16.gmra.mxu2 %vm364_vm1, %v3981_v40 }
 0x49f   : > { %v3469_v8 = vpop.f32.mrf.mxu2 }
 0x4a0   : > { %v6129_v60 = vadd.f32 %v3469_v8, %v3353_v42  ;;  %v3818_v42 = vld [vmem:[#allocation2 + $0xe5] ss:$2 sm:$0xff]  ;;  %v3730_v8 = vpop.f32.mrf.mxu0 }
 0x4a1   : > { %v3322_v26 = vpop.f32.mrf.mxu1  ;;  %v3835_v45 = vpack.c.bf16 %v3820_v27, %v3818_v42 }
 0x4a2   : > { %v3354_v34 = vadd.f32 %v3322_v26, %v3222_v43  ;;  %v3228_v43 = vadd.f32 %v6074_v7, %v3075_v5 }
 0x4a7   : > { %v3471_v36 = vpop.f32.mrf.mxu2 }
 0x4a8   : > { %v6132_v59 = vadd.f32 %v3471_v36, %v3354_v34  ;;  %v3732_v39 = vpop.f32.mrf.mxu0 }
 0x4a9   : > { %v3325_v50 = vpop.f32.mrf.mxu1 }
 0x4aa   : > { %v3355_v15 = vadd.f32 %v3325_v50, %v6037_v9  ;;  %v3824_v50 = vld [vmem:[#allocation2 + $0x115] ss:$2 sm:$0xff] }
 0x4ac   : > { %4456 = vmatmul.msk.bf16.gmra.mxu1 %vm364_vm1, %v3833_v44  ;;  %4466 = vmatmul.msk.bf16.gmra.mxu2 %vm364_vm1, %v3982_v31  ;;  %v3971_v44 = vld [vmem:[#allocation2 + $0x106] ss:$2 sm:$0xff] }
 0x4ad   : > { %v3985_v3 = vpack.c.bf16 %v3973_v14, %v3971_v44 }
 0x4af   : > { %v3474_v47 = vpop.f32.mrf.mxu2 }
 0x4b0   : > { %v6139_v29 = vadd.f32 %v3474_v47, %v3355_v15  ;;  %v3603_v15 = vpop.f32.mrf.mxu3  ;;  %v3836_v47 = vpack.c.bf16 %v3824_v50, %v3822_v19  ;;  %v3735_v7 = vpop.f32.mrf.mxu0 }
 0x4b1   : > { %v3327_v16 = vpop.f32.mrf.mxu1 }
 0x4b2   : > { %v3356_v30 = vadd.f32 %v3327_v16, %v3224_v48 }
 0x4b7   : > { %v3476_v20 = vpop.f32.mrf.mxu2 }
 0x4b8   : > { %v6142_v9 = vadd.f32 %v3476_v20, %v3356_v30  ;;  %v3605_v23 = vpop.f32.mrf.mxu3 }
 0x4b9   : > { %v3330_v54 = vpop.f32.mrf.mxu1 }
 0x4ba   : > { %v3357_v11 = vadd.f32 %v3330_v54, %v6051_v32  ;;  %v3969_v32 = vld [vmem:[#allocation2 + $0xf6] ss:$2 sm:$0xff] }
 0x4bb   : > { %v3984_v40 = vpack.c.bf16 %v3969_v32, %v3967_v25 }
 0x4bc   : > { %4457 = vmatmul.msk.bf16.gmra.mxu1 %vm364_vm1, %v3834_v62  ;;  %4467 = vmatmul.msk.bf16.gmra.mxu2 %vm364_vm1, %v3983_v22  ;;  %v3737_v22 = vpop.f32.mrf.mxu0 }
 0x4bf   : > { %v3479_v46 = vpop.f32.mrf.mxu2 }
 0x4c0   : > { %v6150_v33 = vadd.f32 %v3479_v46, %v3357_v11  ;;  %v3643_v11 = vadd.f32 %v3598_v10, %v6089_v52  ;;  %v3837_v46 = vpack.c.bf16 %v3828_v24, %v3826_v55  ;;  %v3644_v10 = vadd.f32 %v3600_v4, %v6092_v21 }
 0x4c1   : > { %v3332_v38 = vpop.f32.mrf.mxu1 }
 0x4c2   : > { %v3358_v57 = vadd.f32 %v3332_v38, %v3226_v41  ;;  %v3775_v38 = vadd.f32 %v3730_v8, %v3643_v11  ;;  %v3645_v8 = vadd.f32 %v3603_v15, %v6099_v56 }
 0x4c4   : > { %v3740_v42 = vpop.f32.mrf.mxu0 }
 0x4c7   : > { %v3481_v17 = vpop.f32.mrf.mxu2 }
 0x4c8   : > { %v6152_v12 = vadd.f32 %v3481_v17, %v3358_v57  ;;  %v6178_v17 = vld [vmem:[%s6264_s4] ss:$0 sm:$0xff] }
 0x4c9   : > { %v3335_v53 = vpop.f32.mrf.mxu1 }
 0x4ca   : > { %v3359_v28 = vadd.f32 %v3335_v53, %v6065_v13 }
 0x4cc   : > { %4458 = vmatmul.msk.bf16.gmra.mxu1 %vm364_vm1, %v3835_v45  ;;  %4468 = vmatmul.msk.bf16.gmra.mxu2 %vm364_vm1, %v3984_v40 }
 0x4cf   : > { %v3484_v26 = vpop.f32.mrf.mxu2 }
 0x4d0   : > { %v6160_v34 = vadd.f32 %v3484_v26, %v3359_v28  ;;  %v3776_v28 = vadd.f32 %v3732_v39, %v3644_v10  ;;  %v3646_v39 = vadd.f32 %v3605_v23, %v6102_v37 }
 0x4d1   : > { %v3337_v36 = vpop.f32.mrf.mxu1 }
 0x4d2   : > { %v3360_v1 = vadd.f32 %v3337_v36, %v3228_v43  ;;  %v3777_v36 = vadd.f32 %v3735_v7, %v3645_v8  ;;  %v3778_v44 = vadd.f32 %v3737_v22, %v3646_v39 }
 0x4d7   : > { %v3486_v13 = vpop.f32.mrf.mxu2 }
 0x4d8   : > { %v6162_v49 = vadd.f32 %v3486_v13, %v3360_v1  ;;  %v3742_v1 = vpop.f32.mrf.mxu0 }
 0x4d9   : > { %v3340_v58 = vpop.f32.mrf.mxu1 }
 0x4da   : > { %v3361_v31 = vadd.f32 %v3340_v58, %v6079_v6  ;;  %v3977_v6 = vld [vmem:[#allocation2 + $0x136] ss:$2 sm:$0xff] }
 0x4db   : > { %v3986_v41 = vpack.c.bf16 %v3977_v6, %v3975_v0 }
 0x4dc   : > { %4459 = vmatmul.msk.bf16.gmra.mxu1 %vm364_vm1, %v3836_v47  ;;  %4469 = vmatmul.msk.bf16.gmra.mxu2 %vm364_vm1, %v3985_v3 }
 0x4df   : > { %v3489_v16 = vpop.f32.mrf.mxu2 }
 0x4e0   : > { %v6167_v48 = vadd.f32 %v3489_v16, %v3361_v31  ;;  %v3745_v47 = vpop.f32.mrf.mxu0 }
 0x4e1   : > { %v3342_v30 = vpop.f32.mrf.mxu1 }
 0x4e2   : > { %v3362_v20 = vadd.f32 %v3342_v30, %v6081_v35  ;;  %v3608_v35 = vpop.f32.mrf.mxu3 }
 0x4e3   : > { %v3647_v7 = vadd.f32 %v3608_v35, %v6109_v63 }
 0x4e5   : > { %v3779_v24 = vadd.f32 %v3740_v42, %v3647_v7 }
 0x4e7   : > { %v3491_v54 = vpop.f32.mrf.mxu2 }
 0x4e8   : > { %v6171_v62 = vadd.f32 %v3491_v54, %v3362_v20  ;;  %v3747_v11 = vpop.f32.mrf.mxu0 }
 0x4e9   : > { %v3879_v51 = vpop.f32.mrf.mxu1 }
 0x4ea   : > { %v3924_v57 = vadd.f32 %v3879_v51, %v3775_v38  ;;  %v3610_v40 = vpop.f32.mrf.mxu3 }
 0x4eb   : > { %v3648_v0 = vadd.f32 %v3610_v40, %v6112_v61 }
 0x4ec   : > { %4460 = vmatmul.msk.bf16.gmra.mxu1 %vm364_vm1, %v3837_v46  ;;  %4470 = vmatmul.msk.bf16.gmra.mxu2 %vm364_vm1, %v3986_v41 }
 0x4ed   : > { %v3780_v46 = vadd.f32 %v3742_v1, %v3648_v0 }
 0x4ef   : > { %v4028_v52 = vpop.f32.mrf.mxu2 }
 0x4f0   : > { %v4073_v27 = vadd.f32 %v4028_v52, %v3924_v57 }
 0x4f1   : > { %v3881_v32 = vpop.f32.mrf.mxu1 }
 0x4f2   : > { %v4095_v53 = vadd.f32 %v6178_v17, %v4073_v27  ;;  %v3925_v45 = vadd.f32 %v3881_v32, %v3776_v28  ;;  %v3613_v58 = vpop.f32.mrf.mxu3  ;;  %v3750_v27 = vpop.f32.mrf.mxu0 }
 0x4f3   : > { %v3649_v57 = vadd.f32 %v3613_v58, %v6119_v18 }
 0x4f4   : > { %v4113_v25 = vmax.f32 %v4095_v53, 0.0 }
 0x4f5   : > { %v3781_v53 = vadd.f32 %v3745_v47, %v3649_v57 }
 0x4f6   : > { %4132 = vst.msk [vmem:[%s6186_s14] sm:$0xff] %vm4131_vm2, %v4113_v25 }
 0x4f7   : > { %v4030_v21 = vpop.f32.mrf.mxu2 }
 0x4f8   : > { %v4074_v5 = vadd.f32 %v4030_v21, %v3925_v45 }
 0x4f9   : > { %v3884_v4 = vpop.f32.mrf.mxu1 }
 0x4fa   : > { %v4096_v26 = vadd.f32 %v6178_v17, %v4074_v5  ;;  %v3926_v13 = vadd.f32 %v3884_v4, %v3777_v36  ;;  %v3615_v20 = vpop.f32.mrf.mxu3  ;;  %v3752_v4 = vpop.f32.mrf.mxu0 }
 0x4fb   : > { %v3650_v45 = vadd.f32 %v3615_v20, %v6122_v2 }
 0x4fc   : > { %v4114_v43 = vmax.f32 %v4096_v26, 0.0 }
 0x4fd   : > { %v3782_v5 = vadd.f32 %v3747_v11, %v3650_v45 }
 0x4fe   : > { %4133 = vst.msk [vmem:[%s6186_s14 + $0x8] sm:$0xff] %vm4131_vm2, %v4114_v43 }
 0x4ff   : > { %v4033_v50 = vpop.f32.mrf.mxu2 }
 0x500   : > { %v4075_v14 = vadd.f32 %v4033_v50, %v3926_v13 }
 0x501   : > { %v3886_v19 = vpop.f32.mrf.mxu1 }
 0x502   : > { %v4097_v56 = vadd.f32 %v6178_v17, %v4075_v14  ;;  %v3927_v31 = vadd.f32 %v3886_v19, %v3778_v44  ;;  %v3618_v41 = vpop.f32.mrf.mxu3  ;;  %v3755_v19 = vpop.f32.mrf.mxu0 }
 0x503   : > { %v3651_v36 = vadd.f32 %v3618_v41, %v6129_v60 }
 0x504   : > { %v4115_v15 = vmax.f32 %v4097_v56, 0.0 }
 0x505   : > { %v3783_v14 = vadd.f32 %v3750_v27, %v3651_v36 }
 0x506   : > { %4134 = vst.msk [vmem:[%s6186_s14 + $0x10] sm:$0xff] %vm4131_vm2, %v4115_v15 }
 0x507   : > { %v4035_v3 = vpop.f32.mrf.mxu2 }
 0x508   : > { %v4076_v16 = vadd.f32 %v4035_v3, %v3927_v31 }
 0x509   : > { %v3889_v30 = vpop.f32.mrf.mxu1 }
 0x50a   : > { %v4098_v37 = vadd.f32 %v6178_v17, %v4076_v16  ;;  %v3928_v54 = vadd.f32 %v3889_v30, %v3779_v24  ;;  %v3620_v25 = vpop.f32.mrf.mxu3 }
 0x50b   : > { %v3652_v15 = vadd.f32 %v3620_v25, %v6132_v59 }
 0x50c   : > { %v4116_v23 = vmax.f32 %v4098_v37, 0.0 }
 0x50d   : > { %v3784_v7 = vadd.f32 %v3752_v4, %v3652_v15 }
 0x50e   : > { %4135 = vst.msk [vmem:[%s6186_s14 + $0x18] sm:$0xff] %vm4131_vm2, %v4116_v23  ;;  %v3757_v23 = vpop.f32.mrf.mxu0 }
 0x50f   : > { %v4038_v55 = vpop.f32.mrf.mxu2 }
 0x510   : > { %v4077_v6 = vadd.f32 %v4038_v55, %v3928_v54 }
 0x511   : > { %v3891_v22 = vpop.f32.mrf.mxu1 }
 0x512   : > { %v4099_v63 = vadd.f32 %v6178_v17, %v4077_v6  ;;  %v3929_v38 = vadd.f32 %v3891_v22, %v3780_v46  ;;  %v3623_v13 = vpop.f32.mrf.mxu3 }
 0x513   : > { %v3653_v37 = vadd.f32 %v3623_v13, %v6139_v29 }
 0x514   : > { %v4117_v51 = vmax.f32 %v4099_v63, 0.0 }
 0x515   : > { %v3785_v55 = vadd.f32 %v3755_v19, %v3653_v37 }
 0x516   : > { %4136 = vst.msk [vmem:[%s6186_s14 + $0x20] sm:$0xff] %vm4131_vm2, %v4117_v51  ;;  %v3760_v46 = vpop.f32.mrf.mxu0 }
 0x517   : > { %v4040_v35 = vpop.f32.mrf.mxu2 }
 0x518   : > { %v4078_v52 = vadd.f32 %v4040_v35, %v3929_v38 }
 0x519   : > { %v3894_v10 = vpop.f32.mrf.mxu1 }
 0x51a   : > { %v4100_v61 = vadd.f32 %v6178_v17, %v4078_v52  ;;  %v3930_v42 = vadd.f32 %v3894_v10, %v3781_v53  ;;  %v3625_v47 = vpop.f32.mrf.mxu3 }
 0x51b   : > { %v3654_v22 = vadd.f32 %v3625_v47, %v6142_v9 }
 0x51c   : > { %v4118_v32 = vmax.f32 %v4100_v61, 0.0 }
 0x51d   : > { %v3786_v38 = vadd.f32 %v3757_v23, %v3654_v22 }
 0x51e   : > { %4137 = vst.msk [vmem:[%s6186_s14 + $0x28] sm:$0xff] %vm4131_vm2, %v4118_v32 }
 0x51f   : > { %v4043_v28 = vpop.f32.mrf.mxu2 }
 0x520   : > { %v4079_v40 = vadd.f32 %v4043_v28, %v3930_v42  ;;  %v3762_v42 = vpop.f32.mrf.mxu0 }
 0x521   : > { %v3896_v21 = vpop.f32.mrf.mxu1 }
 0x522   : > { %v4101_v18 = vadd.f32 %v6178_v17, %v4079_v40  ;;  %v3931_v26 = vadd.f32 %v3896_v21, %v3782_v5  ;;  %v3628_v0 = vpop.f32.mrf.mxu3 }
 0x523   : > { %v3655_v10 = vadd.f32 %v3628_v0, %v6150_v33 }
 0x524   : > { %v4119_v8 = vmax.f32 %v4101_v18, 0.0 }
 0x525   : > { %v3787_v53 = vadd.f32 %v3760_v46, %v3655_v10 }
 0x526   : > { %4138 = vst.msk [vmem:[%s6186_s14 + $0x30] sm:$0xff] %vm4131_vm2, %v4119_v8 }
 0x527   : > { %v4045_v43 = vpop.f32.mrf.mxu2 }
 0x528   : > { %v4080_v1 = vadd.f32 %v4045_v43, %v3931_v26  ;;  %v3765_v4 = vpop.f32.mrf.mxu0 }
 0x529   : > { %v3899_v50 = vpop.f32.mrf.mxu1 }
 0x52a   : > { %v4102_v2 = vadd.f32 %v6178_v17, %v4080_v1  ;;  %v3932_v58 = vadd.f32 %v3899_v50, %v3783_v14  ;;  %v3630_v57 = vpop.f32.mrf.mxu3 }
 0x52b   : > { %v3656_v45 = vadd.f32 %v3630_v57, %v6152_v12 }
 0x52c   : > { %v4120_v39 = vmax.f32 %v4102_v2, 0.0 }
 0x52d   : > { %v3788_v5 = vadd.f32 %v3762_v42, %v3656_v45 }
 0x52e   : > { %4139 = vst.msk [vmem:[%s6186_s14 + $0x38] sm:$0xff] %vm4131_vm2, %v4120_v39 }
 0x52f   : > { %v4048_v56 = vpop.f32.mrf.mxu2 }
 0x530   : > { %v4081_v44 = vadd.f32 %v4048_v56, %v3932_v58  ;;  %v3767_v58 = vpop.f32.mrf.mxu0 }
 0x531   : > { %v3901_v31 = vpop.f32.mrf.mxu1 }
 0x532   : > { %v4103_v60 = vadd.f32 %v6178_v17, %v4081_v44  ;;  %v3933_v16 = vadd.f32 %v3901_v31, %v3784_v7  ;;  %v3633_v21 = vpop.f32.mrf.mxu3 }
 0x533   : > { %v3657_v36 = vadd.f32 %v3633_v21, %v6160_v34 }
 0x534   : > { %v4121_v3 = vmax.f32 %v4103_v60, 0.0 }
 0x535   : > { %v3789_v39 = vadd.f32 %v3765_v4, %v3657_v36 }
 0x536   : > { %4140 = vst.msk [vmem:[%s6186_s14 + $0x40] sm:$0xff] %vm4131_vm2, %v4121_v3 }
 0x537   : > { %v4050_v30 = vpop.f32.mrf.mxu2 }
 0x538   : > { %v4082_v20 = vadd.f32 %v4050_v30, %v3933_v16  ;;  %v3770_v37 = vpop.f32.mrf.mxu0 }
 0x539   : > { %v3904_v24 = vpop.f32.mrf.mxu1 }
 0x53a   : > { %v4104_v59 = vadd.f32 %v6178_v17, %v4082_v20  ;;  %v3934_v6 = vadd.f32 %v3904_v24, %v3785_v55  ;;  %v3635_v50 = vpop.f32.mrf.mxu3 }
 0x53b   : > { %v3658_v56 = vadd.f32 %v3635_v50, %v6162_v49 }
 0x53c   : > { %v4122_v54 = vmax.f32 %v4104_v59, 0.0 }
 0x53d   : > { %v3790_v60 = vadd.f32 %v3767_v58, %v3658_v56 }
 0x53e   : > { %4141 = vst.msk [vmem:[%s6186_s14 + $0x48] sm:$0xff] %vm4131_vm2, %v4122_v54 }
 0x53f   : > { %v4053_v11 = vpop.f32.mrf.mxu2 }
 0x540   : > { %v4083_v63 = vadd.f32 %v4053_v11, %v3934_v6 }
 0x541   : > { %v3906_v51 = vpop.f32.mrf.mxu1 }
 0x542   : > { %v4105_v29 = vadd.f32 %v6178_v17, %v4083_v63  ;;  %v3935_v35 = vadd.f32 %v3906_v51, %v3786_v38  ;;  %v3638_v47 = vpop.f32.mrf.mxu3 }
 0x543   : > { %v3659_v16 = vadd.f32 %v3638_v47, %v6167_v48  ;;  %v3772_v48 = vpop.f32.mrf.mxu0 }
 0x544   : > { %v4123_v41 = vmax.f32 %v4105_v29, 0.0 }
 0x545   : > { %v3791_v24 = vadd.f32 %v3770_v37, %v3659_v16 }
 0x546   : > { %4142 = vst.msk [vmem:[%s6186_s14 + $0x50] sm:$0xff] %vm4131_vm2, %v4123_v41 }
 0x547   : > { %v4055_v52 = vpop.f32.mrf.mxu2 }
 0x548   : > { %v4084_v61 = vadd.f32 %v4055_v52, %v3935_v35 }
 0x549   : > { %v3909_v27 = vpop.f32.mrf.mxu1 }
 0x54a   : > { %v4106_v9 = vadd.f32 %v6178_v17, %v4084_v61  ;;  %v3936_v25 = vadd.f32 %v3909_v27, %v3787_v53  ;;  %v3640_v54 = vpop.f32.mrf.mxu3 }
 0x54b   : > { %v3660_v0 = vadd.f32 %v3640_v54, %v6171_v62 }
 0x54c   : > { %v4124_v32 = vmax.f32 %v4106_v9, 0.0 }
 0x54d   : > { %v3792_v51 = vadd.f32 %v3772_v48, %v3660_v0 }
 0x54e   : > { %4143 = vst.msk [vmem:[%s6186_s14 + $0x58] sm:$0xff] %vm4131_vm2, %v4124_v32 }
 0x54f   : > { %v4058_v28 = vpop.f32.mrf.mxu2 }
 0x550   : > { %v4085_v40 = vadd.f32 %v4058_v28, %v3936_v25 }
 0x551   : > { %v3911_v18 = vpop.f32.mrf.mxu1 }
 0x552   : > { %v4107_v33 = vadd.f32 %v6178_v17, %v4085_v40  ;;  %v3937_v26 = vadd.f32 %v3911_v18, %v3788_v5 }
 0x554   : > { %v4125_v8 = vmax.f32 %v4107_v33, 0.0 }
 0x556   : > { %4144 = vst.msk [vmem:[%s6186_s14 + $0x60] sm:$0xff] %vm4131_vm2, %v4125_v8 }
 0x557   : > { %v4060_v43 = vpop.f32.mrf.mxu2 }
 0x558   : > { %v4086_v1 = vadd.f32 %v4060_v43, %v3937_v26 }
 0x559   : > { %v3914_v13 = vpop.f32.mrf.mxu1 }
 0x55a   : > { %v4108_v12 = vadd.f32 %v6178_v17, %v4086_v1  ;;  %v3938_v14 = vadd.f32 %v3914_v13, %v3789_v39 }
 0x55c   : > { %v4126_v2 = vmax.f32 %v4108_v12, 0.0 }
 0x55e   : > { %4145 = vst.msk [vmem:[%s6186_s14 + $0x68] sm:$0xff] %vm4131_vm2, %v4126_v2 }
 0x55f   : > { %v4063_v19 = vpop.f32.mrf.mxu2 }
 0x560   : > { %v4087_v15 = vadd.f32 %v4063_v19, %v3938_v14 }
 0x561   : > { %v3916_v44 = vpop.f32.mrf.mxu1 }
 0x562   : > { %v4109_v34 = vadd.f32 %v6178_v17, %v4087_v15  ;;  %v3939_v3 = vadd.f32 %v3916_v44, %v3790_v60 }
 0x564   : > { %v4127_v31 = vmax.f32 %v4109_v34, 0.0 }
 0x566   : > { %4146 = vst.msk [vmem:[%s6186_s14 + $0x70] sm:$0xff] %vm4131_vm2, %v4127_v31 }
 0x567   : > { %v4065_v7 = vpop.f32.mrf.mxu2 }
 0x568   : > { %v4088_v30 = vadd.f32 %v4065_v7, %v3939_v3 }
 0x569   : > { %v3919_v20 = vpop.f32.mrf.mxu1 }
 0x56a   : > { %v4110_v49 = vadd.f32 %v6178_v17, %v4088_v30  ;;  %v3940_v59 = vadd.f32 %v3919_v20, %v3791_v24 }
 0x56c   : > { %v4128_v23 = vmax.f32 %v4110_v49, 0.0 }
 0x56e   : > { %4147 = vst.msk [vmem:[%s6186_s14 + $0x78] sm:$0xff] %vm4131_vm2, %v4128_v23 }
 0x56f   : > { %v4068_v55 = vpop.f32.mrf.mxu2 }
 0x570   : > { %v4089_v6 = vadd.f32 %v4068_v55, %v3940_v59 }
 0x571   : > { %v3921_v22 = vpop.f32.mrf.mxu1 }
 0x572   : > { %v4111_v11 = vadd.f32 %v6178_v17, %v4089_v6  ;;  %v3941_v29 = vadd.f32 %v3921_v22, %v3792_v51 }
 0x574   : > { %v4129_v63 = vmax.f32 %v4111_v11, 0.0 }
 0x576   : > { %4148 = vst.msk [vmem:[%s6186_s14 + $0x80] sm:$0xff] %vm4131_vm2, %v4129_v63 }
 0x577   : > { %v4070_v46 = vpop.f32.mrf.mxu2 }
 0x578   : > { %v4090_v41 = vadd.f32 %v4070_v46, %v3941_v29 }
 0x57a   : > { %v4112_v38 = vadd.f32 %v6178_v17, %v4090_v41 }
 0x57c   : > { %v4130_v35 = vmax.f32 %v4112_v38, 0.0 }
 0x57e   : > { %4149 = vst.msk [vmem:[%s6186_s14 + $0x88] sm:$0xff] %vm4131_vm2, %v4130_v35 }
 0x57f PF: > { %s16_s21 = sadd.s32 1, %s4500_s21  }
 0x580   : > { %p13_p4 = scmp.ge.s32.totalorder %s16_s21, 4  }
 0x582   :  { %15 = sbr.rel (!%p13_p4) target bundleno = 1 (0x1), region = 217 }

</bundles_post_ra>
